<compile_context>
chip_gen: v6e
topology: v6e:2x2x1
jax: 0.10.0
libtpu: 0.0.40
codegen_flags: <defaults>
</compile_context>

<pallas_src>
import functools

import jax
import jax.numpy as jnp
from jax import lax
from jax.experimental import pallas as pl
from jax.experimental.pallas import tpu as pltpu

BN_EPS = 1e-5


# --------------------------- Pallas kernel -----------------------------------

def _resblock_kernel(x_ref, w1_ref, b1_ref, w2_ref, b2_ref, o_ref,
                     xp1_ref, xp2_ref, acc_ref, *, H, W, RT):
    """Fused ResBlock for one batch element (NHWC).

    x_ref  : (1, H, W, C)        input block (f32)
    w*_ref : (3, 3*C, C)   bf16  conv weights, BN-scale folded in, laid out as
                                 [kx, ky*C + cin, cout] (ky fused into K)
    b*_ref : (1, C)        f32   folded BN shift (accumulator init)
    o_ref  : (1, H, W, C)        output block
    xp1/xp2: (H+2, W+2, C) bf16  VMEM scratch, zero-padded conv inputs
    acc_ref: (RT*W, C)     f32   VMEM matmul accumulator
    """
    C = o_ref.shape[3]
    n_chunks = H // RT
    dt = xp1_ref.dtype

    # ---- zero ONLY the 1-px padding border (interiors are overwritten) ------
    # Not gated on program_id: under "parallel" semantics each core has its
    # own scratch and runs its own subset of grid steps.
    zrow = jnp.zeros((1, W + 2, C), dt)
    zcol = jnp.zeros((H + 2, 1, C), dt)
    for xp in (xp1_ref, xp2_ref):
        xp[0:1, :, :] = zrow
        xp[H + 1:H + 2, :, :] = zrow
        xp[:, 0:1, :] = zcol
        xp[:, W + 1:W + 2, :] = zcol

    # conv1 input interior: cast activations to bf16 once for the MXU.
    xp1_ref[1:H + 1, 1:W + 1, :] = x_ref[0].astype(dt)

    # BN shifts broadcast once (JAX does not CSE broadcast_in_dim, so do not
    # re-broadcast inside the chunk loops).
    b1_full = jnp.broadcast_to(b1_ref[...], (RT * W, C)).astype(jnp.float32)
    b2_full = jnp.broadcast_to(b2_ref[...], (RT * W, C)).astype(jnp.float32)

    def conv_chunk(xp_ref, w_ref, r, bias_full):
        # 3x3 conv (stride 1, pad 1) for output rows [r*RT, (r+1)*RT).
        # BN shift = accumulator init, BN scale folded into w.  ky taps are
        # fused into the contraction (K = 3*C): one (RT*W, 3C) x (3C, C)
        # matmul per kx, accumulated in VMEM (`+=` -> MRB in-place on v7x).
        acc_ref[...] = bias_full
        for kx in range(3):
            sh = xp_ref[r * RT:r * RT + RT + 2, kx:kx + W, :]     # (RT+2, W, C)
            lhs = jnp.concatenate(
                [sh[0:RT], sh[1:RT + 1], sh[2:RT + 2]], axis=-1   # (RT, W, 3C)
            ).reshape(RT * W, 3 * C)                              # layout-preserving
            acc_ref[...] += jnp.dot(lhs, w_ref[kx],
                                    preferred_element_type=jnp.float32)
        return acc_ref[...]                                       # (RT*W, C) f32

    # ---- conv1 + BN1 + ReLU -> xp2 interior (stays in VMEM, no HBM trip) ----
    for r in range(n_chunks):
        y = jnp.maximum(conv_chunk(xp1_ref, w1_ref, r, b1_full), 0.0)
        xp2_ref[1 + r * RT:1 + (r + 1) * RT, 1:W + 1, :] = (
            y.reshape(RT, W, C).astype(dt))

    # ---- conv2 + BN2 + identity + ReLU -> output (lane-dense stores) --------
    for r in range(n_chunks):
        y = conv_chunk(xp2_ref, w2_ref, r, b2_full)
        identity = x_ref[0, r * RT:(r + 1) * RT, :, :].astype(jnp.float32)
        y = jnp.maximum(y + identity.reshape(RT * W, C), 0.0)
        o_ref[0, r * RT:(r + 1) * RT, :, :] = (
            y.reshape(RT, W, C).astype(o_ref.dtype))


# --------------------------- wrapper ------------------------------------------

def resblock_forward(params, x_nhwc, *, rt=None):
    """Fused ResBlock forward. x_nhwc: (N, H, W, C). Returns (N, H, W, C)."""
    N, H, W, C = x_nhwc.shape

    if rt is None:
        # v6e/v7x (256-wide MXU): RT=16 -> M = RT*W = 256 rows per matmul.
        # v5e (128-wide MXU): RT=8 gives no fill benefit beyond 128 rows.
        try:
            wide_mxu = "v5" not in jax.devices()[0].device_kind.lower()
        except Exception:
            wide_mxu = True
        if wide_mxu and H >= 16 and H % 16 == 0:
            rt = 16
        elif H % 8 == 0:
            rt = 8
        else:
            rt = H  # TODO(synk): ragged H needs a proper padded-chunk scheme.

    kernel = functools.partial(_resblock_kernel, H=H, W=W, RT=rt)
    return pl.pallas_call(
        kernel,
        grid=(N,),
        out_shape=jax.ShapeDtypeStruct((N, H, W, C), x_nhwc.dtype),
        in_specs=[
            pl.BlockSpec((1, H, W, C), lambda n: (n, 0, 0, 0)),
            pl.BlockSpec((3, 3 * C, C), lambda n: (0, 0, 0)),   # w1 (constant)
            pl.BlockSpec((1, C), lambda n: (0, 0)),             # b1
            pl.BlockSpec((3, 3 * C, C), lambda n: (0, 0, 0)),   # w2 (constant)
            pl.BlockSpec((1, C), lambda n: (0, 0)),             # b2
        ],
        out_specs=pl.BlockSpec((1, H, W, C), lambda n: (n, 0, 0, 0)),
        scratch_shapes=[
            pltpu.VMEM((H + 2, W + 2, C), jnp.bfloat16),   # padded conv1 input
            pltpu.VMEM((H + 2, W + 2, C), jnp.bfloat16),   # padded conv2 input
            pltpu.VMEM((rt * W, C), jnp.float32),          # MXU accumulator
        ],
        compiler_params=pltpu.CompilerParams(
            dimension_semantics=("parallel",),
            vmem_limit_bytes=8 * 1024 * 1024,
        ),
    )(x_nhwc, params["w1"], params["b1"], params["w2"], params["b2"])


def resblock_forward_nchw(params, x_nchw, **kw):
    """PyTorch-layout (NCHW) drop-in wrapper.

    NOTE: each transpose here is an extra HBM round trip; prefer keeping the
    surrounding model in NHWC and calling resblock_forward directly.
    """
    x = jnp.transpose(x_nchw, (0, 2, 3, 1))
    return jnp.transpose(resblock_forward(params, x, **kw), (0, 3, 1, 2))


# --------------------------- parameters --------------------------------------

def init_params(key, c):
    """Raw (PyTorch-equivalent) parameters: f32 HWIO weights + BN stats."""
    k1, k2, k3, k4 = jax.random.split(key, 4)
    std = (2.0 / (9 * c)) ** 0.5

    def conv_w(k):
        return std * jax.random.normal(k, (3, 3, c, c), jnp.float32)

    def bn(k):
        kg, kb, km, kv = jax.random.split(k, 4)
        return {
            "gamma": jax.random.uniform(kg, (c,), jnp.float32, 0.5, 1.5),
            "beta": 0.1 * jax.random.normal(kb, (c,), jnp.float32),
            "mean": 0.1 * jax.random.normal(km, (c,), jnp.float32),
            "var": jax.random.uniform(kv, (c,), jnp.float32, 0.5, 1.5),
        }

    return {"w1": conv_w(k1), "w2": conv_w(k2), "bn1": bn(k3), "bn2": bn(k4)}


def prepare_params(raw, eps=BN_EPS):
    """Fold BN (inference mode) into the weights / shift, fuse ky into K,
    and cast weights to bf16 for the MXU.  One-time, offline cost."""
    def fold(w, bn):
        c = w.shape[2]
        scale = bn["gamma"] / jnp.sqrt(bn["var"] + eps)          # (C,)
        shift = bn["beta"] - bn["mean"] * scale                  # (C,)
        w_s = (w * scale[None, None, None, :]).astype(jnp.bfloat16)
        # (ky, kx, cin, cout) -> (kx, ky*C + cin, cout): ky stacked along K.
        w_f = jnp.transpose(w_s, (1, 0, 2, 3)).reshape(3, 3 * c, c)
        return w_f, shift.reshape(1, c).astype(jnp.float32)

    w1, b1 = fold(raw["w1"], raw["bn1"])
    w2, b2 = fold(raw["w2"], raw["bn2"])
    return {"w1": w1, "b1": b1, "w2": w2, "b2": b2}


# --------------------------- pure-JAX reference --------------------------------

def resblock_reference(raw, x_nhwc, eps=BN_EPS):
    def conv(x, w):
        return lax.conv_general_dilated(
            x, w, window_strides=(1, 1), padding=((1, 1), (1, 1)),
            dimension_numbers=("NHWC", "HWIO", "NHWC"))

    def bn(x, p):
        return (x - p["mean"]) / jnp.sqrt(p["var"] + eps) * p["gamma"] + p["beta"]

    h = jnp.maximum(bn(conv(x_nhwc, raw["w1"]), raw["bn1"]), 0.0)
    y = bn(conv(h, raw["w2"]), raw["bn2"]) + x_nhwc
    return jnp.maximum(y, 0.0)


# --------------------------- main ---------------------------------------------

if __name__ == "__main__":
    key = jax.random.PRNGKey(0)
    kx_, kp = jax.random.split(key)

    # ResBlock as used in effSAM_CD's resCD: 128->128 channels, H/16 spatial.
    # NHWC layout end-to-end (C=128 on the lane axis).
    N, H, W, C = 2, 16, 16, 128
    x = jax.random.normal(kx_, (N, H, W, C), jnp.float32)

    raw = init_params(kp, C)
    params = prepare_params(raw)

    out = resblock_forward(params, x)
    jax.block_until_ready(out)
    assert out.shape == (N, H, W, C)

    ref = resblock_reference(raw, x)
    err = float(jnp.max(jnp.abs(out - ref)))
    # bf16 weights / bf16 conv1 activations -> small deviation vs f32 reference.
    assert err < 0.2, f"max abs error vs reference: {err}"

    print("KERNEL_OK")
</pallas_src>

<mosaic_0001>
module attributes {stable_mosaic.version = 11 : i64} {
  func.func @_resblock_kernel(%arg0: i32, %arg1: memref<1x16x16x128xf32, #tpu.memory_space<vmem>>, %arg2: memref<3x384x128xbf16, #tpu.memory_space<vmem>>, %arg3: memref<1x128xf32, #tpu.memory_space<vmem>>, %arg4: memref<3x384x128xbf16, #tpu.memory_space<vmem>>, %arg5: memref<1x128xf32, #tpu.memory_space<vmem>>, %arg6: memref<1x16x16x128xf32, #tpu.memory_space<vmem>>, %arg7: memref<18x18x128xbf16, #tpu.memory_space<vmem>>, %arg8: memref<18x18x128xbf16, #tpu.memory_space<vmem>>, %arg9: memref<256x128xf32, #tpu.memory_space<vmem>>) attributes {dimension_semantics = [#tpu.dimension_semantics<parallel>], iteration_bounds = array<i64: 2>, scalar_prefetch = 0 : i64, scratch_operands = 3 : i64, tpu.core_type = #tpu.core_type<tc>, window_params = [{transform_indices = @transform_0, window_bounds = array<i64: 1, 16, 16, 128>}, {pipeline_mode = #tpu.pipeline_mode<synchronous>, transform_indices = @transform_1, window_bounds = array<i64: 3, 384, 128>}, {pipeline_mode = #tpu.pipeline_mode<synchronous>, transform_indices = @transform_2, window_bounds = array<i64: 1, 128>}, {pipeline_mode = #tpu.pipeline_mode<synchronous>, transform_indices = @transform_3, window_bounds = array<i64: 3, 384, 128>}, {pipeline_mode = #tpu.pipeline_mode<synchronous>, transform_indices = @transform_4, window_bounds = array<i64: 1, 128>}, {transform_indices = @transform_5, window_bounds = array<i64: 1, 16, 16, 128>}]} {
    %cst = arith.constant 0.000000e+00 : bf16
    %0 = vector.broadcast %cst : bf16 to vector<1x18x128xbf16>
    %cst_0 = arith.constant 0.000000e+00 : bf16
    %1 = vector.broadcast %cst_0 : bf16 to vector<18x1x128xbf16>
    %c0 = arith.constant 0 : index
    %c0_1 = arith.constant 0 : index
    %c0_2 = arith.constant 0 : index
    %2 = vector.load %arg7[%c0, %c0_1, %c0_2] : memref<18x18x128xbf16, #tpu.memory_space<vmem>>, vector<1x18x128xbf16>
    tpu.vector_store %arg7[%c0, %c0_1, %c0_2], %0 {strides = array<i32>} : memref<18x18x128xbf16, #tpu.memory_space<vmem>>, vector<1x18x128xbf16>,
    %c17 = arith.constant 17 : index
    %c0_3 = arith.constant 0 : index
    %c0_4 = arith.constant 0 : index
    %3 = vector.load %arg7[%c17, %c0_3, %c0_4] : memref<18x18x128xbf16, #tpu.memory_space<vmem>>, vector<1x18x128xbf16>
    tpu.vector_store %arg7[%c17, %c0_3, %c0_4], %0 {strides = array<i32>} : memref<18x18x128xbf16, #tpu.memory_space<vmem>>, vector<1x18x128xbf16>,
    %c0_5 = arith.constant 0 : index
    %c0_6 = arith.constant 0 : index
    %c0_7 = arith.constant 0 : index
    %4 = vector.load %arg7[%c0_5, %c0_6, %c0_7] : memref<18x18x128xbf16, #tpu.memory_space<vmem>>, vector<18x1x128xbf16>
    tpu.vector_store %arg7[%c0_5, %c0_6, %c0_7], %1 {strides = array<i32>} : memref<18x18x128xbf16, #tpu.memory_space<vmem>>, vector<18x1x128xbf16>,
    %c0_8 = arith.constant 0 : index
    %c17_9 = arith.constant 17 : index
    %c0_10 = arith.constant 0 : index
    %5 = vector.load %arg7[%c0_8, %c17_9, %c0_10] : memref<18x18x128xbf16, #tpu.memory_space<vmem>>, vector<18x1x128xbf16>
    tpu.vector_store %arg7[%c0_8, %c17_9, %c0_10], %1 {strides = array<i32>} : memref<18x18x128xbf16, #tpu.memory_space<vmem>>, vector<18x1x128xbf16>,
    %c0_11 = arith.constant 0 : index
    %c0_12 = arith.constant 0 : index
    %c0_13 = arith.constant 0 : index
    %6 = vector.load %arg8[%c0_11, %c0_12, %c0_13] : memref<18x18x128xbf16, #tpu.memory_space<vmem>>, vector<1x18x128xbf16>
    tpu.vector_store %arg8[%c0_11, %c0_12, %c0_13], %0 {strides = array<i32>} : memref<18x18x128xbf16, #tpu.memory_space<vmem>>, vector<1x18x128xbf16>,
    %c17_14 = arith.constant 17 : index
    %c0_15 = arith.constant 0 : index
    %c0_16 = arith.constant 0 : index
    %7 = vector.load %arg8[%c17_14, %c0_15, %c0_16] : memref<18x18x128xbf16, #tpu.memory_space<vmem>>, vector<1x18x128xbf16>
    tpu.vector_store %arg8[%c17_14, %c0_15, %c0_16], %0 {strides = array<i32>} : memref<18x18x128xbf16, #tpu.memory_space<vmem>>, vector<1x18x128xbf16>,
    %c0_17 = arith.constant 0 : index
    %c0_18 = arith.constant 0 : index
    %c0_19 = arith.constant 0 : index
    %8 = vector.load %arg8[%c0_17, %c0_18, %c0_19] : memref<18x18x128xbf16, #tpu.memory_space<vmem>>, vector<18x1x128xbf16>
    tpu.vector_store %arg8[%c0_17, %c0_18, %c0_19], %1 {strides = array<i32>} : memref<18x18x128xbf16, #tpu.memory_space<vmem>>, vector<18x1x128xbf16>,
    %c0_20 = arith.constant 0 : index
    %c17_21 = arith.constant 17 : index
    %c0_22 = arith.constant 0 : index
    %9 = vector.load %arg8[%c0_20, %c17_21, %c0_22] : memref<18x18x128xbf16, #tpu.memory_space<vmem>>, vector<18x1x128xbf16>
    tpu.vector_store %arg8[%c0_20, %c17_21, %c0_22], %1 {strides = array<i32>} : memref<18x18x128xbf16, #tpu.memory_space<vmem>>, vector<18x1x128xbf16>,
    %c0_23 = arith.constant 0 : index
    %c0_24 = arith.constant 0 : index
    %c0_25 = arith.constant 0 : index
    %c0_26 = arith.constant 0 : index
    %10 = vector.load %arg1[%c0_23, %c0_24, %c0_25, %c0_26] : memref<1x16x16x128xf32, #tpu.memory_space<vmem>>, vector<1x16x16x128xf32>
    %11 = vector.shape_cast %10 : vector<1x16x16x128xf32> to vector<16x16x128xf32>
    %12 = arith.truncf %11 : vector<16x16x128xf32> to vector<16x16x128xbf16>
    %c1 = arith.constant 1 : index
    %c1_27 = arith.constant 1 : index
    %c0_28 = arith.constant 0 : index
    %13 = vector.load %arg7[%c1, %c1_27, %c0_28] : memref<18x18x128xbf16, #tpu.memory_space<vmem>>, vector<16x16x128xbf16>
    tpu.vector_store %arg7[%c1, %c1_27, %c0_28], %12 {strides = array<i32>} : memref<18x18x128xbf16, #tpu.memory_space<vmem>>, vector<16x16x128xbf16>,
    %c0_29 = arith.constant 0 : index
    %c0_30 = arith.constant 0 : index
    %14 = vector.load %arg3[%c0_29, %c0_30] : memref<1x128xf32, #tpu.memory_space<vmem>>, vector<1x128xf32>
    %15 = vector.shape_cast %14 : vector<1x128xf32> to vector<1x128xf32>
    %16 = vector.broadcast %15 : vector<1x128xf32> to vector<256x128xf32>
    %c0_31 = arith.constant 0 : index
    %c0_32 = arith.constant 0 : index
    %17 = vector.load %arg5[%c0_31, %c0_32] : memref<1x128xf32, #tpu.memory_space<vmem>>, vector<1x128xf32>
    %18 = vector.shape_cast %17 : vector<1x128xf32> to vector<1x128xf32>
    %19 = vector.broadcast %18 : vector<1x128xf32> to vector<256x128xf32>
    %c0_33 = arith.constant 0 : index
    %c0_34 = arith.constant 0 : index
    %20 = vector.load %arg9[%c0_33, %c0_34] : memref<256x128xf32, #tpu.memory_space<vmem>>, vector<256x128xf32>
    tpu.vector_store %arg9[%c0_33, %c0_34], %16 {strides = array<i32>} : memref<256x128xf32, #tpu.memory_space<vmem>>, vector<256x128xf32>,
    %c0_35 = arith.constant 0 : index
    %c0_36 = arith.constant 0 : index
    %c0_37 = arith.constant 0 : index
    %21 = vector.load %arg7[%c0_35, %c0_36, %c0_37] : memref<18x18x128xbf16, #tpu.memory_space<vmem>>, vector<18x16x128xbf16>
    %22 = vector.extract_strided_slice %21 {offsets = [0, 0, 0], sizes = [16, 16, 128], strides = [1, 1, 1]} : vector<18x16x128xbf16> to vector<16x16x128xbf16>
    %23 = vector.extract_strided_slice %21 {offsets = [1, 0, 0], sizes = [16, 16, 128], strides = [1, 1, 1]} : vector<18x16x128xbf16> to vector<16x16x128xbf16>
    %24 = vector.extract_strided_slice %21 {offsets = [2, 0, 0], sizes = [16, 16, 128], strides = [1, 1, 1]} : vector<18x16x128xbf16> to vector<16x16x128xbf16>
    %25 = tpu.concatenate %22, %23, %24 in 2 : vector<16x16x128xbf16>, vector<16x16x128xbf16>, vector<16x16x128xbf16> -> vector<16x16x384xbf16>
    %26 = vector.shape_cast %25 : vector<16x16x384xbf16> to vector<256x384xbf16>
    %c0_38 = arith.constant 0 : index
    %c0_39 = arith.constant 0 : index
    %27 = vector.load %arg9[%c0_38, %c0_39] : memref<256x128xf32, #tpu.memory_space<vmem>>, vector<256x128xf32>
    %c0_40 = arith.constant 0 : index
    %c0_41 = arith.constant 0 : index
    %c0_42 = arith.constant 0 : index
    %28 = vector.load %arg2[%c0_40, %c0_41, %c0_42] : memref<3x384x128xbf16, #tpu.memory_space<vmem>>, vector<1x384x128xbf16>
    %29 = vector.shape_cast %28 : vector<1x384x128xbf16> to vector<384x128xbf16>
    %cst_43 = arith.constant dense<0.000000e+00> : vector<256x128xf32>
    %30 = tpu.matmul %26, %29, %cst_43 {dimension_numbers = #tpu.dot_dimension_numbers<[1], [0], [0], [1], [0, 0, 1, 1], [], []>} : vector<256x384xbf16>, vector<384x128xbf16>, vector<256x128xf32> -> vector<256x128xf32>
    %31 = arith.addf %27, %30 : vector<256x128xf32>
    %c0_44 = arith.constant 0 : index
    %c0_45 = arith.constant 0 : index
    %32 = vector.load %arg9[%c0_44, %c0_45] : memref<256x128xf32, #tpu.memory_space<vmem>>, vector<256x128xf32>
    tpu.vector_store %arg9[%c0_44, %c0_45], %31 {strides = array<i32>} : memref<256x128xf32, #tpu.memory_space<vmem>>, vector<256x128xf32>,
    %c0_46 = arith.constant 0 : index
    %c1_47 = arith.constant 1 : index
    %c0_48 = arith.constant 0 : index
    %33 = vector.load %arg7[%c0_46, %c1_47, %c0_48] : memref<18x18x128xbf16, #tpu.memory_space<vmem>>, vector<18x16x128xbf16>
    %34 = vector.extract_strided_slice %33 {offsets = [0, 0, 0], sizes = [16, 16, 128], strides = [1, 1, 1]} : vector<18x16x128xbf16> to vector<16x16x128xbf16>
    %35 = vector.extract_strided_slice %33 {offsets = [1, 0, 0], sizes = [16, 16, 128], strides = [1, 1, 1]} : vector<18x16x128xbf16> to vector<16x16x128xbf16>
    %36 = vector.extract_strided_slice %33 {offsets = [2, 0, 0], sizes = [16, 16, 128], strides = [1, 1, 1]} : vector<18x16x128xbf16> to vector<16x16x128xbf16>
    %37 = tpu.concatenate %34, %35, %36 in 2 : vector<16x16x128xbf16>, vector<16x16x128xbf16>, vector<16x16x128xbf16> -> vector<16x16x384xbf16>
    %38 = vector.shape_cast %37 : vector<16x16x384xbf16> to vector<256x384xbf16>
    %c0_49 = arith.constant 0 : index
    %c0_50 = arith.constant 0 : index
    %39 = vector.load %arg9[%c0_49, %c0_50] : memref<256x128xf32, #tpu.memory_space<vmem>>, vector<256x128xf32>
    %c1_51 = arith.constant 1 : index
    %c0_52 = arith.constant 0 : index
    %c0_53 = arith.constant 0 : index
    %40 = vector.load %arg2[%c1_51, %c0_52, %c0_53] : memref<3x384x128xbf16, #tpu.memory_space<vmem>>, vector<1x384x128xbf16>
    %41 = vector.shape_cast %40 : vector<1x384x128xbf16> to vector<384x128xbf16>
    %cst_54 = arith.constant dense<0.000000e+00> : vector<256x128xf32>
    %42 = tpu.matmul %38, %41, %cst_54 {dimension_numbers = #tpu.dot_dimension_numbers<[1], [0], [0], [1], [0, 0, 1, 1], [], []>} : vector<256x384xbf16>, vector<384x128xbf16>, vector<256x128xf32> -> vector<256x128xf32>
    %43 = arith.addf %39, %42 : vector<256x128xf32>
    %c0_55 = arith.constant 0 : index
    %c0_56 = arith.constant 0 : index
    %44 = vector.load %arg9[%c0_55, %c0_56] : memref<256x128xf32, #tpu.memory_space<vmem>>, vector<256x128xf32>
    tpu.vector_store %arg9[%c0_55, %c0_56], %43 {strides = array<i32>} : memref<256x128xf32, #tpu.memory_space<vmem>>, vector<256x128xf32>,
    %c0_57 = arith.constant 0 : index
    %c2 = arith.constant 2 : index
    %c0_58 = arith.constant 0 : index
    %45 = vector.load %arg7[%c0_57, %c2, %c0_58] : memref<18x18x128xbf16, #tpu.memory_space<vmem>>, vector<18x16x128xbf16>
    %46 = vector.extract_strided_slice %45 {offsets = [0, 0, 0], sizes = [16, 16, 128], strides = [1, 1, 1]} : vector<18x16x128xbf16> to vector<16x16x128xbf16>
    %47 = vector.extract_strided_slice %45 {offsets = [1, 0, 0], sizes = [16, 16, 128], strides = [1, 1, 1]} : vector<18x16x128xbf16> to vector<16x16x128xbf16>
    %48 = vector.extract_strided_slice %45 {offsets = [2, 0, 0], sizes = [16, 16, 128], strides = [1, 1, 1]} : vector<18x16x128xbf16> to vector<16x16x128xbf16>
    %49 = tpu.concatenate %46, %47, %48 in 2 : vector<16x16x128xbf16>, vector<16x16x128xbf16>, vector<16x16x128xbf16> -> vector<16x16x384xbf16>
    %50 = vector.shape_cast %49 : vector<16x16x384xbf16> to vector<256x384xbf16>
    %c0_59 = arith.constant 0 : index
    %c0_60 = arith.constant 0 : index
    %51 = vector.load %arg9[%c0_59, %c0_60] : memref<256x128xf32, #tpu.memory_space<vmem>>, vector<256x128xf32>
    %c2_61 = arith.constant 2 : index
    %c0_62 = arith.constant 0 : index
    %c0_63 = arith.constant 0 : index
    %52 = vector.load %arg2[%c2_61, %c0_62, %c0_63] : memref<3x384x128xbf16, #tpu.memory_space<vmem>>, vector<1x384x128xbf16>
    %53 = vector.shape_cast %52 : vector<1x384x128xbf16> to vector<384x128xbf16>
    %cst_64 = arith.constant dense<0.000000e+00> : vector<256x128xf32>
    %54 = tpu.matmul %50, %53, %cst_64 {dimension_numbers = #tpu.dot_dimension_numbers<[1], [0], [0], [1], [0, 0, 1, 1], [], []>} : vector<256x384xbf16>, vector<384x128xbf16>, vector<256x128xf32> -> vector<256x128xf32>
    %55 = arith.addf %51, %54 : vector<256x128xf32>
    %c0_65 = arith.constant 0 : index
    %c0_66 = arith.constant 0 : index
    %56 = vector.load %arg9[%c0_65, %c0_66] : memref<256x128xf32, #tpu.memory_space<vmem>>, vector<256x128xf32>
    tpu.vector_store %arg9[%c0_65, %c0_66], %55 {strides = array<i32>} : memref<256x128xf32, #tpu.memory_space<vmem>>, vector<256x128xf32>,
    %c0_67 = arith.constant 0 : index
    %c0_68 = arith.constant 0 : index
    %57 = vector.load %arg9[%c0_67, %c0_68] : memref<256x128xf32, #tpu.memory_space<vmem>>, vector<256x128xf32>
    %cst_69 = arith.constant 0.000000e+00 : f32
    %58 = vector.broadcast %cst_69 : f32 to vector<256x128xf32>
    %59 = arith.maximumf %57, %58 : vector<256x128xf32>
    %60 = vector.shape_cast %59 : vector<256x128xf32> to vector<16x16x128xf32>
    %61 = arith.truncf %60 : vector<16x16x128xf32> to vector<16x16x128xbf16>
    %c1_70 = arith.constant 1 : index
    %c1_71 = arith.constant 1 : index
    %c0_72 = arith.constant 0 : index
    %62 = vector.load %arg8[%c1_70, %c1_71, %c0_72] : memref<18x18x128xbf16, #tpu.memory_space<vmem>>, vector<16x16x128xbf16>
    tpu.vector_store %arg8[%c1_70, %c1_71, %c0_72], %61 {strides = array<i32>} : memref<18x18x128xbf16, #tpu.memory_space<vmem>>, vector<16x16x128xbf16>,
    %c0_73 = arith.constant 0 : index
    %c0_74 = arith.constant 0 : index
    %63 = vector.load %arg9[%c0_73, %c0_74] : memref<256x128xf32, #tpu.memory_space<vmem>>, vector<256x128xf32>
    tpu.vector_store %arg9[%c0_73, %c0_74], %19 {strides = array<i32>} : memref<256x128xf32, #tpu.memory_space<vmem>>, vector<256x128xf32>,
    %c0_75 = arith.constant 0 : index
    %c0_76 = arith.constant 0 : index
    %c0_77 = arith.constant 0 : index
    %64 = vector.load %arg8[%c0_75, %c0_76, %c0_77] : memref<18x18x128xbf16, #tpu.memory_space<vmem>>, vector<18x16x128xbf16>
    %65 = vector.extract_strided_slice %64 {offsets = [0, 0, 0], sizes = [16, 16, 128], strides = [1, 1, 1]} : vector<18x16x128xbf16> to vector<16x16x128xbf16>
    %66 = vector.extract_strided_slice %64 {offsets = [1, 0, 0], sizes = [16, 16, 128], strides = [1, 1, 1]} : vector<18x16x128xbf16> to vector<16x16x128xbf16>
    %67 = vector.extract_strided_slice %64 {offsets = [2, 0, 0], sizes = [16, 16, 128], strides = [1, 1, 1]} : vector<18x16x128xbf16> to vector<16x16x128xbf16>
    %68 = tpu.concatenate %65, %66, %67 in 2 : vector<16x16x128xbf16>, vector<16x16x128xbf16>, vector<16x16x128xbf16> -> vector<16x16x384xbf16>
    %69 = vector.shape_cast %68 : vector<16x16x384xbf16> to vector<256x384xbf16>
    %c0_78 = arith.constant 0 : index
    %c0_79 = arith.constant 0 : index
    %70 = vector.load %arg9[%c0_78, %c0_79] : memref<256x128xf32, #tpu.memory_space<vmem>>, vector<256x128xf32>
    %c0_80 = arith.constant 0 : index
    %c0_81 = arith.constant 0 : index
    %c0_82 = arith.constant 0 : index
    %71 = vector.load %arg4[%c0_80, %c0_81, %c0_82] : memref<3x384x128xbf16, #tpu.memory_space<vmem>>, vector<1x384x128xbf16>
    %72 = vector.shape_cast %71 : vector<1x384x128xbf16> to vector<384x128xbf16>
    %cst_83 = arith.constant dense<0.000000e+00> : vector<256x128xf32>
    %73 = tpu.matmul %69, %72, %cst_83 {dimension_numbers = #tpu.dot_dimension_numbers<[1], [0], [0], [1], [0, 0, 1, 1], [], []>} : vector<256x384xbf16>, vector<384x128xbf16>, vector<256x128xf32> -> vector<256x128xf32>
    %74 = arith.addf %70, %73 : vector<256x128xf32>
    %c0_84 = arith.constant 0 : index
    %c0_85 = arith.constant 0 : index
    %75 = vector.load %arg9[%c0_84, %c0_85] : memref<256x128xf32, #tpu.memory_space<vmem>>, vector<256x128xf32>
    tpu.vector_store %arg9[%c0_84, %c0_85], %74 {strides = array<i32>} : memref<256x128xf32, #tpu.memory_space<vmem>>, vector<256x128xf32>,
    %c0_86 = arith.constant 0 : index
    %c1_87 = arith.constant 1 : index
    %c0_88 = arith.constant 0 : index
    %76 = vector.load %arg8[%c0_86, %c1_87, %c0_88] : memref<18x18x128xbf16, #tpu.memory_space<vmem>>, vector<18x16x128xbf16>
    %77 = vector.extract_strided_slice %76 {offsets = [0, 0, 0], sizes = [16, 16, 128], strides = [1, 1, 1]} : vector<18x16x128xbf16> to vector<16x16x128xbf16>
    %78 = vector.extract_strided_slice %76 {offsets = [1, 0, 0], sizes = [16, 16, 128], strides = [1, 1, 1]} : vector<18x16x128xbf16> to vector<16x16x128xbf16>
    %79 = vector.extract_strided_slice %76 {offsets = [2, 0, 0], sizes = [16, 16, 128], strides = [1, 1, 1]} : vector<18x16x128xbf16> to vector<16x16x128xbf16>
    %80 = tpu.concatenate %77, %78, %79 in 2 : vector<16x16x128xbf16>, vector<16x16x128xbf16>, vector<16x16x128xbf16> -> vector<16x16x384xbf16>
    %81 = vector.shape_cast %80 : vector<16x16x384xbf16> to vector<256x384xbf16>
    %c0_89 = arith.constant 0 : index
    %c0_90 = arith.constant 0 : index
    %82 = vector.load %arg9[%c0_89, %c0_90] : memref<256x128xf32, #tpu.memory_space<vmem>>, vector<256x128xf32>
    %c1_91 = arith.constant 1 : index
    %c0_92 = arith.constant 0 : index
    %c0_93 = arith.constant 0 : index
    %83 = vector.load %arg4[%c1_91, %c0_92, %c0_93] : memref<3x384x128xbf16, #tpu.memory_space<vmem>>, vector<1x384x128xbf16>
    %84 = vector.shape_cast %83 : vector<1x384x128xbf16> to vector<384x128xbf16>
    %cst_94 = arith.constant dense<0.000000e+00> : vector<256x128xf32>
    %85 = tpu.matmul %81, %84, %cst_94 {dimension_numbers = #tpu.dot_dimension_numbers<[1], [0], [0], [1], [0, 0, 1, 1], [], []>} : vector<256x384xbf16>, vector<384x128xbf16>, vector<256x128xf32> -> vector<256x128xf32>
    %86 = arith.addf %82, %85 : vector<256x128xf32>
    %c0_95 = arith.constant 0 : index
    %c0_96 = arith.constant 0 : index
    %87 = vector.load %arg9[%c0_95, %c0_96] : memref<256x128xf32, #tpu.memory_space<vmem>>, vector<256x128xf32>
    tpu.vector_store %arg9[%c0_95, %c0_96], %86 {strides = array<i32>} : memref<256x128xf32, #tpu.memory_space<vmem>>, vector<256x128xf32>,
    %c0_97 = arith.constant 0 : index
    %c2_98 = arith.constant 2 : index
    %c0_99 = arith.constant 0 : index
    %88 = vector.load %arg8[%c0_97, %c2_98, %c0_99] : memref<18x18x128xbf16, #tpu.memory_space<vmem>>, vector<18x16x128xbf16>
    %89 = vector.extract_strided_slice %88 {offsets = [0, 0, 0], sizes = [16, 16, 128], strides = [1, 1, 1]} : vector<18x16x128xbf16> to vector<16x16x128xbf16>
    %90 = vector.extract_strided_slice %88 {offsets = [1, 0, 0], sizes = [16, 16, 128], strides = [1, 1, 1]} : vector<18x16x128xbf16> to vector<16x16x128xbf16>
    %91 = vector.extract_strided_slice %88 {offsets = [2, 0, 0], sizes = [16, 16, 128], strides = [1, 1, 1]} : vector<18x16x128xbf16> to vector<16x16x128xbf16>
    %92 = tpu.concatenate %89, %90, %91 in 2 : vector<16x16x128xbf16>, vector<16x16x128xbf16>, vector<16x16x128xbf16> -> vector<16x16x384xbf16>
    %93 = vector.shape_cast %92 : vector<16x16x384xbf16> to vector<256x384xbf16>
    %c0_100 = arith.constant 0 : index
    %c0_101 = arith.constant 0 : index
    %94 = vector.load %arg9[%c0_100, %c0_101] : memref<256x128xf32, #tpu.memory_space<vmem>>, vector<256x128xf32>
    %c2_102 = arith.constant 2 : index
    %c0_103 = arith.constant 0 : index
    %c0_104 = arith.constant 0 : index
    %95 = vector.load %arg4[%c2_102, %c0_103, %c0_104] : memref<3x384x128xbf16, #tpu.memory_space<vmem>>, vector<1x384x128xbf16>
    %96 = vector.shape_cast %95 : vector<1x384x128xbf16> to vector<384x128xbf16>
    %cst_105 = arith.constant dense<0.000000e+00> : vector<256x128xf32>
    %97 = tpu.matmul %93, %96, %cst_105 {dimension_numbers = #tpu.dot_dimension_numbers<[1], [0], [0], [1], [0, 0, 1, 1], [], []>} : vector<256x384xbf16>, vector<384x128xbf16>, vector<256x128xf32> -> vector<256x128xf32>
    %98 = arith.addf %94, %97 : vector<256x128xf32>
    %c0_106 = arith.constant 0 : index
    %c0_107 = arith.constant 0 : index
    %99 = vector.load %arg9[%c0_106, %c0_107] : memref<256x128xf32, #tpu.memory_space<vmem>>, vector<256x128xf32>
    tpu.vector_store %arg9[%c0_106, %c0_107], %98 {strides = array<i32>} : memref<256x128xf32, #tpu.memory_space<vmem>>, vector<256x128xf32>,
    %c0_108 = arith.constant 0 : index
    %c0_109 = arith.constant 0 : index
    %100 = vector.load %arg9[%c0_108, %c0_109] : memref<256x128xf32, #tpu.memory_space<vmem>>, vector<256x128xf32>
    %c0_110 = arith.constant 0 : index
    %c0_111 = arith.constant 0 : index
    %c0_112 = arith.constant 0 : index
    %c0_113 = arith.constant 0 : index
    %101 = vector.load %arg1[%c0_110, %c0_111, %c0_112, %c0_113] : memref<1x16x16x128xf32, #tpu.memory_space<vmem>>, vector<1x16x16x128xf32>
    %102 = vector.shape_cast %101 : vector<1x16x16x128xf32> to vector<16x16x128xf32>
    %103 = vector.shape_cast %102 : vector<16x16x128xf32> to vector<256x128xf32>
    %104 = arith.addf %100, %103 : vector<256x128xf32>
    %cst_114 = arith.constant 0.000000e+00 : f32
    %105 = vector.broadcast %cst_114 : f32 to vector<256x128xf32>
    %106 = arith.maximumf %104, %105 : vector<256x128xf32>
    %107 = vector.shape_cast %106 : vector<256x128xf32> to vector<16x16x128xf32>
    %c0_115 = arith.constant 0 : index
    %c0_116 = arith.constant 0 : index
    %c0_117 = arith.constant 0 : index
    %c0_118 = arith.constant 0 : index
    %108 = vector.load %arg6[%c0_115, %c0_116, %c0_117, %c0_118] : memref<1x16x16x128xf32, #tpu.memory_space<vmem>>, vector<1x16x16x128xf32>
    %109 = vector.shape_cast %108 : vector<1x16x16x128xf32> to vector<16x16x128xf32>
    %110 = vector.shape_cast %107 : vector<16x16x128xf32> to vector<1x16x16x128xf32>
    tpu.vector_store %arg6[%c0_115, %c0_116, %c0_117, %c0_118], %110 {strides = array<i32>} : memref<1x16x16x128xf32, #tpu.memory_space<vmem>>, vector<1x16x16x128xf32>,
    return
  }
  func.func @transform_0(%arg0: i32) -> (i32, i32, i32, i32) {
    %c0_i32 = arith.constant 0 : i32
    %c0_i32_0 = arith.constant 0 : i32
    %c0_i32_1 = arith.constant 0 : i32
    %c0_i32_2 = arith.constant 0 : i32
    return %arg0, %c0_i32, %c0_i32_0, %c0_i32_1 : i32, i32, i32, i32
  }
  func.func @transform_1(%arg0: i32) -> (i32, i32, i32) {
    %c0_i32 = arith.constant 0 : i32
    %c0_i32_0 = arith.constant 0 : i32
    %c0_i32_1 = arith.constant 0 : i32
    %c0_i32_2 = arith.constant 0 : i32
    return %c0_i32, %c0_i32_0, %c0_i32_1 : i32, i32, i32
  }
  func.func @transform_2(%arg0: i32) -> (i32, i32) {
    %c0_i32 = arith.constant 0 : i32
    %c0_i32_0 = arith.constant 0 : i32
    %c0_i32_1 = arith.constant 0 : i32
    return %c0_i32, %c0_i32_0 : i32, i32
  }
  func.func @transform_3(%arg0: i32) -> (i32, i32, i32) {
    %c0_i32 = arith.constant 0 : i32
    %c0_i32_0 = arith.constant 0 : i32
    %c0_i32_1 = arith.constant 0 : i32
    %c0_i32_2 = arith.constant 0 : i32
    return %c0_i32, %c0_i32_0, %c0_i32_1 : i32, i32, i32
  }
  func.func @transform_4(%arg0: i32) -> (i32, i32) {
    %c0_i32 = arith.constant 0 : i32
    %c0_i32_0 = arith.constant 0 : i32
    %c0_i32_1 = arith.constant 0 : i32
    return %c0_i32, %c0_i32_0 : i32, i32
  }
  func.func @transform_5(%arg0: i32) -> (i32, i32, i32, i32) {
    %c0_i32 = arith.constant 0 : i32
    %c0_i32_0 = arith.constant 0 : i32
    %c0_i32_1 = arith.constant 0 : i32
    %c0_i32_2 = arith.constant 0 : i32
    return %arg0, %c0_i32, %c0_i32_0, %c0_i32_1 : i32, i32, i32, i32
  }
}

</mosaic_0001>

<bundles_post_ra>
// kernel: tpu_custom_call.1
= control target key start
LH: loop header
LB: loop body
LE: loop exit
PB: predicated region body
PF: predicated region fallthrough
CT: control target
= control target key end

     0   :  { %10 = vsyncpa [#allocation6], 0  ;;  %s11670_s0 = inlined_call_operand.hbm [shape: f32[2,16,16,128], index: 0, kind: input, shape index: {}]   ;;  %s11671_s1 = inlined_call_operand.hbm [shape: bf16[3,384,128], index: 1, kind: input, shape index: {}]   ;;  %s11672_s2 = inlined_call_operand.vmem [shape: f32[1,128], index: 2, kind: input, shape index: {}]   ;;  %s11673_s3 = inlined_call_operand.hbm [shape: bf16[3,384,128], index: 3, kind: input, shape index: {}]   ;;  %s11674_s4 = inlined_call_operand.vmem [shape: f32[1,128], index: 4, kind: input, shape index: {}]   ;;  %s11675_s5 = inlined_call_operand.hbm [shape: f32[2,16,16,128], index: 5, kind: output, shape index: {}]  }
   0x1   :  { %12 = vsyncpa [#allocation6 + $0x1], 0 }
   0x2   :  { %13 = vsyncpa [#allocation9], 0 }
   0x3   :  { %14 = vsyncpa [#allocation7], 0 }
   0x4   :  { %16 = vsyncpa [#allocation7 + $0x1], 0  ;;  %s9535_s18 = smov 0   ;;  %s9537_s19 = smov 0  }
   0x5   :  { %s9539_s20 = smov 0   ;;  %s9541_s21 = smov 0  }
   0x6 LB: > { %s9556_s22 = sadd.s32 4294967295, %s9492_s21   ;;  %s7368_s23 = sadd.s32 4294967294, %s9492_s21   ;;  %s9492_s21 = sphi %s9541_s21, %s11762_s21   ;;  %s9488_s20 = sphi %s9539_s20, %s11761_s20   ;;  %s9484_s19 = sphi %s9537_s19, %s11760_s19   ;;  %s9480_s18 = sphi %s9535_s18, %s11759_s18  }
   0x7   : > { %p42_p0 = scmp.ne.s32.totalorder %s9484_s19, %s9480_s18  ;;  %p11676_p1 = scmp.eq.s32.totalorder %s9556_s22, 0 }
   0x8   : > { %p156_p3 = scmp.eq.s32.totalorder %s7368_s23, 1  ;;  %p7369_p5 = scmp.ge.s32.totalorder %s9492_s21, 1 }
   0x9   : > { %p9565_p4 = por %p11676_p1, %p42_p0  ;;  %p163_p7 = scmp.lt.s32.totalorder %s9492_s21, 3 }
   0xa   : > { %p9570_p6 = por %p156_p3, %p42_p0  ;;  %s9494_s27 = smov [#allocation8]  }
   0xb   : > { %s11685_s24 = scalar_select %p9565_p4, 1, 0 }
   0xc   : > { %s11686_s25 = scalar_select %p9570_p6, 1, 0 }
   0xd   : > { %p9575_p8 = pnand %p7369_p5, %p163_p7  ;;  %s175_s28 = sshll.u32 %s9494_s27, 4  ;;  %s176_s28 = int_to_ptr.vmem [resolvable:$true] %s175_s28 }
   0xe   : > { %s9495_s30 = smov [#allocation10]   ;;  %s9355_s7 = scalar_lea.vmem %s176_s28, 9216 }
   0xf   : > { %s11687_s26 = scalar_select %p9575_p8, 1, 0 }
  0x10   : > { %p8958_p9 = pneg %p9575_p8  ;;  %s191_s6 = sshll.u32 %s9495_s30, 4  ;;  %s192_s6 = int_to_ptr.vmem [resolvable:$true] %s191_s6 }
  0x11   : > { %p9356_p13 = scmp.ne.s32.totalorder %s176_s28, %s9355_s7  ;;  %p9363_p5 = scmp.lt.s32.totalorder %s176_s28, %s176_s28 }
  0x12   : > { %p9584_p11 = pnand %p8958_p9, %p11676_p1  ;;  %p9364_p7 = scmp.lt.s32.totalorder %s9355_s7, %s9355_s7 }
  0x14   : > { %p9346_p12 = pneg %p9584_p11  ;;  %p9365_p10 = por %p9364_p7, %p9363_p5 }
  0x16   : > { %p9358_p0 = pnand %p9356_p13, %p9346_p12 }
  0x18   : > { %p9359_p3 = pneg %p9358_p0 }
  0x1a   : > { %p9366_p9 = pnand %p9365_p10, %p9359_p3 }
  0x1c   : > { %9369 = shalt.err (!%p9366_p9)
}
  0x1d   : > { %s9496_s8 = smov 64   ;;  %s9497_s9 = smov 4  }
  0x1e   : > { %8961 = dma.hbm_to_vmem [thread:$0]  (!%p9584_p11), %s11671_s1, 9216, %s176_s28, [#allocation9], %s9496_s8, %s9496_s8, %s9497_s9  }
  0x1f   : > { %s9381_s12 = scalar_lea.vmem %s192_s6, 9216  ;;  %p9389_p2 = scmp.lt.s32.totalorder %s192_s6, %s192_s6 }
  0x20   : > { %p9382_p1 = scmp.ne.s32.totalorder %s192_s6, %s9381_s12  ;;  %p9390_p6 = scmp.lt.s32.totalorder %s9381_s12, %s9381_s12 }
  0x22   : > { %p9384_p13 = pnand %p9382_p1, %p9346_p12  ;;  %p9391_p5 = por %p9390_p6, %p9389_p2 }
  0x24   : > { %p9385_p0 = pneg %p9384_p13 }
  0x26   : > { %p9392_p10 = pnand %p9391_p5, %p9385_p0 }
  0x28   : > { %9395 = shalt.err (!%p9392_p10)
}
  0x29   : > { %8964 = dma.hbm_to_vmem [thread:$0]  (!%p9584_p11), %s11673_s3, 9216, %s192_s6, [#allocation9], %s9496_s8, %s9496_s8, %s9497_s9  }
  0x2a   : > { %s9607_s15 = sadd.s32 1, %s9492_s21   ;;  %s29_s16 = sadd.s32 1, %s9488_s20 }
  0x2b   : > { %s26_s17 = ssub.s32 %s9492_s21, %s9607_s15  ;;  %p36_p1 = scmp.ne.s32.totalorder %s9488_s20, %s9484_s19 }
  0x2c   : > { %p27_p2 = scmp.eq.s32.totalorder %s26_s17, 0  ;;  %p37_p6 = scmp.eq.s32.totalorder %s9492_s21, 0 }
  0x2d   : > { %p11689_p12 = scmp.eq.s32.totalorder %s9556_s22, 1  ;;  %p8975_p7 = scmp.lt.s32.totalorder %s9492_s21, 2 }
  0x2e   : > { %s9623_s27 = scalar_select %p27_p2, %s9488_s20, %s29_s16  }
  0x2f   : > { %p9617_p3 = por %p11689_p12, %p36_p1  ;;  %p38_p9 = por %p37_p6, %p36_p1 }
  0x30   : > { %s208_s28 = sand.u32 1, %s9488_s20   ;;  %s7776_s30 = sshll.u32 %s9492_s21, 12 }
  0x31   : > { %s11690_s23 = scalar_select %p9617_p3, 1, 0 }
  0x32   : > { %s7373_s29 = sshll.u32 %s208_s28, 8  ;;  %s9630_s8 = scalar_lea.hbm %s11670_s0, %s7776_s30 }
  0x33   : > { %s212_s9 = scalar_lea.vmem [#allocation5], %s7373_s29  ;;  %p9634_p11 = pnand %p8975_p7, %p38_p9 }
  0x34   : > { %s219_s10 = sshll.u32 %s212_s9, 4  ;;  %s9638_s12 = scalar_lea.sflag [#allocation6], %s208_s28  ;;  %s9632_s10 = int_to_ptr.vmem [resolvable:$true] %s219_s10 }
  0x35   : > { %s9396_s13 = scalar_lea.hbm %s9630_s8, 4096  ;;  %p9398_p0 = pneg %p9634_p11 }
  0x36   : > { %p9397_p13 = scmp.ne.s32.totalorder %s9630_s8, %s9396_s13  ;;  %s9401_s17 = scalar_lea.hbm %s11670_s0, 8192 }
  0x37   : > { %p9402_p1 = scmp.lt.s32.totalorder %s9630_s8, %s11670_s0  ;;  %p9403_p2 = scmp.lt.s32.totalorder %s9401_s17, %s9396_s13 }
  0x38   : > { %p9399_p5 = pnand %p9398_p0, %p9397_p13 }
  0x39   : > { %p9404_p6 = por %p9403_p2, %p9402_p1 }
  0x3a   : > { %p9400_p10 = pneg %p9399_p5 }
  0x3c   : > { %p9405_p12 = pnand %p9404_p6, %p9400_p10 }
  0x3e   : > { %9408 = shalt.err (!%p9405_p12)
}
  0x3f   : > { %s9409_s28 = scalar_lea.vmem %s9632_s10, 4096  ;;  %s9498_s6 = smov [#allocation5]  }
  0x40   : > { %p9410_p7 = scmp.ne.s32.totalorder %s9632_s10, %s9409_s28  ;;  %s9414_s7 = sshll.u32 %s9498_s6, 4  ;;  %s9415_s7 = int_to_ptr.vmem [resolvable:$false] %s9414_s7 }
  0x41   : > { %s9416_s9 = scalar_lea.vmem %s9415_s7, 8192  ;;  %p9417_p5 = scmp.lt.s32.totalorder %s9632_s10, %s9415_s7 }
  0x42   : > { %p9412_p9 = pnand %p9410_p7, %p9398_p0  ;;  %p9418_p3 = scmp.lt.s32.totalorder %s9416_s9, %s9409_s28 }
  0x44   : > { %p9413_p13 = pneg %p9412_p9  ;;  %p9419_p4 = por %p9418_p3, %p9417_p5 }
  0x46   : > { %p9420_p8 = pnand %p9419_p4, %p9413_p13 }
  0x48   : > { %9423 = shalt.err (!%p9420_p8)
}
  0x49   : > { %s9499_s13 = smov 128   ;;  %s9500_s14 = smov 8  }
  0x4a   : > { %8968 = dma.hbm_to_vmem [thread:$0]  (!%p9634_p11), %s9630_s8, 4096, %s9632_s10, %s9638_s12, %s9499_s13, %s9499_s13, %s9500_s14  }
  0x4b   : > { %p11692_p0 = scmp.ne.s32.totalorder %s11687_s26, 0 }
  0x4d   : > { %231 = sbr.rel (%p11692_p0) target bundleno = 1083 (0x43b), region = 40 }
  0x52   : > { %s9662_s16 = sand.u32 1, %s9484_s19   ;;  %p11693_p4 = scmp.ne.s32.totalorder %s11685_s24, 0 }
  0x53   : > { %s7377_s17 = sshll.u32 %s9662_s16, 8  ;;  %s234_s29 = scalar_lea.sflag [#allocation6], %s9662_s16 }
  0x54   : > { %s9668_s30 = scalar_lea.vmem [#allocation5], %s7377_s17 }
  0x55   : > { %9467 = dma.done.wait (%p11693_p4), %s234_s29, 4096  }
  0x56   : > { %9469 = vsyncadd (%p11693_p4), %s234_s29, 4294963200  ;;  %p11694_p8 = scmp.eq.s32.totalorder %s9556_s22, 0 }
  0x58   : > { %9471 = dma.done.wait (%p11694_p8), [#allocation9], 18432   ;;  %p11695_p3 = pmov %p11694_p8 }
  0x59   : > { %v9501_v0 = vmov 0   ;;  %v9020_v1 = vld [vmem:[#allocation8 + $0x78] sm:$0xff]   ;;  %v9023_v4 = vld [vmem:[#allocation8 + $0x70] sm:$0xff]   ;;  %v9026_v7 = vld [vmem:[#allocation8 + $0x68] sm:$0xff]   ;;  %vm281_vm0 = vsmask.f32 256 }
  0x5a   : > { %9473 = vsyncadd (%p11695_p3), [#allocation9], 4294948864  ;;  %273 = vst [vmem:[#allocation2] sm:$0xf] %v9501_v0  ;;  %v9021_v2 = vld [vmem:[#allocation8 + $0xb8] sm:$0xff]   ;;  %7842 = vmatprep.subr.bf16.mxu0 %v9020_v1  ;;  %v9024_v5 = vld [vmem:[#allocation8 + $0xb0] sm:$0xff]  }
  0x5b   : > { %274 = vst [vmem:[#allocation2 + $0x4] sm:$0xf] %v9501_v0  ;;  %275 = vst [vmem:[#allocation2 + $0x8] sm:$0x1] %v9501_v0  ;;  %v9022_v3 = vld [vmem:[#allocation8 + $0x38] sm:$0xff]   ;;  %8658 = vmatprep.subr.bf16.mxu1 %v9021_v2  ;;  %v9025_v6 = vld [vmem:[#allocation8 + $0x30] sm:$0xff]  }
  0x5c   : > { %277 = vst [vmem:[#allocation2 + $0xcc] sm:$0xf] %v9501_v0  ;;  %278 = vst [vmem:[#allocation2 + $0xd0] sm:$0xf] %v9501_v0  ;;  %7843 = vmatpush3.bf16.msra.mxu0 %v9022_v3  ;;  %8659 = vmatpush3.bf16.msra.mxu1 %v9021_v2  ;;  %v9027_v8 = vld [vmem:[#allocation8 + $0xa8] sm:$0xff]   ;;  %v9029_v10 = vld [vmem:[#allocation8 + $0x60] sm:$0xff]  }
  0x5d   : > { %279 = vst [vmem:[#allocation2 + $0xd4] sm:$0x1] %v9501_v0  ;;  %393 = vst [vmem:[#allocation3] sm:$0xf] %v9501_v0  ;;  %7844 = vmatprep.subr.bf16.mxu0 %v9023_v4  ;;  %8660 = vmatprep.subr.bf16.mxu1 %v9024_v5  ;;  %v9028_v9 = vld [vmem:[#allocation8 + $0x28] sm:$0xff]   ;;  %v9030_v11 = vld [vmem:[#allocation8 + $0xa0] sm:$0xff]  }
  0x5e   : > { %394 = vst [vmem:[#allocation3 + $0x4] sm:$0xf] %v9501_v0  ;;  %395 = vst [vmem:[#allocation3 + $0x8] sm:$0x1] %v9501_v0  ;;  %v9031_v12 = vld [vmem:[#allocation8 + $0x20] sm:$0xff]   ;;  %v9032_v13 = vld [vmem:[#allocation8 + $0x58] sm:$0xff]  }
  0x5f   : > { %397 = vst [vmem:[#allocation3 + $0xcc] sm:$0xf] %v9501_v0  ;;  %398 = vst [vmem:[#allocation3 + $0xd0] sm:$0xf] %v9501_v0  ;;  %v9033_v14 = vld [vmem:[#allocation8 + $0x98] sm:$0xff]   ;;  %vm280_vm1 = vcmask 1040384  }
  0x60   : > { %399 = vst [vmem:[#allocation3 + $0xd4] sm:$0x1] %v9501_v0  ;;  %7845 = vmatpush3.bf16.msra.mxu0 %v9025_v6  ;;  %8661 = vmatpush3.bf16.msra.mxu1 %v9024_v5  ;;  %v9034_v15 = vld [vmem:[#allocation8 + $0x18] sm:$0xff]   ;;  %v9035_v16 = vld [vmem:[#allocation8 + $0x50] sm:$0xff]   ;;  %vm9680_vm2 = vmand %vm280_vm1, %vm281_vm0  ;;  %vm337_vm3 = vsmask.f32 7938 }
  0x61   : > { %7846 = vmatprep.subr.bf16.mxu0 %v9026_v7  ;;  %8662 = vmatprep.subr.bf16.mxu1 %v9027_v8  ;;  %v9036_v17 = vld [vmem:[#allocation8 + $0x90] sm:$0xff]   ;;  %v9038_v20 = vld [vmem:[#allocation8 + $0x48] sm:$0xff]   ;;  %v9041_v23 = vld [vmem:[#allocation8 + $0x40] sm:$0xff]   ;;  %vm636_vm4 = vsmask.f32 4368  ;;  %vm959_vm5 = vcmask 1043456  }
  0x62   : > { %v9037_v19 = vld [vmem:[#allocation8 + $0x10] sm:$0xff]   ;;  %v9039_v21 = vld [vmem:[#allocation8 + $0x88] sm:$0xff]   ;;  %v9042_v24 = vld [vmem:[#allocation8 + $0x80] sm:$0xff]   ;;  %v11698_v55 = vmov 0  ;;  %v11701_v63 = vmov 0  ;;  %vm3115_vm10 = vcmask 1046528  }
  0x63   : > { %v9040_v22 = vld [vmem:[#allocation8 + $0x8] sm:$0xff]   ;;  %v286_v25 = vld [vmem:[#allocation2 + $0xc] sm:$0x1]  ;;  %v508_v26 = vld [vmem:[%s9668_s30] sm:$0xff]  ;;  %vm2071_vm9 = vsmask.f32 7424 }
  0x64   : > { %7847 = vmatpush3.bf16.msra.mxu0 %v9028_v9  ;;  %8663 = vmatpush3.bf16.msra.mxu1 %v9027_v8  ;;  %v509_v27 = vld [vmem:[%s9668_s30 + $0x8] sm:$0xff]  ;;  %v287_v28 = vsel %vm9680_vm2, 0, %v286_v25  ;;  %v7777_v29 = vpack.c.bf16 %v508_v26, %v508_v26  ;;  %v510_v32 = vld [vmem:[%s9668_s30 + $0x10] sm:$0xff]  ;;  %v511_v33 = vld [vmem:[%s9668_s30 + $0x18] sm:$0xff]  ;;  %s11477_s11 = scalar_lea.vmem [#allocation11], %s7377_s17  ;;  %s7841_s12 = sshll.u32 %s9556_s22, 12 }
  0x65   : > { %7848 = vmatprep.subr.bf16.mxu0 %v9029_v10  ;;  %8664 = vmatprep.subr.bf16.mxu1 %v9030_v11  ;;  %v7778_v30 = vpack.c.bf16 %v509_v27, %v509_v27  ;;  %v289_v31 = vld [vmem:[#allocation2 + $0x18] sm:$0x1]  ;;  %v9043_v34 = vld [vmem:[#allocation8] sm:$0xff]   ;;  %288 = vst [vmem:[#allocation2 + $0xc] sm:$0x1] %v287_v28  ;;  %v7779_v36 = vpack.c.bf16 %v510_v32, %v510_v32  ;;  %v9694_v50 = vld [vmem:[#allocation8 + $0x178] sm:$0xff]   ;;  %s11624_s9 = scalar_lea.hbm %s11675_s5, %s7841_s12 }
  0x66   : > { %v290_v35 = vsel %vm9680_vm2, 0, %v289_v31  ;;  %v7780_v37 = vpack.c.bf16 %v511_v33, %v511_v33  ;;  %v283_v38 = vld [vmem:[#allocation2] sm:$0x1]  ;;  %v512_v39 = vld [vmem:[%s9668_s30 + $0x20] sm:$0xff]  ;;  %v639_v40 = vshrl.u32 %v7777_v29, 16  ;;  %v642_v41 = vshll.u32 %v7777_v29, 16  ;;  %vm9704_vm6 = vmor %vm281_vm0, %vm636_vm4 }
  0x67   : > { %v647_v42 = vshrl.u32 %v7778_v30, 16  ;;  %v650_v43 = vshll.u32 %v7778_v30, 16  ;;  %291 = vst [vmem:[#allocation2 + $0x18] sm:$0x1] %v290_v35  ;;  %v292_v44 = vld [vmem:[#allocation2 + $0x24] sm:$0x1]  ;;  %v7781_v58 = vpack.c.bf16 %v512_v39, %v512_v39  ;;  %vm9713_vm7 = vmand %vm959_vm5, %vm337_vm3 }
  0x68   : > { %7849 = vmatpush3.bf16.msra.mxu0 %v9031_v12  ;;  %8665 = vmatpush3.bf16.msra.mxu1 %v9030_v11  ;;  %v656_v45 = vshrl.u32 %v7779_v36, 16  ;;  %v659_v46 = vshll.u32 %v7779_v36, 16  ;;  %v664_v47 = vshrl.u32 %v7780_v37, 16  ;;  %v667_v48 = vshll.u32 %v7780_v37, 16  ;;  %v513_v49 = vld [vmem:[%s9668_s30 + $0x28] sm:$0xff]  ;;  %v9049_v0 = vld [vmem:[#allocation8 + $0x138] sm:$0xff]   ;;  %vm9924_vm8 = vmand %vm280_vm1, %vm337_vm3 }
  0x69   : > { %7850 = vmatprep.subr.bf16.mxu0 %v9032_v13  ;;  %8666 = vmatprep.subr.bf16.mxu1 %v9033_v14  ;;  %v641_v51 = vrot.slane %v639_v40, 7  ;;  %v9696_v52 = vrot.slane %v647_v42, 7  ;;  %v284_v53 = vsel %vm9680_vm2, 0, %v283_v38  ;;  %v293_v54 = vsel %vm9680_vm2, 0, %v292_v44  ;;  %v514_v9 = vld [vmem:[%s9668_s30 + $0x30] sm:$0xff]  ;;  %v517_v28 = vld [vmem:[%s9668_s30 + $0x48] sm:$0xff] }
  0x6a   : > { %v11699_v55 = vsel %vm9704_vm6, 4294967295, %v11698_v55  ;;  %v658_v56 = vrot.slane %v656_v45, 7  ;;  %v9708_v57 = vrot.slane %v664_v47, 7  ;;  %285 = vst [vmem:[#allocation2] sm:$0x1] %v284_v53  ;;  %v7782_v59 = vpack.c.bf16 %v513_v49, %v513_v49  ;;  %v518_v45 = vld [vmem:[%s9668_s30 + $0x50] sm:$0xff] }
  0x6b   : > { %11700 = vst [vmem:[#allocation15_spill] sm:$0xff] %v11699_v55  ;;  %294 = vst [vmem:[#allocation2 + $0x24] sm:$0x1] %v293_v54  ;;  %v644_v60 = vor.u32 %v642_v41, %v641_v51  ;;  %v645_v61 = vrot.slane %v641_v51, 4  ;;  %v652_v62 = vor.u32 %v650_v43, %v9696_v52  ;;  %v11702_v63 = vsel %vm9713_vm7, 4294967295, %v11701_v63  ;;  %s7276_s28 = sshll.u32 %s11477_s11, 4  ;;  %s11626_s28 = int_to_ptr.vmem [resolvable:$true] %s7276_s28 }
  0x6c   : > { %7851 = vmatpush3.bf16.msra.mxu0 %v9034_v15  ;;  %8667 = vmatpush3.bf16.msra.mxu1 %v9033_v14  ;;  %11703 = vst [vmem:[#allocation16_spill] sm:$0xff] %v11702_v63  ;;  %v661_v1 = vor.u32 %v659_v46, %v658_v56  ;;  %v662_v2 = vrot.slane %v658_v56, 4  ;;  %v669_v3 = vor.u32 %v667_v48, %v9708_v57  ;;  %v961_v5 = vld [vmem:[#allocation2 + $0xc] sm:$0xf]  ;;  %v673_v6 = vshrl.u32 %v7781_v58, 16  ;;  %s7263_s13 = scalar_lea.sflag [#allocation7], %s9662_s16 }
  0x6d   : > { %7852 = vmatprep.subr.bf16.mxu0 %v9035_v16  ;;  %8668 = vmatprep.subr.bf16.mxu1 %v9036_v17  ;;  %v653_v4 = vsel %vm9704_vm6, %v645_v61, %v652_v62  ;;  %v676_v7 = vshll.u32 %v7781_v58, 16  ;;  %v681_v8 = vshrl.u32 %v7782_v59, 16  ;;  %v962_v10 = vsel %vm9713_vm7, %v644_v60, %v961_v5  ;;  %v295_v14 = vld [vmem:[#allocation2 + $0x30] sm:$0x1]  ;;  %v515_v15 = vld [vmem:[%s9668_s30 + $0x38] sm:$0xff]  ;;  %s9424_s14 = scalar_lea.vmem %s11626_s28, 4096 }
  0x6e   : > { %964 = vst [vmem:[#allocation2 + $0x10] sm:$0xf] %v653_v4  ;;  %v670_v11 = vsel %vm9704_vm6, %v662_v2, %v669_v3  ;;  %v968_v12 = vld [vmem:[#allocation2 + $0x18] sm:$0xf]  ;;  %v684_v13 = vshll.u32 %v7782_v59, 16  ;;  %v7783_v16 = vpack.c.bf16 %v514_v9, %v514_v9  ;;  %v7786_v39 = vpack.c.bf16 %v517_v28, %v517_v28  ;;  %v519_v2 = vld [vmem:[%s9668_s30 + $0x58] sm:$0xff]  ;;  %p9425_p11 = scmp.ne.s32.totalorder %s11626_s28, %s9424_s14 }
  0x6f   : > { %963 = vst [vmem:[#allocation2 + $0xc] sm:$0xf] %v962_v10  ;;  %971 = vst [vmem:[#allocation2 + $0x1c] sm:$0xf] %v670_v11  ;;  %v301_v44 = vld [vmem:[#allocation2 + $0x48] sm:$0x1]  ;;  %v7787_v56 = vpack.c.bf16 %v518_v45, %v518_v45 }
  0x70   : > { %7853 = vmatpush3.bf16.msra.mxu0 %v9037_v19  ;;  %8669 = vmatpush3.bf16.msra.mxu1 %v9036_v17  ;;  %v969_v17 = vsel %vm9713_vm7, %v661_v1, %v968_v12  ;;  %v675_v19 = vrot.slane %v673_v6, 7  ;;  %v690_v25 = vshrl.u32 %v7783_v16, 16  ;;  %v693_v26 = vshll.u32 %v7783_v16, 16  ;;  %v520_v4 = vld [vmem:[%s9668_s30 + $0x60] sm:$0xff]  ;;  %v521_v10 = vld [vmem:[%s9668_s30 + $0x68] sm:$0xff]  ;;  %v9057_v11 = vld [vmem:[#allocation8 + $0x170] sm:$0xff]  }
  0x71   : > { %7854 = vmatprep.subr.bf16.mxu0 %v9038_v20  ;;  %8670 = vmatprep.subr.bf16.mxu1 %v9039_v21  ;;  %v9729_v20 = vrot.slane %v681_v8, 7  ;;  %970 = vst [vmem:[#allocation2 + $0x18] sm:$0xf] %v969_v17  ;;  %v9046_v46 = vld [vmem:[#allocation2] sm:$0xff]   ;;  %v715_v48 = vshrl.u32 %v7786_v39, 16  ;;  %v302_v49 = vsel %vm9680_vm2, 0, %v301_v44 }
  0x72   : > { %v678_v29 = vor.u32 %v676_v7, %v675_v19  ;;  %v679_v30 = vrot.slane %v675_v19, 4  ;;  %v975_v32 = vld [vmem:[#allocation2 + $0x24] sm:$0xf]  ;;  %v692_v33 = vrot.slane %v690_v25, 7  ;;  %v718_v54 = vshll.u32 %v7786_v39, 16  ;;  %v9050_v12 = vld [vmem:[#allocation8 + $0xf8] sm:$0xff]  }
  0x73   : > { %v686_v31 = vor.u32 %v684_v13, %v9729_v20  ;;  %303 = vst [vmem:[#allocation2 + $0x48] sm:$0x1] %v302_v49  ;;  %v724_v3 = vshrl.u32 %v7787_v56, 16  ;;  %v7788_v7 = vpack.c.bf16 %v519_v2, %v519_v2  ;;  %v727_v8 = vshll.u32 %v7787_v56, 16  ;;  %v304_v9 = vld [vmem:[#allocation2 + $0x54] sm:$0x1] }
  0x74   : > { %7855 = vmatpush3.bf16.msra.mxu0 %v9040_v22  ;;  %8671 = vmatpush3.bf16.msra.mxu1 %v9039_v21  ;;  %v296_v21 = vsel %vm9680_vm2, 0, %v295_v14  ;;  %v298_v22 = vld [vmem:[#allocation2 + $0x3c] sm:$0x1]  ;;  %v976_v38 = vsel %vm9713_vm7, %v678_v29, %v975_v32  ;;  %v695_v40 = vor.u32 %v693_v26, %v692_v33  ;;  %v696_v41 = vrot.slane %v692_v33, 4  ;;  %v9053_v14 = vld [vmem:[#allocation8 + $0x130] sm:$0xff]   ;;  %p11756_p10 = scmp.ne.s32.totalorder %s11690_s23, 0 }
  0x75   : > { %7856 = vmatprep.subr.bf16.mxu0 %v9041_v23  ;;  %8672 = vmatprep.subr.bf16.mxu1 %v9042_v24  ;;  %v516_v23 = vld [vmem:[%s9668_s30 + $0x40] sm:$0xff]  ;;  %297 = vst [vmem:[#allocation2 + $0x30] sm:$0x1] %v296_v21  ;;  %v299_v27 = vsel %vm9680_vm2, 0, %v298_v22  ;;  %v687_v37 = vsel %vm9704_vm6, %v679_v30, %v686_v31  ;;  %977 = vst [vmem:[#allocation2 + $0x24] sm:$0xf] %v976_v38  ;;  %v7789_v22 = vpack.c.bf16 %v520_v4, %v520_v4 }
  0x76   : > { %300 = vst [vmem:[#allocation2 + $0x3c] sm:$0x1] %v299_v27  ;;  %v7785_v36 = vpack.c.bf16 %v516_v23, %v516_v23  ;;  %978 = vst [vmem:[#allocation2 + $0x28] sm:$0xf] %v687_v37  ;;  %v9747_v51 = vld [vmem:[#allocation2 + $0xc] sm:$0xff]   ;;  %v305_v16 = vsel %vm9680_vm2, 0, %v304_v9  ;;  %v7790_v23 = vpack.c.bf16 %v521_v10, %v521_v10  ;;  %p9426_p1 = pnand %p9425_p11, %p11756_p10 }
  0x77   : > { %1519 = vmatprep.mubr.bf16.mxu0 %v9747_v51  ;;  %v732_v21 = vshrl.u32 %v7788_v7, 16  ;;  %306 = vst [vmem:[#allocation2 + $0x54] sm:$0x1] %v305_v16  ;;  %v735_v26 = vshll.u32 %v7788_v7, 16  ;;  %v741_v29 = vshrl.u32 %v7789_v22, 16  ;;  %v744_v30 = vshll.u32 %v7789_v22, 16 }
  0x78   : > { %7857 = vmatpush3.bf16.msra.mxu0 %v9043_v34  ;;  %8673 = vmatpush3.bf16.msra.mxu1 %v9042_v24  ;;  %v7784_v24 = vpack.c.bf16 %v515_v15, %v515_v15  ;;  %v707_v43 = vshrl.u32 %v7785_v36, 16  ;;  %v710_v47 = vshll.u32 %v7785_v36, 16  ;;  %v9750_v58 = vld [vmem:[#allocation2 + $0x18] sm:$0xff]   ;;  %v726_v15 = vrot.slane %v724_v3, 7  ;;  %v9054_v32 = vld [vmem:[#allocation8 + $0xf0] sm:$0xff]   ;;  %v9062_v4 = vld [vmem:[#allocation8 + $0x120] sm:$0xff]   ;;  %p9427_p2 = pneg %p9426_p1 }
  0x79   : > { %8706 = vmatprep.subr.bf16.mxu0 %v9694_v50  ;;  %7978 = vmatprep.subr.bf16.mxu1 %v9049_v0  ;;  %v9757_v0 = vrot.slane %v715_v48, 7  ;;  %v9775_v27 = vrot.slane %v732_v21, 7  ;;  %v749_v31 = vshrl.u32 %v7790_v23, 16  ;;  %v743_v36 = vrot.slane %v741_v29, 7  ;;  %v9058_v38 = vld [vmem:[#allocation8 + $0x128] sm:$0xff]   ;;  %v522_v39 = vld [vmem:[%s9668_s30 + $0x70] sm:$0xff] }
  0x7a   : > { %v698_v34 = vshrl.u32 %v7784_v24, 16  ;;  %v701_v35 = vshll.u32 %v7784_v24, 16  ;;  %v709_v60 = vrot.slane %v707_v43, 7  ;;  %8674 = vmatprep.mubr.bf16.mxu1 %v9750_v58  ;;  %v729_v24 = vor.u32 %v727_v8, %v726_v15  ;;  %v996_v28 = vld [vmem:[#allocation2 + $0x48] sm:$0xf]  ;;  %v525_v3 = vld [vmem:[%s9668_s30 + $0x88] sm:$0xff] }
  0x7b   : > { %1520 = vmatmul.mubr.bf16.vlgmr.msra.gmra.mxu0 %v9046_v46  ;;  %v720_v13 = vor.u32 %v718_v54, %v9757_v0  ;;  %v730_v25 = vrot.slane %v726_v15, 4  ;;  %v9780_v37 = vrot.slane %v749_v31, 7  ;;  %v746_v44 = vor.u32 %v744_v30, %v743_v36  ;;  %v523_v48 = vld [vmem:[%s9668_s30 + $0x78] sm:$0xff]  ;;  %v9059_v54 = vld [vmem:[#allocation8 + $0xe8] sm:$0xff]   ;;  %v526_v22 = vld [vmem:[%s9668_s30 + $0x90] sm:$0xff]  ;;  %s9502_s22 = smov [#allocation11]  }
  0x7c   : > { %v9742_v42 = vrot.slane %v698_v34, 7  ;;  %v982_v59 = vld [vmem:[#allocation2 + $0x30] sm:$0xf]  ;;  %v712_v5 = vor.u32 %v710_v47, %v709_v60  ;;  %v713_v6 = vrot.slane %v709_v60, 4  ;;  %8707 = vmatpush3.bf16.msra.mxu0 %v9694_v50  ;;  %1527 = vmatprep.mubr.bf16.mxu0 %v9750_v58  ;;  %v997_v33 = vsel %vm9713_vm7, %v729_v24, %v996_v28  ;;  %v307_v47 = vld [vmem:[#allocation2 + $0x60] sm:$0x1] }
  0x7d   : > { %v983_v62 = vsel %vm9713_vm7, %v695_v40, %v982_v59  ;;  %v989_v1 = vld [vmem:[#allocation2 + $0x3c] sm:$0xf]  ;;  %v9768_v17 = vld [vmem:[#allocation2 + $0x24] sm:$0xff]   ;;  %8708 = vmatprep.subr.bf16.mxu0 %v9057_v11  ;;  %v752_v34 = vshll.u32 %v7790_v23, 16  ;;  %998 = vst [vmem:[#allocation2 + $0x48] sm:$0xf] %v997_v33  ;;  %v7792_v56 = vpack.c.bf16 %v523_v48, %v523_v48  ;;  %v7794_v10 = vpack.c.bf16 %v525_v3, %v525_v3 }
  0x7e   : > { %v703_v53 = vor.u32 %v701_v35, %v9742_v42  ;;  %984 = vst [vmem:[#allocation2 + $0x30] sm:$0xf] %v983_v62  ;;  %v990_v19 = vsel %vm9713_vm7, %v712_v5, %v989_v1  ;;  %v721_v50 = vsel %vm9704_vm6, %v713_v6, %v720_v13  ;;  %8675 = vmatmul.mubr.bf16.vlgmr.msra.gmra.mxu1 %v9768_v17  ;;  %v747_v45 = vrot.slane %v743_v36, 4  ;;  %v310_v49 = vld [vmem:[#allocation2 + $0x6c] sm:$0x1]  ;;  %v524_v60 = vld [vmem:[%s9668_s30 + $0x80] sm:$0xff] }
  0x7f   : > { %991 = vst [vmem:[#allocation2 + $0x3c] sm:$0xf] %v990_v19  ;;  %992 = vst [vmem:[#allocation2 + $0x40] sm:$0xf] %v721_v50  ;;  %7979 = vmatpush3.bf16.msra.mxu1 %v9050_v12  ;;  %v737_v35 = vor.u32 %v735_v26, %v9775_v27  ;;  %v754_v46 = vor.u32 %v752_v34, %v9780_v37  ;;  %v311_v2 = vsel %vm9680_vm2, 0, %v310_v49  ;;  %v766_v7 = vshrl.u32 %v7792_v56, 16 }
  0x80   : > { %v704_v61 = vsel %vm9704_vm6, %v696_v41, %v703_v53  ;;  %8709 = vmatpush3.bf16.msra.mxu0 %v9057_v11  ;;  %7980 = vmatprep.subr.bf16.mxu1 %v9053_v14  ;;  %v7791_v41 = vpack.c.bf16 %v522_v39, %v522_v39  ;;  %v1003_v53 = vld [vmem:[#allocation2 + $0x54] sm:$0xf]  ;;  %v769_v8 = vshll.u32 %v7792_v56, 16  ;;  %312 = vst [vmem:[#allocation2 + $0x6c] sm:$0x1] %v311_v2  ;;  %v783_v19 = vshrl.u32 %v7794_v10, 16 }
  0x81   : > { %985 = vst [vmem:[#allocation2 + $0x34] sm:$0xf] %v704_v61  ;;  %v738_v43 = vsel %vm9704_vm6, %v730_v25, %v737_v35  ;;  %v755_v61 = vsel %vm9704_vm6, %v747_v45, %v754_v46  ;;  %v1004_v62 = vsel %vm9713_vm7, %v746_v44, %v1003_v53  ;;  %v7793_v9 = vpack.c.bf16 %v524_v60, %v524_v60  ;;  %v9063_v14 = vld [vmem:[#allocation8 + $0xe0] sm:$0xff]   ;;  %v313_v24 = vld [vmem:[#allocation2 + $0x78] sm:$0x1]  ;;  %v527_v25 = vld [vmem:[%s9668_s30 + $0x98] sm:$0xff] }
  0x82   : > { %999 = vst [vmem:[#allocation2 + $0x4c] sm:$0xf] %v738_v43  ;;  %v758_v59 = vshrl.u32 %v7791_v41, 16  ;;  %v761_v1 = vshll.u32 %v7791_v41, 16  ;;  %1005 = vst [vmem:[#allocation2 + $0x54] sm:$0xf] %v1004_v62  ;;  %v7795_v26 = vpack.c.bf16 %v526_v22, %v526_v22 }
  0x83   : > { %1528 = vmatmul.mubr.bf16.gmra.mxu0 %v9747_v51  ;;  %7981 = vmatpush3.bf16.msra.mxu1 %v9054_v32  ;;  %v308_v51 = vsel %vm9680_vm2, 0, %v307_v47  ;;  %1006 = vst [vmem:[#allocation2 + $0x58] sm:$0xf] %v755_v61  ;;  %v9805_v12 = vrot.slane %v766_v7, 7  ;;  %v775_v13 = vshrl.u32 %v7793_v9, 16  ;;  %v778_v16 = vshll.u32 %v7793_v9, 16 }
  0x84   : > { %1535 = vmatprep.mubr.bf16.mxu0 %v9768_v17  ;;  %7982 = vmatprep.subr.bf16.mxu1 %v9058_v38  ;;  %309 = vst [vmem:[#allocation2 + $0x60] sm:$0x1] %v308_v51  ;;  %v760_v6 = vrot.slane %v758_v59, 7  ;;  %v786_v21 = vshll.u32 %v7794_v10, 16  ;;  %v528_v28 = vld [vmem:[%s9668_s30 + $0xa0] sm:$0xff]  ;;  %v9814_v30 = vrot.slane %v783_v19, 7  ;;  %v7796_v32 = vpack.c.bf16 %v527_v25, %v527_v25 }
  0x85   : > { %v771_v23 = vor.u32 %v769_v8, %v9805_v12  ;;  %v777_v50 = vrot.slane %v775_v13, 7  ;;  %v314_v31 = vsel %vm9680_vm2, 0, %v313_v24  ;;  %v529_v33 = vld [vmem:[%s9668_s30 + $0xa8] sm:$0xff]  ;;  %v7797_v34 = vpack.c.bf16 %v528_v28, %v528_v28  ;;  %v316_v43 = vld [vmem:[#allocation2 + $0x84] sm:$0x1]  ;;  %v9067_v8 = vld [vmem:[#allocation8 + $0x118] sm:$0xff]  }
  0x86   : > { %v9802_v5 = vld [vmem:[#allocation2 + $0x3c] sm:$0xff]   ;;  %v764_v11 = vrot.slane %v760_v6, 4  ;;  %v763_v15 = vor.u32 %v761_v1, %v760_v6  ;;  %315 = vst [vmem:[#allocation2 + $0x78] sm:$0x1] %v314_v31  ;;  %v792_v41 = vshrl.u32 %v7795_v26, 16  ;;  %v788_v45 = vor.u32 %v786_v21, %v9814_v30  ;;  %v9068_v10 = vld [vmem:[#allocation8 + $0xd8] sm:$0xff]  }
  0x87   : > { %7983 = vmatpush3.bf16.msra.mxu1 %v9059_v54  ;;  %v780_v38 = vor.u32 %v778_v16, %v777_v50  ;;  %v781_v39 = vrot.slane %v777_v50, 4  ;;  %v7798_v46 = vpack.c.bf16 %v529_v33, %v529_v33  ;;  %v1017_v47 = vld [vmem:[#allocation2 + $0x6c] sm:$0xf]  ;;  %v795_v49 = vshll.u32 %v7795_v26, 16  ;;  %v9066_v3 = vld [vmem:[#allocation8 + $0x168] sm:$0xff]   ;;  %v530_v21 = vld [vmem:[%s9668_s30 + $0xb0] sm:$0xff] }
  0x88   : > { %v9783_v40 = vld [vmem:[#allocation2 + $0x30] sm:$0xff]   ;;  %7984 = vmatprep.subr.bf16.mxu1 %v9062_v4  ;;  %v772_v35 = vsel %vm9704_vm6, %v764_v11, %v771_v23  ;;  %v794_v48 = vrot.slane %v792_v41, 7  ;;  %v800_v53 = vshrl.u32 %v7796_v32, 16  ;;  %v803_v54 = vshll.u32 %v7796_v32, 16  ;;  %8710 = vmatprep.subr.bf16.mxu0 %v9066_v3  ;;  %v531_v22 = vld [vmem:[%s9668_s30 + $0xb8] sm:$0xff]  ;;  %v533_v33 = vld [vmem:[%s9668_s30 + $0xc8] sm:$0xff] }
  0x89   : > { %8678 = vmatprep.mubr.bf16.mxu1 %v9783_v40  ;;  %v9811_v29 = vld [vmem:[#allocation2 + $0x48] sm:$0xff]   ;;  %1013 = vst [vmem:[#allocation2 + $0x64] sm:$0xf] %v772_v35  ;;  %v789_v51 = vsel %vm9704_vm6, %v781_v39, %v788_v45  ;;  %v1018_v56 = vsel %vm9713_vm7, %v780_v38, %v1017_v47  ;;  %v317_v59 = vsel %vm9680_vm2, 0, %v316_v43  ;;  %v809_v60 = vshrl.u32 %v7797_v34, 16  ;;  %8711 = vmatpush3.bf16.msra.mxu0 %v9066_v3  ;;  %v532_v32 = vld [vmem:[%s9668_s30 + $0xc0] sm:$0xff] }
  0x8a   : > { %8679 = vmatmul.mubr.bf16.gmra.mxu1 %v9802_v5  ;;  %1019 = vst [vmem:[#allocation2 + $0x6c] sm:$0xf] %v1018_v56  ;;  %1020 = vst [vmem:[#allocation2 + $0x70] sm:$0xf] %v789_v51  ;;  %v797_v61 = vor.u32 %v795_v49, %v794_v48  ;;  %v798_v62 = vrot.slane %v794_v48, 4  ;;  %v9835_v1 = vrot.slane %v800_v53, 7  ;;  %v7799_v25 = vpack.c.bf16 %v530_v21, %v530_v21 }
  0x8b   : > { %1536 = vmatmul.mubr.bf16.gmra.mxu0 %v9750_v58  ;;  %v1010_v36 = vld [vmem:[#allocation2 + $0x60] sm:$0xf]  ;;  %8682 = vmatprep.mubr.bf16.mxu1 %v9811_v29  ;;  %v9823_v58 = vld [vmem:[#allocation2 + $0x54] sm:$0xff]   ;;  %318 = vst [vmem:[#allocation2 + $0x84] sm:$0x1] %v317_v59  ;;  %v812_v2 = vshll.u32 %v7797_v34, 16  ;;  %v7800_v26 = vpack.c.bf16 %v531_v22, %v531_v22  ;;  %v7801_v38 = vpack.c.bf16 %v532_v32, %v532_v32 }
  0x8c   : > { %1543 = vmatprep.mubr.bf16.mxu0 %v9783_v40  ;;  %v1011_v44 = vsel %vm9713_vm7, %v763_v15, %v1010_v36  ;;  %7985 = vmatpush3.bf16.msra.mxu1 %v9063_v14  ;;  %v811_v4 = vrot.slane %v809_v60, 7  ;;  %v817_v6 = vshrl.u32 %v7798_v46, 16  ;;  %v820_v7 = vshll.u32 %v7798_v46, 16  ;;  %v319_v15 = vld [vmem:[#allocation2 + $0x90] sm:$0x1]  ;;  %v9071_v46 = vld [vmem:[#allocation8 + $0x110] sm:$0xff]  }
  0x8d   : > { %1012 = vst [vmem:[#allocation2 + $0x60] sm:$0xf] %v1011_v44  ;;  %v805_v9 = vor.u32 %v803_v54, %v9835_v1  ;;  %v1024_v11 = vld [vmem:[#allocation2 + $0x78] sm:$0xf]  ;;  %7986 = vmatprep.subr.bf16.mxu1 %v9067_v8  ;;  %v322_v28 = vld [vmem:[#allocation2 + $0x9c] sm:$0x1]  ;;  %v7802_v39 = vpack.c.bf16 %v533_v33, %v533_v33 }
  0x8e   : > { %v815_v13 = vrot.slane %v811_v4, 4  ;;  %v9839_v14 = vrot.slane %v817_v6, 7  ;;  %v1025_v19 = vsel %vm9713_vm7, %v797_v61, %v1024_v11  ;;  %v814_v50 = vor.u32 %v812_v2, %v811_v4  ;;  %v9072_v54 = vld [vmem:[#allocation8 + $0xd0] sm:$0xff]   ;;  %v325_v3 = vld [vmem:[#allocation2 + $0xa8] sm:$0x1]  ;;  %s9428_s17 = sshll.u32 %s9502_s22, 4  ;;  %s9429_s17 = int_to_ptr.vmem [resolvable:$false] %s9428_s17 }
  0x8f   : > { %v806_v16 = vsel %vm9704_vm6, %v798_v62, %v805_v9  ;;  %1026 = vst [vmem:[#allocation2 + $0x78] sm:$0xf] %v1025_v19  ;;  %v323_v31 = vsel %vm9680_vm2, 0, %v322_v28  ;;  %v826_v36 = vshrl.u32 %v7799_v25, 16  ;;  %v829_v43 = vshll.u32 %v7799_v25, 16  ;;  %v534_v60 = vld [vmem:[%s9668_s30 + $0xd0] sm:$0xff]  ;;  %p9431_p6 = scmp.lt.s32.totalorder %s11626_s28, %s9429_s17 }
  0x90   : > { %1027 = vst [vmem:[#allocation2 + $0x7c] sm:$0xf] %v806_v16  ;;  %v822_v24 = vor.u32 %v820_v7, %v9839_v14  ;;  %7987 = vmatpush3.bf16.msra.mxu1 %v9068_v10  ;;  %324 = vst [vmem:[#allocation2 + $0x9c] sm:$0x1] %v323_v31  ;;  %v834_v44 = vshrl.u32 %v7800_v26, 16  ;;  %v837_v45 = vshll.u32 %v7800_v26, 16  ;;  %v7803_v4 = vpack.c.bf16 %v534_v60, %v534_v60 }
  0x91   : > { %v9858_v34 = vld [vmem:[#allocation2 + $0x6c] sm:$0xff]   ;;  %v828_v48 = vrot.slane %v826_v36, 7  ;;  %v843_v49 = vshrl.u32 %v7801_v38, 16  ;;  %v846_v53 = vshll.u32 %v7801_v38, 16  ;;  %v851_v56 = vshrl.u32 %v7802_v39, 16  ;;  %7988 = vmatprep.subr.bf16.mxu1 %v9071_v46  ;;  %v537_v28 = vld [vmem:[%s9668_s30 + $0xe8] sm:$0xff] }
  0x92   : > { %8683 = vmatmul.mubr.bf16.gmra.mxu1 %v9823_v58  ;;  %v823_v35 = vsel %vm9704_vm6, %v815_v13, %v822_v24  ;;  %v1031_v41 = vld [vmem:[#allocation2 + $0x84] sm:$0xf]  ;;  %v9865_v51 = vrot.slane %v834_v44, 7  ;;  %v854_v59 = vshll.u32 %v7802_v39, 16  ;;  %v535_v13 = vld [vmem:[%s9668_s30 + $0xd8] sm:$0xff]  ;;  %v860_v21 = vshrl.u32 %v7803_v4, 16 }
  0x93   : > { %1544 = vmatmul.mubr.bf16.gmra.mxu0 %v9768_v17  ;;  %v320_v17 = vsel %vm9680_vm2, 0, %v319_v15  ;;  %1034 = vst [vmem:[#allocation2 + $0x88] sm:$0xf] %v823_v35  ;;  %v1032_v47 = vsel %vm9713_vm7, %v814_v50, %v1031_v41  ;;  %v831_v61 = vor.u32 %v829_v43, %v828_v48  ;;  %v832_v62 = vrot.slane %v828_v48, 4  ;;  %v328_v22 = vld [vmem:[#allocation2 + $0xb4] sm:$0x1] }
  0x94   : > { %1551 = vmatprep.mubr.bf16.mxu0 %v9802_v5  ;;  %v9850_v23 = vld [vmem:[#allocation2 + $0x60] sm:$0xff]   ;;  %321 = vst [vmem:[#allocation2 + $0x90] sm:$0x1] %v320_v17  ;;  %1033 = vst [vmem:[#allocation2 + $0x84] sm:$0xf] %v1032_v47  ;;  %v845_v2 = vrot.slane %v843_v49, 7  ;;  %7989 = vmatpush3.bf16.msra.mxu1 %v9072_v54  ;;  %v839_v7 = vor.u32 %v837_v45, %v9865_v51  ;;  %v7804_v17 = vpack.c.bf16 %v535_v13, %v535_v13 }
  0x95   : > { %8686 = vmatprep.mubr.bf16.mxu1 %v9850_v23  ;;  %v9873_v11 = vrot.slane %v851_v56, 7  ;;  %v536_v50 = vld [vmem:[%s9668_s30 + $0xe0] sm:$0xff]  ;;  %v863_v26 = vshll.u32 %v7803_v4, 16  ;;  %v862_v32 = vrot.slane %v860_v21, 7  ;;  %v329_v36 = vsel %vm9680_vm2, 0, %v328_v22  ;;  %v9076_v54 = vld [vmem:[#allocation8 + $0x108] sm:$0xff]  }
  0x96   : > { %v848_v9 = vor.u32 %v846_v53, %v845_v2  ;;  %v849_v10 = vrot.slane %v845_v2, 4  ;;  %v840_v15 = vsel %vm9704_vm6, %v832_v62, %v839_v7  ;;  %v9075_v31 = vld [vmem:[#allocation8 + $0x160] sm:$0xff]   ;;  %v868_v33 = vshrl.u32 %v7804_v17, 16  ;;  %330 = vst [vmem:[#allocation2 + $0xb4] sm:$0x1] %v329_v36  ;;  %v9077_v56 = vld [vmem:[#allocation8 + $0xc8] sm:$0xff]   ;;  %7990 = vmatprep.subr.bf16.mxu1 %v9076_v54 }
  0x97   : > { %v9869_v6 = vld [vmem:[#allocation2 + $0x78] sm:$0xff]   ;;  %1041 = vst [vmem:[#allocation2 + $0x94] sm:$0xf] %v840_v15  ;;  %v856_v24 = vor.u32 %v854_v59, %v9873_v11  ;;  %v871_v35 = vshll.u32 %v7804_v17, 16  ;;  %v7805_v41 = vpack.c.bf16 %v536_v50, %v536_v50  ;;  %v7806_v43 = vpack.c.bf16 %v537_v28, %v537_v28  ;;  %8712 = vmatprep.subr.bf16.mxu0 %v9075_v31  ;;  %v538_v60 = vld [vmem:[%s9668_s30 + $0xf0] sm:$0xff]  ;;  %v539_v15 = vld [vmem:[%s9668_s30 + $0xf8] sm:$0xff] }
  0x98   : > { %v1045_v19 = vld [vmem:[#allocation2 + $0x9c] sm:$0xf]  ;;  %v865_v44 = vor.u32 %v863_v26, %v862_v32  ;;  %v866_v45 = vrot.slane %v862_v32, 4  ;;  %v9894_v46 = vrot.slane %v868_v33, 7  ;;  %8713 = vmatpush3.bf16.msra.mxu0 %v9075_v31  ;;  %v7807_v4 = vpack.c.bf16 %v538_v60, %v538_v60  ;;  %7991 = vmatpush3.bf16.msra.mxu1 %v9077_v56  ;;  %v334_v50 = vld [vmem:[#allocation2 + $0xcc] sm:$0x1] }
  0x99   : > { %v1046_v25 = vsel %vm9713_vm7, %v848_v9, %v1045_v19  ;;  %v857_v39 = vsel %vm9704_vm6, %v849_v10, %v856_v24  ;;  %v877_v47 = vshrl.u32 %v7805_v41, 16  ;;  %v880_v48 = vshll.u32 %v7805_v41, 16  ;;  %v9081_v36 = vld [vmem:[#allocation8 + $0xc0] sm:$0xff]   ;;  %s9430_s29 = scalar_lea.vmem %s9429_s17, 8192 }
  0x9a   : > { %8687 = vmatmul.mubr.bf16.gmra.mxu1 %v9858_v34  ;;  %1047 = vst [vmem:[#allocation2 + $0x9c] sm:$0xf] %v1046_v25  ;;  %1048 = vst [vmem:[#allocation2 + $0xa0] sm:$0xf] %v857_v39  ;;  %v885_v49 = vshrl.u32 %v7806_v43, 16  ;;  %v888_v53 = vshll.u32 %v7806_v43, 16  ;;  %v873_v59 = vor.u32 %v871_v35, %v9894_v46  ;;  %v7808_v17 = vpack.c.bf16 %v539_v15, %v539_v15  ;;  %p9432_p12 = scmp.lt.s32.totalorder %s9430_s29, %s9424_s14 }
  0x9b   : > { %1552 = vmatmul.mubr.bf16.gmra.mxu0 %v9783_v40  ;;  %v1038_v8 = vld [vmem:[#allocation2 + $0x90] sm:$0xf]  ;;  %v326_v40 = vsel %vm9680_vm2, 0, %v325_v3  ;;  %8690 = vmatprep.mubr.bf16.mxu1 %v9869_v6  ;;  %v9890_v38 = vld [vmem:[#allocation2 + $0x84] sm:$0xff]   ;;  %v879_v62 = vrot.slane %v877_v47, 7  ;;  %v894_v21 = vshrl.u32 %v7807_v4, 16 }
  0x9c   : > { %1559 = vmatprep.mubr.bf16.mxu0 %v9811_v29  ;;  %v1039_v16 = vsel %vm9713_vm7, %v831_v61, %v1038_v8  ;;  %327 = vst [vmem:[#allocation2 + $0xa8] sm:$0x1] %v326_v40  ;;  %v9901_v2 = vrot.slane %v885_v49, 7  ;;  %v331_v3 = vld [vmem:[#allocation2 + $0xc0] sm:$0x1]  ;;  %v874_v7 = vsel %vm9704_vm6, %v866_v45, %v873_v59  ;;  %v897_v22 = vshll.u32 %v7807_v4, 16  ;;  %p9433_p7 = por %p9432_p12, %p9431_p6 }
  0x9d   : > { %1040 = vst [vmem:[#allocation2 + $0x90] sm:$0xf] %v1039_v16  ;;  %v332_v9 = vsel %vm9680_vm2, 0, %v331_v3  ;;  %1055 = vst [vmem:[#allocation2 + $0xac] sm:$0xf] %v874_v7  ;;  %v882_v10 = vor.u32 %v880_v48, %v879_v62  ;;  %v883_v40 = vrot.slane %v879_v62, 4 }
  0x9e   : > { %v890_v13 = vor.u32 %v888_v53, %v9901_v2  ;;  %333 = vst [vmem:[#allocation2 + $0xc0] sm:$0x1] %v332_v9  ;;  %v9080_v16 = vld [vmem:[#allocation8 + $0x100] sm:$0xff]   ;;  %v335_v28 = vsel %vm9680_vm2, 0, %v334_v50  ;;  %v896_v32 = vrot.slane %v894_v21, 7  ;;  %v902_v33 = vshrl.u32 %v7808_v17, 16  ;;  %p9434_p9 = pnand %p9433_p7, %p9427_p2 }
  0x9f   : > { %v1059_v19 = vld [vmem:[#allocation2 + $0xb4] sm:$0xf]  ;;  %7992 = vmatprep.subr.bf16.mxu1 %v9080_v16  ;;  %v905_v35 = vshll.u32 %v7808_v17, 16  ;;  %336 = vst [vmem:[#allocation2 + $0xcc] sm:$0x1] %v335_v28  ;;  %v9938_v54 = vld [vmem:[#allocation2 + $0xc] sm:$0xff]  }
  0xa0   : > { %v891_v25 = vsel %vm9704_vm6, %v883_v40, %v890_v13  ;;  %v1060_v26 = vsel %vm9713_vm7, %v882_v10, %v1059_v19  ;;  %v899_v39 = vor.u32 %v897_v22, %v896_v32  ;;  %v900_v41 = vrot.slane %v896_v32, 4  ;;  %7993 = vmatpush3.bf16.msra.mxu1 %v9081_v36  ;;  %v339_v47 = vld [vmem:[#allocation2 + $0x8] sm:$0x1]  ;;  %v9084_v62 = vld [vmem:[#allocation2] sm:$0xff]   ;;  %v9963_v19 = vld [vmem:[#allocation2 + $0x18] sm:$0xff]  }
  0xa1   : > { %v9914_v24 = vld [vmem:[#allocation2 + $0x9c] sm:$0xff]   ;;  %1061 = vst [vmem:[#allocation2 + $0xb4] sm:$0xf] %v1060_v26  ;;  %1062 = vst [vmem:[#allocation2 + $0xb8] sm:$0xf] %v891_v25  ;;  %v9931_v43 = vrot.slane %v902_v33, 7 }
  0xa2   : > { %8691 = vmatmul.mubr.bf16.gmra.mxu1 %v9890_v38  ;;  %v9086_v3 = vld [vmem:[#allocation8 + $0x158] sm:$0xff]   ;;  %v2087_v4 = vshll.u32 %v9938_v54, 16  ;;  %v2075_v15 = vshll.u32 %v9084_v62, 16  ;;  %v9092_v21 = vld [vmem:[#allocation8 + $0x150] sm:$0xff]   ;;  %v671_v22 = vrot.slane %v9708_v57, 4  ;;  %v2085_v25 = vshrl.u32 %v9938_v54, 16 }
  0xa3   : > { %1560 = vmatmul.mubr.bf16.gmra.mxu0 %v9802_v5  ;;  %v1052_v61 = vld [vmem:[#allocation2 + $0xa8] sm:$0xf]  ;;  %v907_v49 = vor.u32 %v905_v35, %v9931_v43  ;;  %8714 = vmatprep.subr.bf16.mxu0 %v9086_v3  ;;  %v2073_v28 = vshrl.u32 %v9084_v62, 16  ;;  %v351_v33 = vld [vmem:[#allocation2 + $0x38] sm:$0x1]  ;;  %v688_v35 = vrot.slane %v9729_v20, 4 }
  0xa4   : > { %1567 = vmatprep.mubr.bf16.mxu0 %v9823_v58  ;;  %v9903_v5 = vld [vmem:[#allocation2 + $0x90] sm:$0xff]   ;;  %v1053_v8 = vsel %vm9713_vm7, %v865_v44, %v1052_v61  ;;  %v654_v61 = vrot.slane %v9696_v52, 4  ;;  %v9954_v7 = vld [vmem:[#allocation8 + $0x238] sm:$0xff]   ;;  %8715 = vmatpush3.bf16.msra.mxu0 %v9086_v3  ;;  %v2089_v26 = vrot.slane %v2087_v4, 1  ;;  %v2077_v32 = vrot.slane %v2075_v15, 1  ;;  %v9098_v62 = vld [vmem:[#allocation8 + $0x148] sm:$0xff]  }
  0xa5   : > { %1054 = vst [vmem:[#allocation2 + $0xa8] sm:$0xf] %v1053_v8  ;;  %8694 = vmatprep.mubr.bf16.mxu1 %v9903_v5  ;;  %v342_v44 = vld [vmem:[#allocation2 + $0x14] sm:$0x1]  ;;  %v1066_v53 = vld [vmem:[#allocation2 + $0xc0] sm:$0xf]  ;;  %v908_v56 = vsel %vm9704_vm6, %v900_v41, %v907_v49  ;;  %8754 = vmatprep.subr.bf16.mxu1 %v9954_v7 }
  0xa6   : > { %v343_v45 = vsel %vm9924_vm8, 0, %v342_v44  ;;  %v1067_v59 = vsel %vm9713_vm7, %v899_v39, %v1066_v53  ;;  %1069 = vst [vmem:[#allocation2 + $0xc4] sm:$0xf] %v908_v56  ;;  %v345_v8 = vld [vmem:[#allocation2 + $0x20] sm:$0x1]  ;;  %v9079_v9 = vld [vmem:[#allocation2 + $0xcc] sm:$0xff]   ;;  %8716 = vmatprep.subr.bf16.mxu0 %v9092_v21  ;;  %v2090_v53 = vor.u32 %v2089_v26, %v2085_v25 }
  0xa7   : > { %344 = vst [vmem:[#allocation2 + $0x14] sm:$0x1] %v343_v45  ;;  %1068 = vst [vmem:[#allocation2 + $0xc0] sm:$0xf] %v1067_v59  ;;  %v346_v52 = vsel %vm9924_vm8, 0, %v345_v8  ;;  %v2099_v57 = vshll.u32 %v9963_v19, 16 }
  0xa8   : > { %v9947_v60 = vld [vmem:[#allocation2 + $0xb4] sm:$0xff]   ;;  %347 = vst [vmem:[#allocation2 + $0x20] sm:$0x1] %v346_v52  ;;  %v9974_v39 = vld [vmem:[#allocation2 + $0x24] sm:$0xff]   ;;  %8717 = vmatpush3.bf16.msra.mxu0 %v9092_v21  ;;  %v352_v41 = vsel %vm9924_vm8, 0, %v351_v33  ;;  %v705_v20 = vrot.slane %v9742_v42, 4 }
  0xa9   : > { %353 = vst [vmem:[#allocation2 + $0x38] sm:$0x1] %v352_v41  ;;  %v354_v49 = vld [vmem:[#allocation2 + $0x44] sm:$0x1]  ;;  %v722_v59 = vrot.slane %v9757_v0, 4  ;;  %v2097_v4 = vshrl.u32 %v9963_v19, 16  ;;  %8718 = vmatprep.subr.bf16.mxu0 %v9098_v62 }
  0xaa   : > { %8695 = vmatmul.mubr.bf16.gmra.mxu1 %v9914_v24  ;;  %v355_v56 = vsel %vm9924_vm8, 0, %v354_v49  ;;  %v357_v52 = vld [vmem:[#allocation2 + $0x50] sm:$0x1]  ;;  %v739_v15 = vrot.slane %v9775_v27, 4  ;;  %v2109_v27 = vshrl.u32 %v9974_v39, 16 }
  0xab   : > { %1568 = vmatmul.mubr.bf16.gmra.mxu0 %v9811_v29  ;;  %v340_v29 = vsel %vm9924_vm8, 0, %v339_v47  ;;  %v2078_v47 = vor.u32 %v2077_v32, %v2073_v28  ;;  %356 = vst [vmem:[#allocation2 + $0x44] sm:$0x1] %v355_v56  ;;  %v9104_v21 = vld [vmem:[#allocation8 + $0x140] sm:$0xff]  }
  0xac   : > { %1575 = vmatprep.mubr.bf16.mxu0 %v9850_v23  ;;  %v9935_v48 = vld [vmem:[#allocation2 + $0xa8] sm:$0xff]   ;;  %341 = vst [vmem:[#allocation2 + $0x8] sm:$0x1] %v340_v29  ;;  %v9981_v29 = vld [vmem:[#allocation2 + $0x30] sm:$0xff]   ;;  %8719 = vmatpush3.bf16.msra.mxu0 %v9098_v62  ;;  %v773_v62 = vrot.slane %v9805_v12, 4 }
  0xad   : > { %8698 = vmatprep.mubr.bf16.mxu1 %v9935_v48  ;;  %8720 = vmatprep.subr.bf16.mxu0 %v9104_v21 }
  0xae   : > { %v965_v10 = vld [vmem:[#allocation2 + $0x14] sm:$0x1]  ;;  %v9961_v16 = vld [vmem:[#allocation2 + $0xc0] sm:$0xff]  }
  0xaf   : > { %v966_v40 = vsel %vm9680_vm2, %v654_v61, %v965_v10  ;;  %v972_v36 = vld [vmem:[#allocation2 + $0x20] sm:$0x1]  ;;  %v2111_v10 = vshll.u32 %v9974_v39, 16  ;;  %v9105_v39 = vld [vmem:[#allocation8 + $0x220] sm:$0xff]  }
  0xb0   : > { %967 = vst [vmem:[#allocation2 + $0x14] sm:$0x1] %v966_v40  ;;  %v9093_v40 = vld [vmem:[#allocation8 + $0x230] sm:$0xff]   ;;  %v986_v19 = vld [vmem:[#allocation2 + $0x38] sm:$0x1]  ;;  %8721 = vmatpush3.bf16.msra.mxu0 %v9104_v21 }
  0xb1   : > { %v987_v25 = vsel %vm9680_vm2, %v705_v20, %v986_v19  ;;  %v2113_v26 = vrot.slane %v2111_v10, 1 }
  0xb2   : > { %8699 = vmatmul.mubr.bf16.gmra.mxu1 %v9947_v60  ;;  %988 = vst [vmem:[#allocation2 + $0x38] sm:$0x1] %v987_v25  ;;  %v993_v33 = vld [vmem:[#allocation2 + $0x44] sm:$0x1] }
  0xb3   : > { %1576 = vmatmul.mubr.bf16.gmra.mxu0 %v9823_v58  ;;  %v348_v58 = vld [vmem:[#allocation2 + $0x2c] sm:$0x1]  ;;  %v9085_v13 = vld [vmem:[#allocation2 + $0x8] ss:$0 sps:$4 sm:$0x11]   ;;  %8702 = vmatprep.mubr.bf16.mxu1 %v9961_v16 }
  0xb4   : > { %1583 = vmatprep.mubr.bf16.mxu0 %v9858_v34  ;;  %v349_v17 = vsel %vm9924_vm8, 0, %v348_v58  ;;  %v2080_v50 = vshll.u32 %v9085_v13, 16  ;;  %v358_v58 = vsel %vm9924_vm8, 0, %v357_v52  ;;  %v360_v13 = vld [vmem:[#allocation2 + $0x5c] sm:$0x1]  ;;  %v9110_v52 = vld [vmem:[#allocation8 + $0x1f8] sm:$0xff]  }
  0xb5   : > { %350 = vst [vmem:[#allocation2 + $0x2c] sm:$0x1] %v349_v17  ;;  %359 = vst [vmem:[#allocation2 + $0x50] sm:$0x1] %v358_v58  ;;  %v361_v17 = vsel %vm9924_vm8, 0, %v360_v13  ;;  %v9112_v13 = vld [vmem:[#allocation8 + $0x218] sm:$0xff]   ;;  %8114 = vmatprep.subr.bf16.mxu0 %v9110_v52 }
  0xb6   : > { %v2082_v45 = vrot.slane %v2080_v50, 1  ;;  %362 = vst [vmem:[#allocation2 + $0x5c] sm:$0x1] %v361_v17 }
  0xb7   : > { %v9083_v44 = vld [vmem:[#allocation2 + $0x14] ss:$0 sps:$4 sm:$0x11]  }
  0xb8   : > { %v2092_v54 = vshll.u32 %v9083_v44, 16  ;;  %v2083_v42 = vsel %vm2071_vm9, %v2078_v47, %v2082_v45  ;;  %v363_v45 = vld [vmem:[#allocation2 + $0x68] sm:$0x1]  ;;  %v2114_v47 = vor.u32 %v2113_v26, %v2109_v27 }
  0xba   : > { %8703 = vmatmul.mubr.bf16.gmra.mxu1 %v9079_v9  ;;  %v2094_v3 = vrot.slane %v2092_v54, 1  ;;  %v2101_v9 = vrot.slane %v2099_v57, 1  ;;  %v994_v57 = vsel %vm9680_vm2, %v722_v59, %v993_v33  ;;  %v9095_v59 = vld [vmem:[#allocation2 + $0x38] ss:$0 sps:$4 sm:$0x11]  }
  0xbb   : > { %1584 = vmatmul.mubr.bf16.gmra.mxu0 %v9850_v23  ;;  %v973_v23 = vsel %vm9680_vm2, %v671_v22, %v972_v36  ;;  %v756_v22 = vrot.slane %v9780_v37, 4  ;;  %v2121_v37 = vshrl.u32 %v9981_v29, 16  ;;  %995 = vst [vmem:[#allocation2 + $0x44] sm:$0x1] %v994_v57 }
  0xbc   : > { %1591 = vmatprep.mubr.bf16.mxu0 %v9869_v6  ;;  %974 = vst [vmem:[#allocation2 + $0x20] sm:$0x1] %v973_v23  ;;  %v979_v61 = vld [vmem:[#allocation2 + $0x2c] sm:$0x1]  ;;  %v2095_v0 = vsel %vm2071_vm9, %v2090_v53, %v2094_v3  ;;  %v2102_v28 = vor.u32 %v2101_v9, %v2097_v4  ;;  %v1000_v20 = vld [vmem:[#allocation2 + $0x50] sm:$0x1] }
  0xbd   : > { %v980_v8 = vsel %vm9680_vm2, %v688_v35, %v979_v61  ;;  %2563 = vmatprep.mubr.bf16.mxu1 %v2095_v0  ;;  %v9099_v35 = vld [vmem:[#allocation8 + $0x228] sm:$0xff]   ;;  %v364_v53 = vsel %vm9924_vm8, 0, %v363_v45  ;;  %v1001_v54 = vsel %vm9680_vm2, %v739_v15, %v1000_v20  ;;  %v9121_v20 = vld [vmem:[#allocation8 + $0x210] sm:$0xff]  }
  0xbe   : > { %981 = vst [vmem:[#allocation2 + $0x2c] sm:$0x1] %v980_v8  ;;  %365 = vst [vmem:[#allocation2 + $0x68] sm:$0x1] %v364_v53 }
  0xbf   : > { %1002 = vst [vmem:[#allocation2 + $0x50] sm:$0x1] %v1001_v54  ;;  %v375_v54 = vld [vmem:[#allocation2 + $0x98] sm:$0x1] }
  0xc2   : > { %2564 = vmatmul.mubr.bf16.vlgmr.msra.gmra.mxu1 %v2083_v42  ;;  %v2128_v42 = vshll.u32 %v9095_v59, 16  ;;  %v9097_v10 = vld [vmem:[#allocation2 + $0x44] ss:$0 sps:$4 sm:$0x11]  }
  0xc3   : > { %1592 = vmatmul.mubr.bf16.gmra.mxu0 %v9858_v34  ;;  %v2123_v34 = vshll.u32 %v9981_v29, 16  ;;  %v9089_v50 = vld [vmem:[#allocation2 + $0x20] ss:$0 sps:$4 sm:$0x11]   ;;  %8755 = vmatpush3.bf16.msra.mxu1 %v9954_v7  ;;  %v366_v29 = vld [vmem:[#allocation2 + $0x74] sm:$0x1] }
  0xc4   : > { %1599 = vmatprep.mubr.bf16.mxu0 %v9890_v38  ;;  %v2104_v32 = vshll.u32 %v9089_v50, 16  ;;  %8756 = vmatprep.subr.bf16.mxu1 %v9093_v40  ;;  %v9096_v7 = vld [vmem:[#allocation2 + $0x3c] sm:$0xff]   ;;  %v367_v3 = vsel %vm9924_vm8, 0, %v366_v29  ;;  %v2130_v12 = vrot.slane %v2128_v42, 1 }
  0xc5   : > { %v2125_v36 = vrot.slane %v2123_v34, 1  ;;  %v9091_v44 = vld [vmem:[#allocation2 + $0x2c] ss:$0 sps:$4 sm:$0x11]   ;;  %v2135_v9 = vshll.u32 %v9096_v7, 16  ;;  %v2133_v58 = vshrl.u32 %v9096_v7, 16 }
  0xc6   : > { %v2106_v41 = vrot.slane %v2104_v32, 1  ;;  %v2116_v49 = vshll.u32 %v9091_v44, 16  ;;  %368 = vst [vmem:[#allocation2 + $0x74] sm:$0x1] %v367_v3  ;;  %v2140_v34 = vshll.u32 %v9097_v10, 16  ;;  %v9102_v32 = vld [vmem:[#allocation2 + $0x54] sm:$0xff]  }
  0xc7   : > { %8757 = vmatpush3.bf16.msra.mxu1 %v9093_v40  ;;  %v2126_v8 = vor.u32 %v2125_v36, %v2121_v37  ;;  %v9100_v40 = vld [vmem:[#allocation2 + $0x48] sm:$0xff]   ;;  %v2137_v19 = vrot.slane %v2135_v9, 1  ;;  %v369_v50 = vld [vmem:[#allocation2 + $0x80] sm:$0x1]  ;;  %v807_v44 = vrot.slane %v9835_v1, 4  ;;  %v376_v1 = vsel %vm9924_vm8, 0, %v375_v54 }
  0xc8   : > { %v10010_v23 = vsel %vm2071_vm9, %v2102_v28, %v2106_v41  ;;  %8758 = vmatprep.subr.bf16.mxu1 %v9099_v35  ;;  %v2118_v56 = vrot.slane %v2116_v49, 1  ;;  %v1014_v17 = vld [vmem:[#allocation2 + $0x68] sm:$0x1]  ;;  %v2142_v27 = vrot.slane %v2140_v34, 1  ;;  %v370_v28 = vsel %vm9924_vm8, 0, %v369_v50 }
  0xc9   : > { %2571 = vmatprep.mubr.bf16.mxu1 %v10010_v23  ;;  %v10030_v15 = vsel %vm2071_vm9, %v2126_v8, %v2130_v12  ;;  %v1015_v21 = vsel %vm9680_vm2, %v773_v62, %v1014_v17  ;;  %v2138_v25 = vor.u32 %v2137_v19, %v2133_v58  ;;  %371 = vst [vmem:[#allocation2 + $0x80] sm:$0x1] %v370_v28  ;;  %v2145_v33 = vshrl.u32 %v9100_v40, 16  ;;  %v372_v37 = vld [vmem:[#allocation2 + $0x8c] sm:$0x1] }
  0xca   : > { %2572 = vmatmul.mubr.bf16.gmra.mxu1 %v2095_v0  ;;  %v10024_v4 = vsel %vm2071_vm9, %v2114_v47, %v2118_v56  ;;  %v790_v0 = vrot.slane %v9814_v30, 4  ;;  %v9101_v30 = vld [vmem:[#allocation2 + $0x50] ss:$0 sps:$4 sm:$0x11]   ;;  %1016 = vst [vmem:[#allocation2 + $0x68] sm:$0x1] %v1015_v21 }
  0xcb   : > { %1600 = vmatmul.mubr.bf16.gmra.mxu0 %v9869_v6  ;;  %v1007_v6 = vld [vmem:[#allocation2 + $0x5c] sm:$0x1]  ;;  %8759 = vmatpush3.bf16.msra.mxu1 %v9099_v35  ;;  %v10043_v36 = vsel %vm2071_vm9, %v2138_v25, %v2142_v27  ;;  %v2152_v57 = vshll.u32 %v9101_v30, 16  ;;  %v373_v41 = vsel %vm9924_vm8, 0, %v372_v37  ;;  %v824_v47 = vrot.slane %v9839_v14, 4  ;;  %v9108_v17 = vld [vmem:[#allocation2 + $0x6c] sm:$0xff]  }
  0xcc   : > { %1607 = vmatprep.mubr.bf16.mxu0 %v9903_v5  ;;  %v1008_v61 = vsel %vm9680_vm2, %v756_v22, %v1007_v6  ;;  %8760 = vmatprep.subr.bf16.mxu1 %v9105_v39  ;;  %374 = vst [vmem:[#allocation2 + $0x8c] sm:$0x1] %v373_v41  ;;  %v9106_v6 = vld [vmem:[#allocation2 + $0x60] sm:$0xff]   ;;  %v2157_v14 = vshrl.u32 %v9102_v32, 16  ;;  %377 = vst [vmem:[#allocation2 + $0x98] sm:$0x1] %v376_v1 }
  0xcd   : > { %1009 = vst [vmem:[#allocation2 + $0x5c] sm:$0x1] %v1008_v61  ;;  %2579 = vmatprep.mubr.bf16.mxu1 %v10024_v4  ;;  %v1021_v22 = vld [vmem:[#allocation2 + $0x74] sm:$0x1]  ;;  %v378_v3 = vld [vmem:[#allocation2 + $0xa4] sm:$0x1] }
  0xce   : > { %v1022_v26 = vsel %vm9680_vm2, %v790_v0, %v1021_v22  ;;  %v2171_v8 = vshll.u32 %v9106_v6, 16  ;;  %v379_v42 = vsel %vm9924_vm8, 0, %v378_v3  ;;  %v841_v9 = vrot.slane %v9865_v51, 4  ;;  %v381_v21 = vld [vmem:[#allocation2 + $0xb0] sm:$0x1] }
  0xcf   : > { %8761 = vmatpush3.bf16.msra.mxu1 %v9105_v39  ;;  %1023 = vst [vmem:[#allocation2 + $0x74] sm:$0x1] %v1022_v26  ;;  %v2154_v39 = vrot.slane %v2152_v57, 1  ;;  %380 = vst [vmem:[#allocation2 + $0xa4] sm:$0x1] %v379_v42  ;;  %v858_v0 = vrot.slane %v9873_v11, 4 }
  0xd0   : > { %8762 = vmatprep.subr.bf16.mxu1 %v9112_v13  ;;  %v1028_v49 = vld [vmem:[#allocation2 + $0x80] sm:$0x1]  ;;  %v2169_v12 = vshrl.u32 %v9106_v6, 16  ;;  %v382_v11 = vsel %vm9924_vm8, 0, %v381_v21  ;;  %v2183_v22 = vshll.u32 %v9108_v17, 16  ;;  %v875_v25 = vrot.slane %v9894_v46, 4 }
  0xd1   : > { %v1029_v53 = vsel %vm9680_vm2, %v807_v44, %v1028_v49  ;;  %v9107_v62 = vld [vmem:[#allocation2 + $0x68] ss:$0 sps:$4 sm:$0x11]   ;;  %383 = vst [vmem:[#allocation2 + $0xb0] sm:$0x1] %v382_v11  ;;  %v9113_v26 = vld [vmem:[#allocation2 + $0x78] sm:$0xff]  }
  0xd2   : > { %2580 = vmatmul.mubr.bf16.gmra.mxu1 %v10010_v23  ;;  %1030 = vst [vmem:[#allocation2 + $0x80] sm:$0x1] %v1029_v53  ;;  %v2176_v34 = vshll.u32 %v9107_v62, 16  ;;  %v384_v27 = vld [vmem:[#allocation2 + $0xbc] sm:$0x1]  ;;  %v9139_v57 = vld [vmem:[#allocation8 + $0x200] sm:$0xff]  }
  0xd3   : > { %1608 = vmatmul.mubr.bf16.gmra.mxu0 %v9890_v38  ;;  %2587 = vmatprep.mubr.bf16.mxu1 %v10030_v15  ;;  %v2147_v38 = vshll.u32 %v9100_v40, 16  ;;  %v1035_v61 = vld [vmem:[#allocation2 + $0x8c] sm:$0x1]  ;;  %v2173_v40 = vrot.slane %v2171_v8, 1  ;;  %v1042_v58 = vld [vmem:[#allocation2 + $0x98] sm:$0x1] }
  0xd4   : > { %1615 = vmatprep.mubr.bf16.mxu0 %v9914_v24  ;;  %8763 = vmatpush3.bf16.msra.mxu1 %v9112_v13  ;;  %v9103_v45 = vld [vmem:[#allocation2 + $0x5c] ss:$0 sps:$4 sm:$0x11]   ;;  %v1043_v51 = vsel %vm9680_vm2, %v841_v9, %v1042_v58  ;;  %v385_v28 = vsel %vm9924_vm8, 0, %v384_v27  ;;  %v892_v46 = vrot.slane %v9901_v2, 4  ;;  %v9111_v44 = vld [vmem:[#allocation8 + $0x1b8] sm:$0xff]  }
  0xd5   : > { %v2149_v35 = vrot.slane %v2147_v38, 1  ;;  %8764 = vmatprep.subr.bf16.mxu1 %v9121_v20  ;;  %v2164_v59 = vshll.u32 %v9103_v45, 16  ;;  %v9130_v13 = vld [vmem:[#allocation8 + $0x208] sm:$0xff]   ;;  %1044 = vst [vmem:[#allocation2 + $0x98] sm:$0x1] %v1043_v51  ;;  %v2178_v38 = vrot.slane %v2176_v34, 1 }
  0xd6   : > { %v1049_v30 = vld [vmem:[#allocation2 + $0xa4] sm:$0x1]  ;;  %386 = vst [vmem:[#allocation2 + $0xbc] sm:$0x1] %v385_v28  ;;  %v2193_v49 = vshrl.u32 %v9113_v26, 16  ;;  %v9120_v9 = vld [vmem:[#allocation8 + $0x1a8] sm:$0xff]  }
  0xd7   : > { %v2150_v7 = vor.u32 %v2149_v35, %v2145_v33  ;;  %v2166_v52 = vrot.slane %v2164_v59, 1  ;;  %v1050_v50 = vsel %vm9680_vm2, %v858_v0, %v1049_v30  ;;  %v2181_v33 = vshrl.u32 %v9108_v17, 16  ;;  %v390_v54 = vld [vmem:[#allocation2 + $0xd4] sm:$0x1]  ;;  %v9128_v17 = vld [vmem:[#allocation8 + $0x1d8] sm:$0xff]   ;;  %v9134_v28 = vld [vmem:[#allocation8 + $0x190] sm:$0xff]  }
  0xd8   : > { %8765 = vmatpush3.bf16.msra.mxu1 %v9121_v20  ;;  %1051 = vst [vmem:[#allocation2 + $0xa4] sm:$0x1] %v1050_v50  ;;  %v2185_v35 = vrot.slane %v2183_v22, 1  ;;  %v1056_v41 = vld [vmem:[#allocation2 + $0xb0] sm:$0x1]  ;;  %v9117_v20 = vld [vmem:[#allocation2 + $0x84] sm:$0xff]  }
  0xd9   : > { %v10058_v29 = vsel %vm2071_vm9, %v2150_v7, %v2154_v39  ;;  %8766 = vmatprep.subr.bf16.mxu1 %v9130_v13  ;;  %v387_v7 = vld [vmem:[#allocation2 + $0xc8] sm:$0x1]  ;;  %v2207_v62 = vshll.u32 %v9117_v20, 16  ;;  %v9122_v0 = vld [vmem:[#allocation2 + $0x90] sm:$0xff]  }
  0xda   : > { %2588 = vmatmul.mubr.bf16.gmra.mxu1 %v10024_v4  ;;  %v2186_v39 = vor.u32 %v2185_v35, %v2181_v33  ;;  %v388_v2 = vsel %vm9924_vm8, 0, %v387_v7  ;;  %v9125_v34 = vld [vmem:[#allocation8 + $0x1a0] sm:$0xff]   ;;  %v9129_v30 = vld [vmem:[#allocation8 + $0x198] sm:$0xff]   ;;  %v2217_v22 = vshrl.u32 %v9122_v0, 16  ;;  %v9137_v35 = vld [vmem:[#allocation8 + $0x1c8] sm:$0xff]  }
  0xdb   : > { %1616 = vmatmul.mubr.bf16.gmra.mxu0 %v9903_v5  ;;  %2595 = vmatprep.mubr.bf16.mxu1 %v10043_v36  ;;  %v2159_v5 = vshll.u32 %v9102_v32, 16  ;;  %389 = vst [vmem:[#allocation2 + $0xc8] sm:$0x1] %v388_v2  ;;  %v2209_v58 = vrot.slane %v2207_v62, 1 }
  0xdc   : > { %1623 = vmatprep.mubr.bf16.mxu0 %v9935_v48  ;;  %8767 = vmatpush3.bf16.msra.mxu1 %v9130_v13 }
  0xdd   : > { %v2161_v56 = vrot.slane %v2159_v5, 1  ;;  %v2195_v5 = vshll.u32 %v9113_v26, 16  ;;  %8768 = vmatprep.subr.bf16.mxu1 %v9139_v57  ;;  %v1063_v53 = vld [vmem:[#allocation2 + $0xbc] sm:$0x1] }
  0xde   : > { %v1064_v1 = vsel %vm9680_vm2, %v892_v46, %v1063_v53  ;;  %v10134_v46 = vld [vmem:[#allocation2 + $0xc0] sm:$0xff]  }
  0xdf   : > { %v2162_v10 = vor.u32 %v2161_v56, %v2157_v14  ;;  %v2197_v6 = vrot.slane %v2195_v5, 1  ;;  %v391_v14 = vsel %vm9924_vm8, 0, %v390_v54  ;;  %1065 = vst [vmem:[#allocation2 + $0xbc] sm:$0x1] %v1064_v1  ;;  %v9138_v5 = vld [vmem:[#allocation8 + $0x188] sm:$0xff]   ;;  %v2267_v2 = vshll.u32 %v10134_v46, 16 }
  0xe0   : > { %8769 = vmatpush3.bf16.msra.mxu1 %v9139_v57  ;;  %392 = vst [vmem:[#allocation2 + $0xd4] sm:$0x1] %v391_v14  ;;  %v10146_v14 = vld [vmem:[#allocation2 + $0xc] sm:$0xfe]  }
  0xe1   : > { %v10071_v19 = vsel %vm2071_vm9, %v2162_v10, %v2166_v52  ;;  %v2198_v3 = vor.u32 %v2197_v6, %v2193_v49  ;;  %v9124_v10 = vld [vmem:[#allocation8 + $0x1e0] sm:$0xff]  }
  0xe2   : > { %2596 = vmatmul.mubr.bf16.gmra.mxu1 %v10030_v15  ;;  %v9145_v6 = vld [vmem:[#allocation8 + $0x180] sm:$0xff]  }
  0xe3   : > { %1624 = vmatmul.mubr.bf16.gmra.mxu0 %v9914_v24  ;;  %v1036_v24 = vsel %vm9680_vm2, %v824_v47, %v1035_v61  ;;  %2603 = vmatprep.mubr.bf16.mxu1 %v10058_v29  ;;  %v9115_v47 = vld [vmem:[#allocation8 + $0x1f0] sm:$0xff]  }
  0xe4   : > { %1631 = vmatprep.mubr.bf16.mxu0 %v9947_v60  ;;  %1037 = vst [vmem:[#allocation2 + $0x8c] sm:$0x1] %v1036_v24  ;;  %v9116_v61 = vld [vmem:[#allocation8 + $0x1b0] sm:$0xff]   ;;  %v9119_v24 = vld [vmem:[#allocation8 + $0x1e8] sm:$0xff]  }
  0xea   : > { %2604 = vmatmul.mubr.bf16.gmra.mxu1 %v10043_v36 }
  0xeb   : > { %1632 = vmatmul.mubr.bf16.gmra.mxu0 %v9935_v48  ;;  %v9109_v48 = vld [vmem:[#allocation2 + $0x74] ss:$0 sps:$4 sm:$0x11]   ;;  %2611 = vmatprep.mubr.bf16.mxu1 %v10071_v19  ;;  %v9118_v42 = vld [vmem:[#allocation2 + $0x8c] ss:$0 sps:$4 sm:$0x11]  }
  0xec   : > { %1639 = vmatprep.mubr.bf16.mxu0 %v9961_v16  ;;  %v2174_v16 = vor.u32 %v2173_v40, %v2169_v12  ;;  %v2188_v37 = vshll.u32 %v9109_v48, 16  ;;  %v2205_v40 = vshrl.u32 %v9117_v20, 16  ;;  %v2212_v13 = vshll.u32 %v9118_v42, 16  ;;  %v9123_v48 = vld [vmem:[#allocation2 + $0x98] ss:$0 sps:$4 sm:$0x11]  }
  0xed   : > { %v2224_v27 = vshll.u32 %v9123_v48, 16  ;;  %v9136_v20 = vld [vmem:[#allocation2 + $0xbc] ss:$0 sps:$4 sm:$0x11]   ;;  %v10172_v48 = vld [vmem:[#allocation2 + $0x30] sm:$0xfe]  }
  0xee   : > { %v10087_v32 = vsel %vm2071_vm9, %v2174_v16, %v2178_v38  ;;  %v2190_v45 = vrot.slane %v2188_v37, 1  ;;  %v2210_v21 = vor.u32 %v2209_v58, %v2205_v40  ;;  %v2214_v11 = vrot.slane %v2212_v13, 1  ;;  %v9133_v16 = vld [vmem:[#allocation8 + $0x1d0] sm:$0xff]   ;;  %v10121_v38 = vld [vmem:[#allocation2 + $0xa8] sm:$0xff]  }
  0xef   : > { %v9127_v37 = vld [vmem:[#allocation2 + $0xa4] ss:$0 sps:$4 sm:$0x11]   ;;  %v2260_v62 = vshll.u32 %v9136_v20, 16  ;;  %v10209_v20 = vld [vmem:[#allocation2 + $0x78] sm:$0xfe]  }
  0xf0   : > { %v10103_v56 = vsel %vm2071_vm9, %v2186_v39, %v2190_v45  ;;  %v10127_v50 = vsel %vm2071_vm9, %v2210_v21, %v2214_v11  ;;  %v9144_v39 = vld [vmem:[#allocation8 + $0x1c0] sm:$0xff]   ;;  %v2236_v49 = vshll.u32 %v9127_v37, 16  ;;  %v10161_v13 = vld [vmem:[#allocation2] sm:$0xfe]  }
  0xf1   : > { %v2262_v40 = vrot.slane %v2260_v62, 1  ;;  %v10168_v21 = vld [vmem:[#allocation2 + $0x2c] ss:$0 sps:$4 sm:$0x11]   ;;  %v10170_v11 = vld [vmem:[#allocation2 + $0x24] sm:$0xfe]  }
  0xf2   : > { %2612 = vmatmul.mubr.bf16.gmra.mxu1 %v10058_v29  ;;  %v3126_v37 = vrot.slane %v10168_v21, 1 }
  0xf3   : > { %1640 = vmatmul.mubr.bf16.gmra.mxu0 %v9947_v60  ;;  %v1057_v60 = vsel %vm9680_vm2, %v875_v25, %v1056_v41  ;;  %2619 = vmatprep.mubr.bf16.mxu1 %v10087_v32 }
  0xf4   : > { %8722 = vmatprep.mubr.bf16.mxu0 %v10010_v23  ;;  %1058 = vst [vmem:[#allocation2 + $0xb0] sm:$0x1] %v1057_v60  ;;  %v9114_v23 = vld [vmem:[#allocation2 + $0x80] ss:$0 sps:$4 sm:$0x11]   ;;  %v10138_v60 = vld [vmem:[#allocation2 + $0xcc] sm:$0xff]  }
  0xf5   : > { %v2200_v59 = vshll.u32 %v9114_v23, 16  ;;  %v2279_v54 = vshll.u32 %v10138_v60, 16 }
  0xf7   : > { %v2202_v8 = vrot.slane %v2200_v59, 1  ;;  %v10148_v59 = vld [vmem:[#allocation2 + $0x14] ss:$0 sps:$4 sm:$0x11]  }
  0xf9   : > { %v10115_v12 = vsel %vm2071_vm9, %v2198_v3, %v2202_v8  ;;  %v2269_v3 = vrot.slane %v2267_v2, 1  ;;  %v2277_v8 = vshrl.u32 %v10138_v60, 16  ;;  %v10196_v60 = vld [vmem:[#allocation2 + $0x60] sm:$0xfe]  }
  0xfa   : > { %2620 = vmatmul.mubr.bf16.gmra.mxu1 %v10071_v19  ;;  %v10206_v2 = vld [vmem:[#allocation2 + $0x80] ss:$0 sps:$4 sm:$0x11]  }
  0xfb   : > { %8723 = vmatmul.mubr.bf16.vlgmr.msra.gmra.mxu0 %v10024_v4  ;;  %v909_v4 = vrot.slane %v9931_v43, 4  ;;  %2627 = vmatprep.mubr.bf16.mxu1 %v10103_v56  ;;  %v10112_v43 = vld [vmem:[#allocation2 + $0x9c] sm:$0xff]   ;;  %v9132_v7 = vld [vmem:[#allocation2 + $0xb0] ss:$0 sps:$4 sm:$0x11]  }
  0xfc   : > { %8115 = vmatpush3.bf16.msra.mxu0 %v9111_v44  ;;  %8726 = vmatprep.mubr.bf16.mxu0 %v10030_v15  ;;  %v1070_v15 = vld [vmem:[#allocation2 + $0xc8] sm:$0x1]  ;;  %v2231_v51 = vshll.u32 %v10112_v43, 16  ;;  %v2229_v26 = vshrl.u32 %v10112_v43, 16  ;;  %v2241_v44 = vshrl.u32 %v10121_v38, 16  ;;  %v2248_v1 = vshll.u32 %v9132_v7, 16 }
  0xfd   : > { %8116 = vmatprep.subr.bf16.mxu0 %v9115_v47  ;;  %v1071_v52 = vsel %vm9680_vm2, %v909_v4, %v1070_v15  ;;  %v2238_v4 = vrot.slane %v2236_v49, 1  ;;  %v3119_v15 = vrot.slane %v10146_v14, 1  ;;  %v3120_v43 = vrot.slane %v10148_v59, 1  ;;  %v10198_v7 = vld [vmem:[#allocation2 + $0x68] ss:$0 sps:$4 sm:$0x11]  }
  0xfe   : > { %1072 = vst [vmem:[#allocation2 + $0xc8] sm:$0x1] %v1071_v52  ;;  %v2233_v33 = vrot.slane %v2231_v51, 1  ;;  %v2250_v42 = vrot.slane %v2248_v1, 1  ;;  %v3141_v62 = vrot.slane %v10198_v7, 1 }
  0xff   : > { %v10156_v52 = vld [vmem:[#allocation2 + $0x20] ss:$0 sps:$4 sm:$0x11]   ;;  %v9170_v7 = vld [vmem:[#allocation2 + $0x90] sm:$0xfe]  }
 0x100   : > { %8117 = vmatpush3.bf16.msra.mxu0 %v9116_v61  ;;  %v2265_v61 = vshrl.u32 %v10134_v46, 16  ;;  %v3123_v51 = vrot.slane %v10156_v52, 1  ;;  %v10187_v46 = vld [vmem:[#allocation2 + $0x48] sm:$0xfe]  }
 0x101   : > { %8118 = vmatprep.subr.bf16.mxu0 %v9119_v24  ;;  %v9143_v24 = vld [vmem:[#allocation2 + $0xd4] ss:$0 sps:$4 sm:$0x11]   ;;  %v3134_v1 = vrot.slane %v10187_v46, 1 }
 0x102   : > { %2628 = vmatmul.mubr.bf16.gmra.mxu1 %v10087_v32 }
 0x103   : > { %8727 = vmatmul.mubr.bf16.gmra.mxu0 %v10043_v36  ;;  %2635 = vmatprep.mubr.bf16.mxu1 %v10115_v12  ;;  %v2219_v36 = vshll.u32 %v9122_v0, 16  ;;  %v2284_v0 = vshll.u32 %v9143_v24, 16 }
 0x104   : > { %8730 = vmatprep.mubr.bf16.mxu0 %v10058_v29  ;;  %8119 = vmatpush3.bf16.msra.mxu0 %v9120_v9  ;;  %v10123_v29 = vld [vmem:[#allocation2 + $0xb4] sm:$0xff]   ;;  %v2281_v9 = vrot.slane %v2279_v54, 1  ;;  %v10213_v54 = vld [vmem:[#allocation2 + $0x84] sm:$0xfe]  }
 0x105   : > { %8120 = vmatprep.subr.bf16.mxu0 %v9124_v10  ;;  %v2221_v25 = vrot.slane %v2219_v36, 1  ;;  %v2255_v57 = vshll.u32 %v10123_v29, 16  ;;  %v2253_v23 = vshrl.u32 %v10123_v29, 16  ;;  %v10153_v10 = vld [vmem:[#allocation2 + $0x18] sm:$0xfe]   ;;  %v3116_v29 = vrot.slane %v10161_v13, 1 }
 0x106   : > { %v9141_v58 = vld [vmem:[#allocation2 + $0xc8] ss:$0 sps:$4 sm:$0x11]   ;;  %v3121_v13 = vsel %vm3115_vm10, %v3119_v15, %v3120_v43 }
 0x107   : > { %v2222_v41 = vor.u32 %v2221_v25, %v2217_v22  ;;  %v2257_v47 = vrot.slane %v2255_v57, 1  ;;  %v10179_v25 = vld [vmem:[#allocation2 + $0x3c] sm:$0xfe]  }
 0x108   : > { %8121 = vmatpush3.bf16.msra.mxu0 %v9125_v34  ;;  %v3122_v34 = vrot.slane %v10153_v10, 1 }
 0x109   : > { %8122 = vmatprep.subr.bf16.mxu0 %v9128_v17  ;;  %v10165_v17 = vld [vmem:[#allocation2 + $0x8] ss:$0 sps:$4 sm:$0x11]  }
 0x10a   : > { %2636 = vmatmul.mubr.bf16.gmra.mxu1 %v10103_v56 }
 0x10b   : > { %8731 = vmatmul.mubr.bf16.gmra.mxu0 %v10071_v19  ;;  %v2243_v19 = vshll.u32 %v10121_v38, 16  ;;  %2643 = vmatprep.mubr.bf16.mxu1 %v10127_v50  ;;  %v2286_v38 = vrot.slane %v2284_v0, 1  ;;  %v3149_v0 = vrot.slane %v10213_v54, 1 }
 0x10c   : > { %8734 = vmatprep.mubr.bf16.mxu0 %v10087_v32  ;;  %8123 = vmatpush3.bf16.msra.mxu0 %v9129_v30  ;;  %v2226_v32 = vrot.slane %v2224_v27, 1  ;;  %v2272_v30 = vshll.u32 %v9141_v58, 16  ;;  %v10181_v27 = vld [vmem:[#allocation2 + $0x44] ss:$0 sps:$4 sm:$0x11]  }
 0x10d   : > { %8124 = vmatprep.subr.bf16.mxu0 %v9133_v16  ;;  %v2245_v45 = vrot.slane %v2243_v19, 1  ;;  %v10174_v16 = vld [vmem:[#allocation2 + $0x38] ss:$0 sps:$4 sm:$0x11]   ;;  %v3128_v19 = vrot.slane %v10172_v48, 1 }
 0x10e   : > { %v2227_v53 = vsel %vm2071_vm9, %v2222_v41, %v2226_v32  ;;  %v3129_v57 = vrot.slane %v10174_v16, 1  ;;  %v10189_v41 = vld [vmem:[#allocation2 + $0x50] ss:$0 sps:$4 sm:$0x11]   ;;  %v10191_v32 = vld [vmem:[#allocation2 + $0x54] sm:$0xfe]  }
 0x10f   : > { %v2246_v36 = vor.u32 %v2245_v45, %v2241_v44  ;;  %v10193_v44 = vld [vmem:[#allocation2 + $0x5c] ss:$0 sps:$4 sm:$0x11]   ;;  %v10202_v45 = vld [vmem:[#allocation2 + $0x74] ss:$0 sps:$4 sm:$0x11]  }
 0x110   : > { %8125 = vmatpush3.bf16.msra.mxu0 %v9134_v28  ;;  %v2270_v28 = vor.u32 %v2269_v3, %v2265_v61  ;;  %v3137_v61 = vrot.slane %v10191_v32, 1  ;;  %v3138_v24 = vrot.slane %v10193_v44, 1 }
 0x111   : > { %8126 = vmatprep.subr.bf16.mxu0 %v9137_v35  ;;  %v2251_v22 = vsel %vm2071_vm9, %v2246_v36, %v2250_v42  ;;  %v3125_v35 = vrot.slane %v10170_v11, 1  ;;  %v3144_v42 = vrot.slane %v10202_v45, 1 }
 0x112   : > { %2644 = vmatmul.mubr.bf16.gmra.mxu1 %v10115_v12 }
 0x113   : > { %8735 = vmatmul.mubr.bf16.gmra.mxu0 %v10103_v56  ;;  %2651 = vmatprep.mubr.bf16.mxu1 %v2227_v53  ;;  %v2234_v56 = vor.u32 %v2233_v33, %v2229_v26  ;;  %v2258_v26 = vor.u32 %v2257_v47, %v2253_v23  ;;  %v2274_v33 = vrot.slane %v2272_v30, 1  ;;  %v3132_v47 = vrot.slane %v10181_v27, 1 }
 0x114   : > { %8738 = vmatprep.mubr.bf16.mxu0 %v10115_v12  ;;  %8127 = vmatpush3.bf16.msra.mxu0 %v9138_v5  ;;  %v3131_v5 = vrot.slane %v10179_v25, 1  ;;  %v3127_v52 = vsel %vm3115_vm10, %v3125_v35, %v3126_v37 }
 0x115   : > { %8128 = vmatprep.subr.bf16.mxu0 %v9144_v39  ;;  %v2239_v12 = vsel %vm2071_vm9, %v2234_v56, %v2238_v4  ;;  %v10200_v39 = vld [vmem:[#allocation2 + $0x6c] sm:$0xfe]   ;;  %v2263_v23 = vsel %vm2071_vm9, %v2258_v26, %v2262_v40  ;;  %v2275_v49 = vsel %vm2071_vm9, %v2270_v28, %v2274_v33  ;;  %v3135_v56 = vrot.slane %v10189_v41, 1 }
 0x116   : > { %v3140_v4 = vrot.slane %v10196_v60, 1  ;;  %v3143_v3 = vrot.slane %v10200_v39, 1  ;;  %v3133_v48 = vsel %vm3115_vm10, %v3131_v5, %v3132_v47 }
 0x118   : > { %8129 = vmatpush3.bf16.msra.mxu0 %v9145_v6  ;;  %v2282_v6 = vor.u32 %v2281_v9, %v2277_v8  ;;  %v3146_v8 = vrot.slane %v10209_v20, 1  ;;  %v3147_v9 = vrot.slane %v10206_v2, 1 }
 0x11a   : > { %2652 = vmatmul.mubr.bf16.gmra.mxu1 %v10127_v50  ;;  %v2287_v58 = vsel %vm2071_vm9, %v2282_v6, %v2286_v38 }
 0x11b   : > { %8739 = vmatmul.mubr.bf16.gmra.mxu0 %v10127_v50  ;;  %2659 = vmatprep.mubr.bf16.mxu1 %v2239_v12  ;;  %v3117_v50 = vrot.slane %v10165_v17, 1  ;;  %v3124_v17 = vsel %vm3115_vm10, %v3122_v34, %v3123_v51  ;;  %v3130_v34 = vsel %vm3115_vm10, %v3128_v19, %v3129_v57 }
 0x11c   : > { %8742 = vmatprep.mubr.bf16.mxu0 %v2227_v53 }
 0x122   : > { %2660 = vmatmul.mubr.bf16.gmra.mxu1 %v2227_v53  ;;  %v10211_v53 = vld [vmem:[#allocation2 + $0x8c] ss:$0 sps:$4 sm:$0x11]  }
 0x123   : > { %8743 = vmatmul.mubr.bf16.gmra.mxu0 %v2239_v12  ;;  %2667 = vmatprep.mubr.bf16.mxu1 %v2251_v22  ;;  %v3150_v40 = vrot.slane %v10211_v53, 1 }
 0x124   : > { %8746 = vmatprep.mubr.bf16.mxu0 %v2251_v22 }
 0x12a   : > { %2668 = vmatmul.mubr.bf16.gmra.mxu1 %v2239_v12  ;;  %v3118_v12 = vsel %vm3115_vm10, %v3116_v29, %v3117_v50 }
 0x12b   : > { %8747 = vmatmul.mubr.bf16.gmra.mxu0 %v2263_v23  ;;  %2675 = vmatprep.mubr.bf16.mxu1 %v2263_v23 }
 0x12c   : > { %8750 = vmatprep.mubr.bf16.mxu0 %v2275_v49 }
 0x132   : > { %2676 = vmatmul.mubr.bf16.gmra.mxu1 %v2251_v22 }
 0x133   : > { %8751 = vmatmul.mubr.bf16.gmra.mxu0 %v2287_v58  ;;  %2683 = vmatprep.mubr.bf16.mxu1 %v2275_v49 }
 0x134   : > { %3445 = vmatprep.mubr.bf16.mxu0 %v3121_v13 }
 0x13a   : > { %2684 = vmatmul.mubr.bf16.gmra.mxu1 %v2263_v23  ;;  %v10257_v23 = vsel %vm3115_vm10, %v3134_v1, %v3135_v56  ;;  %v10269_v1 = vsel %vm3115_vm10, %v3137_v61, %v3138_v24 }
 0x13b   : > { %v7858_v36 = vpop.f32.mrf.mxu0  ;;  %3446 = vmatmul.mubr.bf16.vlgmr.msra.gmra.mxu0 %v3118_v12  ;;  %8770 = vmatprep.mubr.bf16.mxu1 %v3124_v17 }
 0x13c   : > { %3453 = vmatprep.mubr.bf16.mxu0 %v3124_v17 }
 0x13d   : > { %v7859_v59 = vpop.f32.mrf.mxu0 }
 0x13e   : > { %v7860_v14 = vadd.f32 %v7859_v59, %v7858_v36  ;;  %v8676_v15 = vpop.f32.mrf.mxu1  ;;  %v10280_v59 = vsel %vm3115_vm10, %v3140_v4, %v3141_v62  ;;  %v10295_v62 = vsel %vm3115_vm10, %v3143_v3, %v3144_v42 }
 0x13f   : > { %v7861_v43 = vpop.f32.mrf.mxu0 }
 0x140   : > { %v1682_v21 = vpop.f32.mrf.mxu1 }
 0x141   : > { %v7862_v11 = vpop.f32.mrf.mxu0  ;;  %v10239_v30 = vadd.f32 %v7860_v14, %v1682_v21 }
 0x142   : > { %v7863_v16 = vadd.f32 %v7862_v11, %v7861_v43  ;;  %v8677_v38 = vpop.f32.mrf.mxu1  ;;  %8771 = vmatmul.mubr.bf16.vlgmr.msra.gmra.mxu1 %v3127_v52  ;;  %v9171_v11 = vld [vmem:[#allocation2 + $0x98] ss:$0 sps:$4 sm:$0x11]  }
 0x143   : > { %v7864_v10 = vpop.f32.mrf.mxu0  ;;  %3454 = vmatmul.mubr.bf16.gmra.mxu0 %v3121_v13  ;;  %8774 = vmatprep.mubr.bf16.mxu1 %v3130_v34  ;;  %v3153_v2 = vrot.slane %v9171_v11, 1  ;;  %v9178_v11 = vld [vmem:[#allocation2 + $0xc0] sm:$0xfe]  }
 0x144   : > { %3461 = vmatprep.mubr.bf16.mxu0 %v3127_v52  ;;  %v1685_v51 = vpop.f32.mrf.mxu1 }
 0x145   : > { %v7865_v29 = vpop.f32.mrf.mxu0  ;;  %v10245_v22 = vadd.f32 %v7863_v16, %v1685_v51 }
 0x146   : > { %v7866_v50 = vadd.f32 %v7865_v29, %v7864_v10 }
 0x147   : > { %v7867_v26 = vpop.f32.mrf.mxu0 }
 0x148   : > { %v10247_v33 = vadd.f32 %v8676_v15, %v7866_v50  ;;  %v9172_v50 = vld [vmem:[#allocation2 + $0x9c] sm:$0xfe]  }
 0x149   : > { %v7868_v35 = vpop.f32.mrf.mxu0 }
 0x14a   : > { %v8680_v28 = vpop.f32.mrf.mxu1  ;;  %v7869_v46 = vadd.f32 %v7868_v35, %v7867_v26  ;;  %8775 = vmatmul.mubr.bf16.gmra.mxu1 %v3133_v48  ;;  %v9173_v26 = vld [vmem:[#allocation2 + $0xa4] ss:$0 sps:$4 sm:$0x11]  }
 0x14b   : > { %v7870_v19 = vpop.f32.mrf.mxu0  ;;  %3462 = vmatmul.mubr.bf16.gmra.mxu0 %v3124_v17  ;;  %8778 = vmatprep.mubr.bf16.mxu1 %v10257_v23 }
 0x14c   : > { %v1698_v37 = vpop.f32.mrf.mxu1  ;;  %v10254_v41 = vadd.f32 %v8677_v38, %v7869_v46  ;;  %3469 = vmatprep.mubr.bf16.mxu0 %v3130_v34  ;;  %v9175_v46 = vld [vmem:[#allocation2 + $0xb0] ss:$0 sps:$4 sm:$0x11]  }
 0x14d   : > { %v7871_v49 = vpop.f32.mrf.mxu0 }
 0x14e   : > { %v8681_v57 = vpop.f32.mrf.mxu1  ;;  %v7872_v58 = vadd.f32 %v7871_v49, %v7870_v19 }
 0x14f   : > { %v7873_v13 = vpop.f32.mrf.mxu0 }
 0x150   : > { %v1701_v6 = vpop.f32.mrf.mxu1  ;;  %v10262_v25 = vadd.f32 %v7872_v58, %v1698_v37  ;;  %v9174_v37 = vld [vmem:[#allocation2 + $0xa8] sm:$0xfe]   ;;  %v3159_v58 = vrot.slane %v9175_v46, 1 }
 0x151   : > { %v7874_v5 = vpop.f32.mrf.mxu0 }
 0x152   : > { %v10260_v27 = vpop.f32.mrf.mxu1  ;;  %v7875_v12 = vadd.f32 %v7874_v5, %v7873_v13  ;;  %8779 = vmatmul.mubr.bf16.gmra.mxu1 %v10269_v1 }
 0x153   : > { %v7876_v17 = vpop.f32.mrf.mxu0  ;;  %3470 = vmatmul.mubr.bf16.gmra.mxu0 %v3127_v52  ;;  %8782 = vmatprep.mubr.bf16.mxu1 %v10280_v59  ;;  %v10305_v52 = vsel %vm3115_vm10, %v3146_v8, %v3147_v9  ;;  %v10322_v9 = vsel %vm3115_vm10, %v3149_v0, %v3150_v40  ;;  %v3155_v40 = vrot.slane %v9172_v50, 1 }
 0x154   : > { %v1714_v47 = vpop.f32.mrf.mxu1  ;;  %v10273_v36 = vadd.f32 %v7875_v12, %v1701_v6  ;;  %3477 = vmatprep.mubr.bf16.mxu0 %v3133_v48  ;;  %v3158_v6 = vrot.slane %v9174_v37, 1  ;;  %v9185_v37 = vld [vmem:[#allocation10 + $0x70] sm:$0xff]  }
 0x155   : > { %v7877_v14 = vpop.f32.mrf.mxu0 }
 0x156   : > { %v10271_v56 = vpop.f32.mrf.mxu1  ;;  %v7878_v44 = vadd.f32 %v7877_v14, %v7876_v17  ;;  %v9183_v17 = vld [vmem:[#allocation10 + $0x38] sm:$0xff]  }
 0x157   : > { %v7879_v32 = vpop.f32.mrf.mxu0  ;;  %v9184_v14 = vld [vmem:[#allocation10 + $0xb8] sm:$0xff]  }
 0x158   : > { %v1717_v15 = vpop.f32.mrf.mxu1  ;;  %v10284_v61 = vadd.f32 %v8680_v28, %v7878_v44  ;;  %8802 = vmatprep.subr.bf16.mxu0 %v9184_v14 }
 0x159   : > { %v7880_v43 = vpop.f32.mrf.mxu0  ;;  %8803 = vmatpush3.bf16.msra.mxu0 %v9184_v14 }
 0x15a   : > { %v10286_v24 = vpop.f32.mrf.mxu1  ;;  %v7881_v21 = vadd.f32 %v7880_v43, %v7879_v32  ;;  %8783 = vmatmul.mubr.bf16.gmra.mxu1 %v10295_v62  ;;  %v9176_v43 = vld [vmem:[#allocation2 + $0xb4] sm:$0xfe]  }
 0x15b   : > { %v7882_v4 = vpop.f32.mrf.mxu0  ;;  %3478 = vmatmul.mubr.bf16.gmra.mxu0 %v3130_v34  ;;  %8786 = vmatprep.mubr.bf16.mxu1 %v10305_v52  ;;  %v3152_v34 = vrot.slane %v9170_v7, 1  ;;  %v10352_v7 = vsel %vm3115_vm10, %v3158_v6, %v3159_v58  ;;  %v9181_v6 = vld [vmem:[#allocation2 + $0xd4] ss:$0 sps:$4 sm:$0x11]  }
 0x15c   : > { %v10288_v60 = vpop.f32.mrf.mxu1  ;;  %v10297_v16 = vadd.f32 %v8681_v57, %v7881_v21  ;;  %3485 = vmatprep.mubr.bf16.mxu0 %v10257_v23  ;;  %v3156_v57 = vrot.slane %v9173_v26, 1 }
 0x15d   : > { %v7883_v10 = vpop.f32.mrf.mxu0  ;;  %v10328_v35 = vsel %vm3115_vm10, %v3152_v34, %v3153_v2  ;;  %v3161_v34 = vrot.slane %v9176_v43, 1 }
 0x15e   : > { %v10307_v38 = vpop.f32.mrf.mxu1  ;;  %v7884_v45 = vadd.f32 %v7883_v10, %v7882_v4  ;;  %v10345_v32 = vsel %vm3115_vm10, %v3155_v40, %v3156_v57  ;;  %v9179_v4 = vld [vmem:[#allocation2 + $0xc8] ss:$0 sps:$4 sm:$0x11]   ;;  %v9180_v57 = vld [vmem:[#allocation2 + $0xcc] sm:$0xfe]  }
 0x15f   : > { %v7885_v3 = vpop.f32.mrf.mxu0  ;;  %v3167_v14 = vrot.slane %v9180_v57, 1 }
 0x160   : > { %v10310_v39 = vpop.f32.mrf.mxu1  ;;  %v10313_v42 = vadd.f32 %v7884_v45, %v1714_v47  ;;  %v9182_v47 = vld [vmem:[#allocation10 + $0x78] sm:$0xff]  }
 0x161   : > { %v7886_v51 = vpop.f32.mrf.mxu0  ;;  %8250 = vmatprep.subr.bf16.mxu1 %v9182_v47 }
 0x162   : > { %v7887_v20 = vadd.f32 %v7886_v51, %v7885_v3  ;;  %v10315_v29 = vpop.f32.mrf.mxu1  ;;  %8787 = vmatmul.mubr.bf16.gmra.mxu1 %v10322_v9 }
 0x163   : > { %v7888_v8 = vpop.f32.mrf.mxu0  ;;  %3486 = vmatmul.mubr.bf16.gmra.mxu0 %v3133_v48  ;;  %8790 = vmatprep.mubr.bf16.mxu1 %v10328_v35 }
 0x164   : > { %v10324_v28 = vadd.f32 %v7887_v20, %v1717_v15  ;;  %3493 = vmatprep.mubr.bf16.mxu0 %v10269_v1  ;;  %v10330_v19 = vpop.f32.mrf.mxu1  ;;  %8251 = vmatpush3.bf16.msra.mxu1 %v9183_v17  ;;  %v3164_v20 = vrot.slane %v9178_v11, 1  ;;  %v9187_v11 = vld [vmem:[#allocation10 + $0x68] sm:$0xff]  }
 0x165   : > { %v7889_v48 = vpop.f32.mrf.mxu0  ;;  %8252 = vmatprep.subr.bf16.mxu1 %v9185_v37 }
 0x166   : > { %v7890_v53 = vadd.f32 %v7889_v48, %v7888_v8  ;;  %v10333_v54 = vpop.f32.mrf.mxu1  ;;  %v3165_v8 = vrot.slane %v9179_v4, 1  ;;  %v9186_v48 = vld [vmem:[#allocation10 + $0x30] sm:$0xff]  }
 0x167   : > { %v7891_v0 = vpop.f32.mrf.mxu0 }
 0x168   : > { %v10337_v49 = vadd.f32 %v10260_v27, %v7890_v53  ;;  %v10339_v13 = vpop.f32.mrf.mxu1  ;;  %v9177_v27 = vld [vmem:[#allocation2 + $0xbc] ss:$0 sps:$4 sm:$0x11]   ;;  %v10376_v58 = vsel %vm3115_vm10, %v3164_v20, %v3165_v8  ;;  %8253 = vmatpush3.bf16.msra.mxu1 %v9186_v48 }
 0x169   : > { %v7892_v5 = vpop.f32.mrf.mxu0  ;;  %v3162_v2 = vrot.slane %v9177_v27, 1  ;;  %8254 = vmatprep.subr.bf16.mxu1 %v9187_v11 }
 0x16a   : > { %v7893_v12 = vadd.f32 %v7892_v5, %v7891_v0  ;;  %v10341_v15 = vpop.f32.mrf.mxu1  ;;  %8791 = vmatmul.mubr.bf16.gmra.mxu1 %v10345_v32 }
 0x16b   : > { %v7894_v44 = vpop.f32.mrf.mxu0  ;;  %3494 = vmatmul.mubr.bf16.gmra.mxu0 %v10257_v23  ;;  %8794 = vmatprep.mubr.bf16.mxu1 %v10352_v7  ;;  %v10369_v40 = vsel %vm3115_vm10, %v3161_v34, %v3162_v2 }
 0x16c   : > { %v10348_v21 = vadd.f32 %v10271_v56, %v7893_v12  ;;  %3501 = vmatprep.mubr.bf16.mxu0 %v10280_v59  ;;  %v10354_v10 = vpop.f32.mrf.mxu1 }
 0x16d   : > { %v7895_v23 = vpop.f32.mrf.mxu0 }
 0x16e   : > { %v7896_v45 = vadd.f32 %v7895_v23, %v7894_v44  ;;  %v10357_v3 = vpop.f32.mrf.mxu1  ;;  %v9188_v23 = vld [vmem:[#allocation10 + $0x28] sm:$0xff]  }
 0x16f   : > { %v7897_v56 = vpop.f32.mrf.mxu0  ;;  %8255 = vmatpush3.bf16.msra.mxu1 %v9188_v23  ;;  %v403_v23 = vld [vmem:[#allocation3 + $0xc] sm:$0x1] }
 0x170   : > { %v10361_v51 = vadd.f32 %v7896_v45, %v10288_v60  ;;  %v10363_v50 = vpop.f32.mrf.mxu1  ;;  %v9189_v45 = vld [vmem:[#allocation10 + $0xb0] sm:$0xff]  }
 0x171   : > { %v7898_v26 = vpop.f32.mrf.mxu0  ;;  %8804 = vmatprep.subr.bf16.mxu0 %v9189_v45 }
 0x172   : > { %v7899_v46 = vadd.f32 %v7898_v26, %v7897_v56  ;;  %v10365_v53 = vpop.f32.mrf.mxu1  ;;  %8795 = vmatmul.mubr.bf16.gmra.mxu1 %v10369_v40  ;;  %8805 = vmatpush3.bf16.msra.mxu0 %v9189_v45 }
 0x173   : > { %v7900_v0 = vpop.f32.mrf.mxu0  ;;  %3502 = vmatmul.mubr.bf16.gmra.mxu0 %v10269_v1  ;;  %8798 = vmatprep.mubr.bf16.mxu1 %v10376_v58 }
 0x174   : > { %v10372_v60 = vadd.f32 %v7899_v46, %v10310_v39  ;;  %3509 = vmatprep.mubr.bf16.mxu0 %v10295_v62  ;;  %v10378_v5 = vpop.f32.mrf.mxu1  ;;  %v3168_v39 = vrot.slane %v9181_v6, 1 }
 0x175   : > { %v7901_v47 = vpop.f32.mrf.mxu0 }
 0x176   : > { %v7902_v12 = vadd.f32 %v7901_v47, %v7900_v0  ;;  %v10381_v1 = vpop.f32.mrf.mxu1  ;;  %v3169_v2 = vsel %vm3115_vm10, %v3167_v14, %v3168_v39  ;;  %v9190_v47 = vld [vmem:[#allocation10 + $0x60] sm:$0xff]  }
 0x177   : > { %v7903_v17 = vpop.f32.mrf.mxu0  ;;  %8256 = vmatprep.subr.bf16.mxu1 %v9190_v47 }
 0x178   : > { %v10385_v44 = vadd.f32 %v10286_v24, %v7902_v12  ;;  %v10387_v43 = vpop.f32.mrf.mxu1  ;;  %v9191_v12 = vld [vmem:[#allocation10 + $0x20] sm:$0xff]  }
 0x179   : > { %11706 = vst [vmem:[#allocation17_spill] sm:$0xff] %v10387_v43  ;;  %v7904_v27 = vpop.f32.mrf.mxu0  ;;  %8257 = vmatpush3.bf16.msra.mxu1 %v9191_v12  ;;  %v466_v43 = vld [vmem:[#allocation3 + $0x38] sm:$0x1] }
 0x17a   : > { %v7905_v4 = vadd.f32 %v7904_v27, %v7903_v17  ;;  %v10389_v56 = vpop.f32.mrf.mxu1  ;;  %8799 = vmatmul.mubr.bf16.gmra.mxu1 %v3169_v2 }
 0x17b   : > { %v7906_v34 = vpop.f32.mrf.mxu0  ;;  %3510 = vmatmul.mubr.bf16.gmra.mxu0 %v10280_v59 }
 0x17c   : > { %v10394_v20 = vadd.f32 %v10307_v38, %v7905_v4  ;;  %3517 = vmatprep.mubr.bf16.mxu0 %v10305_v52  ;;  %v10397_v24 = vpop.f32.mrf.mxu1 }
 0x17d   : > { %v7907_v8 = vpop.f32.mrf.mxu0 }
 0x17e   : > { %v7908_v26 = vadd.f32 %v7907_v8, %v7906_v34  ;;  %v10399_v37 = vpop.f32.mrf.mxu1  ;;  %v404_v34 = vsel %vm9680_vm2, 0, %v403_v23 }
 0x17f   : > { %v7909_v46 = vpop.f32.mrf.mxu0  ;;  %405 = vst [vmem:[#allocation3 + $0xc] sm:$0x1] %v404_v34  ;;  %v9192_v34 = vld [vmem:[#allocation10 + $0x58] sm:$0xff]  }
 0x180   : > { %v10402_v59 = vadd.f32 %v7908_v26, %v10330_v19  ;;  %v10404_v0 = vpop.f32.mrf.mxu1  ;;  %8258 = vmatprep.subr.bf16.mxu1 %v9192_v34 }
 0x181   : > { %v7910_v48 = vpop.f32.mrf.mxu0  ;;  %11707 = vst [vmem:[#allocation18_spill] sm:$0xff] %v10404_v0 }
 0x182   : > { %v10406_v38 = vadd.f32 %v7910_v48, %v7909_v46  ;;  %v7994_v17 = vpop.f32.mrf.mxu1 }
 0x183   : > { %v7912_v57 = vpop.f32.mrf.mxu0  ;;  %3518 = vmatmul.mubr.bf16.gmra.mxu0 %v10295_v62 }
 0x184   : > { %3525 = vmatprep.mubr.bf16.mxu0 %v10322_v9  ;;  %v7995_v27 = vpop.f32.mrf.mxu1 }
 0x185   : > { %v7913_v6 = vpop.f32.mrf.mxu0  ;;  %v10413_v11 = vadd.f32 %v7995_v27, %v7994_v17 }
 0x186   : > { %v7914_v14 = vadd.f32 %v7913_v6, %v7912_v57  ;;  %v10415_v45 = vpop.f32.mrf.mxu1 }
 0x187   : > { %v7915_v39 = vpop.f32.mrf.mxu0 }
 0x188   : > { %v10411_v19 = vadd.f32 %v10315_v29, %v7914_v14  ;;  %v10420_v8 = vpop.f32.mrf.mxu1 }
 0x189   : > { %v7916_v4 = vpop.f32.mrf.mxu0 }
 0x18a   : > { %v7917_v62 = vadd.f32 %v7916_v4, %v7915_v39  ;;  %v8000_v46 = vpop.f32.mrf.mxu1 }
 0x18b   : > { %v7918_v2 = vpop.f32.mrf.mxu0  ;;  %3526 = vmatmul.mubr.bf16.gmra.mxu0 %v10305_v52 }
 0x18c   : > { %v10423_v29 = vadd.f32 %v10333_v54, %v7917_v62  ;;  %3533 = vmatprep.mubr.bf16.mxu0 %v10328_v35  ;;  %v8001_v6 = vpop.f32.mrf.mxu1  ;;  %v457_v54 = vld [vmem:[#allocation3 + $0x14] sm:$0x1] }
 0x18d   : > { %v7919_v26 = vpop.f32.mrf.mxu0  ;;  %v10429_v12 = vadd.f32 %v8001_v6, %v8000_v46  ;;  %v458_v4 = vsel %vm9924_vm8, 0, %v457_v54  ;;  %v406_v46 = vld [vmem:[#allocation3 + $0x18] sm:$0x1] }
 0x18e   : > { %v7920_v48 = vadd.f32 %v7919_v26, %v7918_v2  ;;  %v10431_v52 = vpop.f32.mrf.mxu1  ;;  %459 = vst [vmem:[#allocation3 + $0x14] sm:$0x1] %v458_v4  ;;  %v9193_v26 = vld [vmem:[#allocation10 + $0x18] sm:$0xff]   ;;  %v407_v6 = vsel %vm9680_vm2, 0, %v406_v46  ;;  %v400_v46 = vld [vmem:[#allocation3] sm:$0x1] }
 0x18f   : > { %v7921_v57 = vpop.f32.mrf.mxu0  ;;  %8259 = vmatpush3.bf16.msra.mxu1 %v9193_v26  ;;  %408 = vst [vmem:[#allocation3 + $0x18] sm:$0x1] %v407_v6  ;;  %v409_v26 = vld [vmem:[#allocation3 + $0x24] sm:$0x1] }
 0x190   : > { %v10427_v47 = vadd.f32 %v7920_v48, %v10354_v10  ;;  %v10436_v27 = vpop.f32.mrf.mxu1 }
 0x191   : > { %v7922_v17 = vpop.f32.mrf.mxu0 }
 0x192   : > { %v10433_v14 = vadd.f32 %v7922_v17, %v7921_v57  ;;  %v8006_v23 = vpop.f32.mrf.mxu1 }
 0x193   : > { %v7924_v39 = vpop.f32.mrf.mxu0  ;;  %3534 = vmatmul.mubr.bf16.gmra.mxu0 %v10322_v9  ;;  %v9194_v9 = vld [vmem:[#allocation10 + $0xa8] sm:$0xff]  }
 0x194   : > { %3541 = vmatprep.mubr.bf16.mxu0 %v10345_v32  ;;  %v8007_v48 = vpop.f32.mrf.mxu1  ;;  %8806 = vmatprep.subr.bf16.mxu0 %v9194_v9 }
 0x195   : > { %v7925_v10 = vpop.f32.mrf.mxu0  ;;  %v10446_v17 = vadd.f32 %v8007_v48, %v8006_v23  ;;  %8807 = vmatpush3.bf16.msra.mxu0 %v9194_v9 }
 0x196   : > { %v7926_v62 = vadd.f32 %v7925_v10, %v7924_v39  ;;  %v10448_v4 = vpop.f32.mrf.mxu1  ;;  %v9195_v10 = vld [vmem:[#allocation10 + $0x50] sm:$0xff]  }
 0x197   : > { %v7927_v2 = vpop.f32.mrf.mxu0  ;;  %8260 = vmatprep.subr.bf16.mxu1 %v9195_v10 }
 0x198   : > { %v10442_v57 = vadd.f32 %v10341_v15, %v7926_v62  ;;  %v9196_v15 = vld [vmem:[#allocation10 + $0x10] sm:$0xff]   ;;  %v460_v62 = vld [vmem:[#allocation3 + $0x20] sm:$0x1]  ;;  %v10451_v34 = vpop.f32.mrf.mxu1 }
 0x199   : > { %v7928_v54 = vpop.f32.mrf.mxu0  ;;  %v461_v23 = vsel %vm9924_vm8, 0, %v460_v62  ;;  %8261 = vmatpush3.bf16.msra.mxu1 %v9196_v15  ;;  %v463_v15 = vld [vmem:[#allocation3 + $0x2c] sm:$0x1] }
 0x19a   : > { %v7929_v39 = vadd.f32 %v7928_v54, %v7927_v2  ;;  %462 = vst [vmem:[#allocation3 + $0x20] sm:$0x1] %v461_v23  ;;  %v8012_v48 = vpop.f32.mrf.mxu1  ;;  %v401_v54 = vsel %vm9680_vm2, 0, %v400_v46  ;;  %v9200_v46 = vld [vmem:[#allocation10 + $0x40] sm:$0xff]  }
 0x19b   : > { %v7930_v55 = vpop.f32.mrf.mxu0  ;;  %3542 = vmatmul.mubr.bf16.gmra.mxu0 %v10328_v35  ;;  %v410_v35 = vsel %vm9680_vm2, 0, %v409_v26  ;;  %402 = vst [vmem:[#allocation3] sm:$0x1] %v401_v54 }
 0x19c   : > { %v10454_v63 = vadd.f32 %v10357_v3, %v7929_v39  ;;  %3549 = vmatprep.mubr.bf16.mxu0 %v10352_v7  ;;  %411 = vst [vmem:[#allocation3 + $0x24] sm:$0x1] %v410_v35  ;;  %v9197_v3 = vld [vmem:[#allocation10 + $0x48] sm:$0xff]   ;;  %v8013_v62 = vpop.f32.mrf.mxu1  ;;  %v464_v35 = vsel %vm9924_vm8, 0, %v463_v15 }
 0x19d   : > { %v7931_v2 = vpop.f32.mrf.mxu0  ;;  %v9198_v39 = vld [vmem:[#allocation10 + $0x8] sm:$0xff]   ;;  %8262 = vmatprep.subr.bf16.mxu1 %v9197_v3  ;;  %v10468_v23 = vadd.f32 %v8013_v62, %v8012_v48  ;;  %465 = vst [vmem:[#allocation3 + $0x2c] sm:$0x1] %v464_v35  ;;  %v9203_v3 = vld [vmem:[#allocation10 + $0x98] sm:$0xff]  }
 0x19e   : > { %v7932_v6 = vadd.f32 %v7931_v2, %v7930_v55  ;;  %v9199_v55 = vld [vmem:[#allocation10 + $0xa0] sm:$0xff]   ;;  %v10472_v2 = vpop.f32.mrf.mxu1  ;;  %8263 = vmatpush3.bf16.msra.mxu1 %v9198_v39  ;;  %v412_v62 = vld [vmem:[#allocation3 + $0x30] sm:$0x1] }
 0x19f   : > { %v10463_v9 = vpop.f32.mrf.mxu0  ;;  %8808 = vmatprep.subr.bf16.mxu0 %v9199_v55  ;;  %8264 = vmatprep.subr.bf16.mxu1 %v9200_v46 }
 0x1a0   : > { %v10466_v10 = vadd.f32 %v7932_v6, %v10378_v5  ;;  %v9201_v5 = vld [vmem:[#allocation10] sm:$0xff]   ;;  %v10477_v6 = vpop.f32.mrf.mxu1  ;;  %8809 = vmatpush3.bf16.msra.mxu0 %v9199_v55 }
 0x1a1   : > { %v10470_v26 = vpop.f32.mrf.mxu0  ;;  %8810 = vmatprep.subr.bf16.mxu0 %v9203_v3 }
 0x1a2   : > { %11708 = vst [vmem:[#allocation19_spill] sm:$0xff] %v10466_v10  ;;  %11709 = vst [vmem:[#allocation20_spill] sm:$0xff] %v10470_v26  ;;  %v8018_v54 = vpop.f32.mrf.mxu1  ;;  %8265 = vmatpush3.bf16.msra.mxu1 %v9201_v5  ;;  %v413_v10 = vsel %vm9680_vm2, 0, %v412_v62 }
 0x1a3   : > { %v7936_v0 = vpop.f32.mrf.mxu0  ;;  %3550 = vmatmul.mubr.bf16.gmra.mxu0 %v10345_v32  ;;  %414 = vst [vmem:[#allocation3 + $0x30] sm:$0x1] %v413_v10 }
 0x1a4   : > { %3557 = vmatprep.mubr.bf16.mxu0 %v10369_v40  ;;  %v8019_v32 = vpop.f32.mrf.mxu1  ;;  %8811 = vmatpush3.bf16.msra.mxu0 %v9203_v3 }
 0x1a5   : > { %v7937_v48 = vpop.f32.mrf.mxu0  ;;  %v10485_v55 = vadd.f32 %v8019_v32, %v8018_v54  ;;  %v415_v54 = vld [vmem:[#allocation3 + $0x3c] sm:$0x1] }
 0x1a6   : > { %v7938_v39 = vadd.f32 %v7937_v48, %v7936_v0  ;;  %v467_v0 = vsel %vm9924_vm8, 0, %v466_v43  ;;  %v9206_v48 = vld [vmem:[#allocation10 + $0x90] sm:$0xff]   ;;  %v10489_v5 = vpop.f32.mrf.mxu1  ;;  %v9208_v43 = vld [vmem:[#allocation10 + $0x88] sm:$0xff]  }
 0x1a7   : > { %v7939_v15 = vpop.f32.mrf.mxu0  ;;  %468 = vst [vmem:[#allocation3 + $0x38] sm:$0x1] %v467_v0  ;;  %8812 = vmatprep.subr.bf16.mxu0 %v9206_v48  ;;  %v469_v0 = vld [vmem:[#allocation3 + $0x44] sm:$0x1] }
 0x1a8   : > { %v10483_v35 = vadd.f32 %v10365_v53, %v7938_v39  ;;  %v10492_v53 = vpop.f32.mrf.mxu1  ;;  %8813 = vmatpush3.bf16.msra.mxu0 %v9206_v48 }
 0x1a9   : > { %v7940_v46 = vpop.f32.mrf.mxu0  ;;  %8814 = vmatprep.subr.bf16.mxu0 %v9208_v43 }
 0x1aa   : > { %11710 = vst [vmem:[#allocation21_spill] sm:$0xff] %v10483_v35  ;;  %v7941_v26 = vadd.f32 %v7940_v46, %v7939_v15  ;;  %v8024_v39 = vpop.f32.mrf.mxu1  ;;  %v416_v15 = vsel %vm9680_vm2, 0, %v415_v54 }
 0x1ab   : > { %v7942_v62 = vpop.f32.mrf.mxu0  ;;  %3558 = vmatmul.mubr.bf16.gmra.mxu0 %v10352_v7  ;;  %417 = vst [vmem:[#allocation3 + $0x3c] sm:$0x1] %v416_v15  ;;  %v10502_v7 = vld [vmem:[#allocation10 + $0x178] sm:$0xff]  }
 0x1ac   : > { %v10495_v10 = vadd.f32 %v10381_v1, %v7941_v26  ;;  %3565 = vmatprep.mubr.bf16.mxu0 %v10376_v58  ;;  %11713 = vst [vmem:[#allocation24_spill] sm:$0xff] %v10502_v7  ;;  %v8025_v1 = vpop.f32.mrf.mxu1  ;;  %v470_v58 = vsel %vm9924_vm8, 0, %v469_v0  ;;  %8815 = vmatpush3.bf16.msra.mxu0 %v9208_v43 }
 0x1ad   : > { %v7943_v3 = vpop.f32.mrf.mxu0  ;;  %v10509_v48 = vadd.f32 %v8025_v1, %v8024_v39  ;;  %8850 = vmatprep.subr.bf16.mxu1 %v10502_v7  ;;  %471 = vst [vmem:[#allocation3 + $0x44] sm:$0x1] %v470_v58 }
 0x1ae   : > { %11711 = vst [vmem:[#allocation22_spill] sm:$0xff] %v10495_v10  ;;  %v7944_v32 = vadd.f32 %v7943_v3, %v7942_v62  ;;  %v9209_v3 = vld [vmem:[#allocation10 + $0x80] sm:$0xff]   ;;  %v10514_v54 = vpop.f32.mrf.mxu1  ;;  %v472_v10 = vld [vmem:[#allocation3 + $0x50] sm:$0x1] }
 0x1af   : > { %v10500_v46 = vpop.f32.mrf.mxu0  ;;  %8816 = vmatprep.subr.bf16.mxu0 %v9209_v3 }
 0x1b0   : > { %11712 = vst [vmem:[#allocation23_spill] sm:$0xff] %v10500_v46  ;;  %v10505_v26 = vadd.f32 %v7944_v32, %v10397_v24  ;;  %v10517_v24 = vpop.f32.mrf.mxu1  ;;  %v418_v32 = vld [vmem:[#allocation3 + $0x48] sm:$0x1]  ;;  %8817 = vmatpush3.bf16.msra.mxu0 %v9209_v3  ;;  %v473_v46 = vsel %vm9924_vm8, 0, %v472_v10 }
 0x1b1   : > { %v10511_v62 = vpop.f32.mrf.mxu0  ;;  %v419_v43 = vsel %vm9680_vm2, 0, %v418_v32  ;;  %v10531_v3 = vld [vmem:[%s11672_s2] ss:$0 sm:$0xff]  ;;  %474 = vst [vmem:[#allocation3 + $0x50] sm:$0x1] %v473_v46 }
 0x1b2   : > { %11714 = vst [vmem:[#allocation25_spill] sm:$0xff] %v10505_v26  ;;  %11715 = vst [vmem:[#allocation26_spill] sm:$0xff] %v10511_v62  ;;  %v8030_v39 = vpop.f32.mrf.mxu1 }
 0x1b3   : > { %v7948_v15 = vpop.f32.mrf.mxu0  ;;  %3566 = vmatmul.mubr.bf16.gmra.mxu0 %v10369_v40  ;;  %420 = vst [vmem:[#allocation3 + $0x48] sm:$0x1] %v419_v43 }
 0x1b4   : > { %v8031_v58 = vpop.f32.mrf.mxu1 }
 0x1b5   : > { %v7949_v0 = vpop.f32.mrf.mxu0  ;;  %v10524_v62 = vadd.f32 %v8031_v58, %v8030_v39  ;;  %v1811_v39 = vadd.f32 %v10531_v3, %v10247_v33  ;;  %v1812_v33 = vadd.f32 %v10531_v3, %v10254_v41  ;;  %v1810_v41 = vadd.f32 %v10531_v3, %v10245_v22 }
 0x1b6   : > { %v7950_v1 = vadd.f32 %v7949_v0, %v7948_v15  ;;  %v10533_v32 = vpop.f32.mrf.mxu1 }
 0x1b7   : > { %v7951_v7 = vpop.f32.mrf.mxu0 }
 0x1b8   : > { %v10522_v26 = vadd.f32 %v10389_v56, %v7950_v1  ;;  %v10535_v43 = vpop.f32.mrf.mxu1  ;;  %v1809_v1 = vadd.f32 %v10531_v3, %v10239_v30  ;;  %v7999_v30 = vadd.f32 %v10420_v8, %v10415_v45 }
 0x1b9   : > { %v7952_v40 = vpop.f32.mrf.mxu0 }
 0x1ba   : > { %11716 = vst [vmem:[#allocation27_spill] sm:$0xff] %v10522_v26  ;;  %v7953_v15 = vadd.f32 %v7952_v40, %v7951_v7  ;;  %v421_v26 = vld [vmem:[#allocation3 + $0x54] sm:$0x1]  ;;  %v8005_v7 = vadd.f32 %v10436_v27, %v10431_v52  ;;  %v8036_v46 = vpop.f32.mrf.mxu1 }
 0x1bb   : > { %v8724_v0 = vpop.f32.mrf.mxu0 }
 0x1bc   : > { %v10538_v56 = vadd.f32 %v10399_v37, %v7953_v15  ;;  %v2735_v10 = vadd.f32 %v8724_v0, %v10429_v12  ;;  %v422_v37 = vsel %vm9680_vm2, 0, %v421_v26  ;;  %v475_v15 = vld [vmem:[#allocation3 + $0x5c] sm:$0x1]  ;;  %v8037_v0 = vpop.f32.mrf.mxu1 }
 0x1bd   : > { %v2726_v58 = vpop.f32.mrf.mxu0  ;;  %423 = vst [vmem:[#allocation3 + $0x54] sm:$0x1] %v422_v37  ;;  %v476_v27 = vsel %vm9924_vm8, 0, %v475_v15 }
 0x1be   : > { %11717 = vst [vmem:[#allocation28_spill] sm:$0xff] %v10538_v56  ;;  %v10547_v40 = vadd.f32 %v2735_v10, %v1811_v39  ;;  %v2727_v35 = vadd.f32 %v10413_v11, %v2726_v58  ;;  %v10560_v11 = vadd.f32 %v8037_v0, %v8036_v46  ;;  %477 = vst [vmem:[#allocation3 + $0x5c] sm:$0x1] %v476_v27  ;;  %v10564_v26 = vpop.f32.mrf.mxu1  ;;  %v424_v46 = vld [vmem:[#allocation3 + $0x60] sm:$0x1] }
 0x1bf   : > { %v8725_v12 = vpop.f32.mrf.mxu0  ;;  %v425_v22 = vsel %vm9680_vm2, 0, %v424_v46  ;;  %v1819_v46 = vadd.f32 %v10531_v3, %v10337_v49  ;;  %v1820_v49 = vadd.f32 %v10531_v3, %v10348_v21  ;;  %v1818_v21 = vadd.f32 %v10531_v3, %v10324_v28 }
 0x1c0   : > { %v10556_v56 = vadd.f32 %v2727_v35, %v1809_v1  ;;  %v2738_v52 = vadd.f32 %v8725_v12, %v8005_v7  ;;  %v10568_v8 = vpop.f32.mrf.mxu1  ;;  %v1815_v1 = vadd.f32 %v10531_v3, %v10284_v61  ;;  %426 = vst [vmem:[#allocation3 + $0x60] sm:$0x1] %v425_v22  ;;  %v1817_v22 = vadd.f32 %v10531_v3, %v10313_v42 }
 0x1c1   : > { %v2729_v39 = vpop.f32.mrf.mxu0  ;;  %v8023_v42 = vadd.f32 %v10492_v53, %v10489_v5  ;;  %v1823_v53 = vadd.f32 %v10531_v3, %v10385_v44 }
 0x1c2   : > { %v10566_v10 = vadd.f32 %v2738_v52, %v1812_v33  ;;  %v2730_v58 = vadd.f32 %v7999_v30, %v2729_v39  ;;  %v8017_v33 = vadd.f32 %v10477_v6, %v10472_v2  ;;  %v8042_v12 = vpop.f32.mrf.mxu1  ;;  %v1813_v30 = vadd.f32 %v10531_v3, %v10262_v25  ;;  %v478_v6 = vld [vmem:[#allocation3 + $0x68] sm:$0x1] }
 0x1c3   : > { %v8728_v45 = vpop.f32.mrf.mxu0  ;;  %v1816_v39 = vadd.f32 %v10531_v3, %v10297_v16  ;;  %v479_v25 = vsel %vm9924_vm8, 0, %v478_v6 }
 0x1c4   : > { %v10570_v35 = vadd.f32 %v2730_v58, %v1810_v41  ;;  %v2751_v7 = vadd.f32 %v8728_v45, %v10468_v23  ;;  %v8011_v23 = vadd.f32 %v10451_v34, %v10448_v4  ;;  %v8043_v52 = vpop.f32.mrf.mxu1  ;;  %v1814_v4 = vadd.f32 %v10531_v3, %v10273_v36  ;;  %480 = vst [vmem:[#allocation3 + $0x68] sm:$0x1] %v479_v25 }
 0x1c5   : > { %v2742_v37 = vpop.f32.mrf.mxu0  ;;  %v10590_v41 = vadd.f32 %v8043_v52, %v8042_v12  ;;  %v427_v12 = vld [vmem:[#allocation3 + $0x6c] sm:$0x1]  ;;  %v8029_v36 = vadd.f32 %v10517_v24, %v10514_v54  ;;  %v481_v52 = vld [vmem:[#allocation3 + $0x74] sm:$0x1] }
 0x1c6   : > { %v10579_v15 = vadd.f32 %v2751_v7, %v1815_v1  ;;  %v2743_v0 = vadd.f32 %v10446_v17, %v2742_v37  ;;  %v10594_v17 = vpop.f32.mrf.mxu1  ;;  %v482_v24 = vsel %vm9924_vm8, 0, %v481_v52 }
 0x1c7   : > { %v8729_v61 = vpop.f32.mrf.mxu0  ;;  %483 = vst [vmem:[#allocation3 + $0x74] sm:$0x1] %v482_v24 }
 0x1c8   : > { %v10586_v27 = vadd.f32 %v2743_v0, %v1813_v30  ;;  %v2754_v2 = vadd.f32 %v8729_v61, %v8017_v33  ;;  %v10600_v7 = vpop.f32.mrf.mxu1 }
 0x1c9   : > { %v2745_v58 = vpop.f32.mrf.mxu0 }
 0x1ca   : > { %v10596_v45 = vadd.f32 %v2754_v2, %v1816_v39  ;;  %v2746_v34 = vadd.f32 %v8011_v23, %v2745_v58  ;;  %v8048_v30 = vpop.f32.mrf.mxu1  ;;  %v428_v23 = vsel %vm9680_vm2, 0, %v427_v12  ;;  %v8041_v12 = vadd.f32 %v10568_v8, %v10564_v26  ;;  %v484_v8 = vld [vmem:[#allocation3 + $0x80] sm:$0x1] }
 0x1cb   : > { %v8732_v1 = vpop.f32.mrf.mxu0  ;;  %429 = vst [vmem:[#allocation3 + $0x6c] sm:$0x1] %v428_v23 }
 0x1cc   : > { %v10602_v16 = vadd.f32 %v2746_v34, %v1814_v4  ;;  %v2767_v37 = vadd.f32 %v8732_v1, %v10509_v48  ;;  %v8049_v39 = vpop.f32.mrf.mxu1 }
 0x1cd   : > { %v2758_v33 = vpop.f32.mrf.mxu0 }
 0x1ce   : > { %v10611_v0 = vadd.f32 %v2767_v37, %v1819_v46  ;;  %v2759_v61 = vadd.f32 %v10485_v55, %v2758_v33  ;;  %v8050_v55 = vadd.f32 %v8049_v39, %v8048_v30  ;;  %v8051_v58 = vpop.f32.mrf.mxu1  ;;  %v430_v37 = vld [vmem:[#allocation3 + $0x78] sm:$0x1]  ;;  %v1821_v30 = vadd.f32 %v10531_v3, %v10361_v51 }
 0x1cf   : > { %v8733_v48 = vpop.f32.mrf.mxu0  ;;  %v431_v33 = vsel %vm9680_vm2, 0, %v430_v37  ;;  %v485_v51 = vsel %vm9924_vm8, 0, %v484_v8  ;;  %v436_v8 = vld [vmem:[#allocation3 + $0x90] sm:$0x1] }
 0x1d0   : > { %v10620_v2 = vadd.f32 %v2759_v61, %v1817_v22  ;;  %v2770_v54 = vadd.f32 %v8733_v48, %v8029_v36  ;;  %v8052_v1 = vpop.f32.mrf.mxu1  ;;  %432 = vst [vmem:[#allocation3 + $0x78] sm:$0x1] %v431_v33  ;;  %v1824_v48 = vadd.f32 %v10531_v3, %v10394_v20  ;;  %486 = vst [vmem:[#allocation3 + $0x80] sm:$0x1] %v485_v51 }
 0x1d1   : > { %v2761_v6 = vpop.f32.mrf.mxu0  ;;  %v1827_v20 = vadd.f32 %v10531_v3, %v10411_v19  ;;  %v8053_v37 = vadd.f32 %v8052_v1, %v8051_v58  ;;  %v1828_v19 = vadd.f32 %v10531_v3, %v10423_v29 }
 0x1d2   : > { %v10624_v25 = vadd.f32 %v2770_v54, %v1820_v49  ;;  %v2762_v4 = vadd.f32 %v8023_v42, %v2761_v6  ;;  %v8054_v36 = vpop.f32.mrf.mxu1  ;;  %v1822_v54 = vadd.f32 %v10531_v3, %v10372_v60 }
 0x1d3   : > { %v8736_v34 = vpop.f32.mrf.mxu0 }
 0x1d4   : > { %v10628_v5 = vadd.f32 %v2762_v4, %v1818_v21  ;;  %v2783_v46 = vadd.f32 %v8736_v34, %v10560_v11  ;;  %v8035_v11 = vadd.f32 %v10535_v43, %v10533_v32  ;;  %v8055_v23 = vpop.f32.mrf.mxu1  ;;  %v1750_v4 = vadd.f32 %v10406_v38, %v10339_v13  ;;  %v487_v13 = vld [vmem:[#allocation3 + $0x8c] sm:$0x1] }
 0x1d5   : > { %v2774_v22 = vpop.f32.mrf.mxu0  ;;  %v8056_v52 = vadd.f32 %v8055_v23, %v8054_v36  ;;  %v1825_v34 = vadd.f32 %v10531_v3, %v10402_v59  ;;  %v8047_v59 = vadd.f32 %v10600_v7, %v10594_v17  ;;  %v488_v1 = vsel %vm9924_vm8, 0, %v487_v13 }
 0x1d6   : > { %v10637_v28 = vadd.f32 %v2783_v46, %v1823_v53  ;;  %v2775_v61 = vadd.f32 %v10524_v62, %v2774_v22  ;;  %v8057_v39 = vpop.f32.mrf.mxu1  ;;  %v433_v46 = vld [vmem:[#allocation3 + $0x84] sm:$0x1]  ;;  %489 = vst [vmem:[#allocation3 + $0x8c] sm:$0x1] %v488_v1  ;;  %v1826_v29 = vadd.f32 %v10531_v3, %v1750_v4  ;;  %v1831_v17 = vadd.f32 %v10531_v3, %v10442_v57  ;;  %v11719_v1 = vld [vmem:[#allocation17_spill] sm:$0xff] }
 0x1d7   : > { %v8737_v44 = vpop.f32.mrf.mxu0 }
 0x1d8   : > { %v10644_v49 = vadd.f32 %v2775_v61, %v1821_v30  ;;  %v2786_v26 = vadd.f32 %v8737_v44, %v8041_v12  ;;  %v8058_v24 = vpop.f32.mrf.mxu1  ;;  %v434_v12 = vsel %vm9680_vm2, 0, %v433_v46 }
 0x1d9   : > { %v2777_v42 = vpop.f32.mrf.mxu0  ;;  %435 = vst [vmem:[#allocation3 + $0x84] sm:$0x1] %v434_v12  ;;  %v8059_v57 = vadd.f32 %v8058_v24, %v8057_v39 }
 0x1da   : > { %v10650_v62 = vadd.f32 %v2786_v26, %v1824_v48  ;;  %v2778_v32 = vadd.f32 %v8035_v11, %v2777_v42  ;;  %v8060_v60 = vpop.f32.mrf.mxu1  ;;  %v1829_v42 = vadd.f32 %v10531_v3, %v10427_v47  ;;  %v1832_v47 = vadd.f32 %v10531_v3, %v10454_v63 }
 0x1db   : > { %v8740_v43 = vpop.f32.mrf.mxu0 }
 0x1dc   : > { %v10654_v6 = vadd.f32 %v2778_v32, %v1822_v54  ;;  %v2799_v21 = vadd.f32 %v8740_v43, %v8050_v55  ;;  %v8061_v38 = vpop.f32.mrf.mxu1  ;;  %v437_v54 = vsel %vm9680_vm2, 0, %v436_v8  ;;  %v1766_v32 = vadd.f32 %v10433_v14, %v10363_v50  ;;  %v11718_v14 = vld [vmem:[#allocation20_spill] sm:$0xff] }
 0x1dd   : > { %v2790_v53 = vpop.f32.mrf.mxu0  ;;  %438 = vst [vmem:[#allocation3 + $0x90] sm:$0x1] %v437_v54 }
 0x1de   : > { %v10662_v22 = vadd.f32 %v2799_v21, %v1827_v20  ;;  %v2791_v33 = vadd.f32 %v10590_v41, %v2790_v53  ;;  %v8062_v41 = vadd.f32 %v8061_v38, %v8060_v60  ;;  %v8063_v61 = vpop.f32.mrf.mxu1  ;;  %v490_v60 = vld [vmem:[#allocation3 + $0x98] sm:$0x1]  ;;  %v1830_v39 = vadd.f32 %v10531_v3, %v1766_v32 }
 0x1df   : > { %v8741_v55 = vpop.f32.mrf.mxu0  ;;  %v491_v50 = vsel %vm9924_vm8, 0, %v490_v60 }
 0x1e0   : > { %v10671_v36 = vadd.f32 %v2791_v33, %v1825_v34  ;;  %v2802_v58 = vadd.f32 %v8741_v55, %v8053_v37  ;;  %v8064_v48 = vpop.f32.mrf.mxu1  ;;  %492 = vst [vmem:[#allocation3 + $0x98] sm:$0x1] %v491_v50 }
 0x1e1   : > { %v2793_v30 = vpop.f32.mrf.mxu0  ;;  %v8065_v43 = vadd.f32 %v8064_v48, %v8063_v61  ;;  %v11720_v61 = vld [vmem:[#allocation19_spill] sm:$0xff]  ;;  %v9221_v48 = vld [vmem:[#allocation10 + $0x138] sm:$0xff]  }
 0x1e2   : > { %v10675_v44 = vadd.f32 %v2802_v58, %v1828_v19  ;;  %v2794_v11 = vadd.f32 %v8047_v59, %v2793_v30  ;;  %v8066_v20 = vpop.f32.mrf.mxu1  ;;  %v7935_v19 = vadd.f32 %v11718_v14, %v10463_v9  ;;  %v439_v58 = vld [vmem:[#allocation3 + $0x9c] sm:$0x1]  ;;  %8386 = vmatprep.subr.bf16.mxu0 %v9221_v48 }
 0x1e3   : > { %v8744_v23 = vpop.f32.mrf.mxu0 }
 0x1e4   : > { %v10678_v26 = vadd.f32 %v2794_v11, %v1826_v29  ;;  %v2815_v7 = vadd.f32 %v8744_v23, %v8062_v41  ;;  %v8067_v53 = vpop.f32.mrf.mxu1  ;;  %v1782_v41 = vadd.f32 %v7935_v19, %v11719_v1  ;;  %v1833_v29 = vadd.f32 %v10531_v3, %v11720_v61  ;;  %v4357_v31 = vld [vmem:[#allocation3 + $0x90] sm:$0xf] }
 0x1e5   : > { %v2806_v51 = vpop.f32.mrf.mxu0  ;;  %v8068_v33 = vadd.f32 %v8067_v53, %v8066_v20  ;;  %v440_v11 = vsel %vm9680_vm2, 0, %v439_v58 }
 0x1e6   : > { %v10688_v21 = vadd.f32 %v2815_v7, %v1831_v17  ;;  %v2807_v4 = vadd.f32 %v8056_v52, %v2806_v51  ;;  %v8069_v52 = vpop.f32.mrf.mxu1  ;;  %441 = vst [vmem:[#allocation3 + $0x9c] sm:$0x1] %v440_v11  ;;  %v493_v17 = vld [vmem:[#allocation3 + $0xa4] sm:$0x1]  ;;  %v1834_v20 = vadd.f32 %v10531_v3, %v1782_v41 }
 0x1e7   : > { %v8745_v34 = vpop.f32.mrf.mxu0  ;;  %v494_v51 = vsel %vm9924_vm8, 0, %v493_v17  ;;  %v11725_v17 = vld [vmem:[#allocation18_spill] sm:$0xff] }
 0x1e8   : > { %v10690_v46 = vadd.f32 %v2807_v4, %v1829_v42  ;;  %v2818_v37 = vadd.f32 %v8745_v34, %v8065_v43  ;;  %v8070_v59 = vpop.f32.mrf.mxu1  ;;  %495 = vst [vmem:[#allocation3 + $0xa4] sm:$0x1] %v494_v51  ;;  %v11721_v34 = vld [vmem:[#allocation21_spill] sm:$0xff] }
 0x1e9   : > { %v2809_v12 = vpop.f32.mrf.mxu0  ;;  %v8071_v7 = vadd.f32 %v8070_v59, %v8069_v52 }
 0x1ea   : > { %v10698_v55 = vadd.f32 %v2818_v37, %v1832_v47  ;;  %v2810_v24 = vadd.f32 %v8059_v57, %v2809_v12  ;;  %v8072_v30 = vpop.f32.mrf.mxu1  ;;  %v1835_v57 = vadd.f32 %v10531_v3, %v11721_v34  ;;  %v445_v34 = vld [vmem:[#allocation3 + $0xb4] sm:$0x1] }
 0x1eb   : > { %v8748_v13 = vpop.f32.mrf.mxu0 }
 0x1ec   : > { %v10701_v63 = vadd.f32 %v2810_v24, %v1830_v39  ;;  %v8073_v8 = vpop.f32.mrf.mxu1  ;;  %v11722_v39 = vld [vmem:[#allocation23_spill] sm:$0xff]  ;;  %v11723_v24 = vld [vmem:[#allocation26_spill] sm:$0xff] }
 0x1ed   : > { %v2822_v38 = vpop.f32.mrf.mxu0  ;;  %v8074_v54 = vadd.f32 %v8073_v8, %v8072_v30  ;;  %v7947_v59 = vadd.f32 %v11723_v24, %v11722_v39  ;;  %v496_v30 = vld [vmem:[#allocation3 + $0xb0] sm:$0x1]  ;;  %v11726_v8 = vld [vmem:[#allocation25_spill] sm:$0xff] }
 0x1ee   : > { %v2823_v9 = vadd.f32 %v8068_v33, %v2822_v38  ;;  %v8075_v43 = vpop.f32.mrf.mxu1  ;;  %v442_v33 = vld [vmem:[#allocation3 + $0xa8] sm:$0x1]  ;;  %v11724_v38 = vld [vmem:[#allocation22_spill] sm:$0xff]  ;;  %v497_v11 = vsel %vm9924_vm8, 0, %v496_v30  ;;  %v1837_v51 = vadd.f32 %v10531_v3, %v11726_v8 }
 0x1ef   : > { %v8749_v23 = vpop.f32.mrf.mxu0  ;;  %v2831_v53 = vadd.f32 %v8748_v13, %v8074_v54  ;;  %v443_v19 = vsel %vm9680_vm2, 0, %v442_v33  ;;  %v1836_v13 = vadd.f32 %v10531_v3, %v11724_v38  ;;  %498 = vst [vmem:[#allocation3 + $0xb0] sm:$0x1] %v497_v11 }
 0x1f0   : > { %v10708_v42 = vadd.f32 %v2823_v9, %v1833_v29  ;;  %v8076_v37 = vpop.f32.mrf.mxu1  ;;  %444 = vst [vmem:[#allocation3 + $0xa8] sm:$0x1] %v443_v19  ;;  %v499_v19 = vld [vmem:[#allocation3 + $0xbc] sm:$0x1] }
 0x1f1   : > { %v2825_v32 = vpop.f32.mrf.mxu0  ;;  %v8077_v12 = vadd.f32 %v8076_v37, %v8075_v43  ;;  %v10717_v50 = vadd.f32 %v2831_v53, %v1835_v57  ;;  %v446_v53 = vsel %vm9680_vm2, 0, %v445_v34 }
 0x1f2   : > { %v2826_v4 = vadd.f32 %v8071_v7, %v2825_v32  ;;  %v8078_v52 = vpop.f32.mrf.mxu1  ;;  %v1798_v7 = vadd.f32 %v7947_v59, %v11725_v17  ;;  %447 = vst [vmem:[#allocation3 + $0xb4] sm:$0x1] %v446_v53 }
 0x1f3   : > { %v8752_v47 = vpop.f32.mrf.mxu0  ;;  %v2834_v58 = vadd.f32 %v8749_v23, %v8077_v12 }
 0x1f4   : > { %v10715_v60 = vadd.f32 %v2826_v4, %v1834_v20  ;;  %v8079_v41 = vpop.f32.mrf.mxu1  ;;  %v1838_v37 = vadd.f32 %v10531_v3, %v1798_v7 }
 0x1f5   : > { %v2838_v14 = vpop.f32.mrf.mxu0  ;;  %v8080_v61 = vadd.f32 %v8079_v41, %v8078_v52  ;;  %v10725_v29 = vadd.f32 %v2834_v58, %v1836_v13  ;;  %v11727_v13 = vld [vmem:[#allocation27_spill] sm:$0xff] }
 0x1f6   : > { %v8081_v48 = vpop.f32.mrf.mxu1  ;;  %v1839_v58 = vadd.f32 %v10531_v3, %v11727_v13 }
 0x1f7   : > { %v8753_v1 = vpop.f32.mrf.mxu0  ;;  %v2839_v54 = vadd.f32 %v8080_v61, %v2838_v14  ;;  %v500_v14 = vsel %vm9924_vm8, 0, %v499_v19 }
 0x1f8   : > { %v8082_v23 = vpop.f32.mrf.mxu1  ;;  %501 = vst [vmem:[#allocation3 + $0xbc] sm:$0x1] %v500_v14 }
 0x1f9   : > { %v2841_v9 = vpop.f32.mrf.mxu0  ;;  %v8083_v43 = vadd.f32 %v8082_v23, %v8081_v48  ;;  %v10732_v20 = vadd.f32 %v2839_v54, %v1837_v51  ;;  %v11728_v23 = vld [vmem:[#allocation28_spill] sm:$0xff] }
 0x1fa   : > { %v8084_v57 = vpop.f32.mrf.mxu1 }
 0x1fb   : > { %v8130_v32 = vpop.f32.mrf.mxu0  ;;  %v2842_v33 = vadd.f32 %v8083_v43, %v2841_v9  ;;  %v448_v9 = vld [vmem:[#allocation3 + $0xc0] sm:$0x1]  ;;  %v1840_v43 = vadd.f32 %v10531_v3, %v11728_v23 }
 0x1fc   : > { %v8085_v52 = vpop.f32.mrf.mxu1  ;;  %v449_v8 = vsel %vm9680_vm2, 0, %v448_v9 }
 0x1fd   : > { %v8131_v4 = vpop.f32.mrf.mxu0  ;;  %v8086_v39 = vadd.f32 %v8085_v52, %v8084_v57  ;;  %v10739_v24 = vadd.f32 %v2842_v33, %v1838_v37  ;;  %450 = vst [vmem:[#allocation3 + $0xc0] sm:$0x1] %v449_v8  ;;  %v502_v37 = vld [vmem:[#allocation3 + $0xc8] sm:$0x1] }
 0x1fe   : > { %v8087_v38 = vpop.f32.mrf.mxu1  ;;  %v8132_v17 = vadd.f32 %v8131_v4, %v8130_v32  ;;  %v503_v4 = vsel %vm9924_vm8, 0, %v502_v37 }
 0x1ff   : > { %v8133_v12 = vpop.f32.mrf.mxu0  ;;  %v2847_v41 = vadd.f32 %v8752_v47, %v8086_v39  ;;  %504 = vst [vmem:[#allocation3 + $0xc8] sm:$0x1] %v503_v4 }
 0x200   : > { %v8088_v61 = vpop.f32.mrf.mxu1 }
 0x201   : > { %v8134_v59 = vpop.f32.mrf.mxu0  ;;  %v10743_v11 = vadd.f32 %v2847_v41, %v1839_v58  ;;  %v8089_v48 = vadd.f32 %v8088_v61, %v8087_v38 }
 0x202   : > { %v8772_v51 = vpop.f32.mrf.mxu1  ;;  %v8135_v52 = vadd.f32 %v8134_v59, %v8133_v12 }
 0x203   : > { %v8136_v30 = vpop.f32.mrf.mxu0  ;;  %v2850_v34 = vadd.f32 %v8753_v1, %v8089_v48 }
 0x204   : > { %v3608_v47 = vpop.f32.mrf.mxu1 }
 0x205   : > { %v8137_v7 = vpop.f32.mrf.mxu0  ;;  %v10749_v33 = vadd.f32 %v2850_v34, %v1840_v43  ;;  %v3609_v19 = vadd.f32 %v8132_v17, %v3608_v47 }
 0x206   : > { %v8138_v54 = vadd.f32 %v8137_v7, %v8136_v30  ;;  %v8773_v14 = vpop.f32.mrf.mxu1 }
 0x207   : > { %v8139_v57 = vpop.f32.mrf.mxu0  ;;  %v3735_v3 = vadd.f32 %v3609_v19, %v10556_v56 }
 0x208   : > { %v3617_v53 = vadd.f32 %v8772_v51, %v8138_v54  ;;  %v3611_v13 = vpop.f32.mrf.mxu1 }
 0x209   : > { %v8140_v32 = vpop.f32.mrf.mxu0  ;;  %v3831_v30 = vmax.f32 %v3735_v3, 0.0  ;;  %v3612_v61 = vadd.f32 %v8135_v52, %v3611_v13 }
 0x20a   : > { %v3737_v39 = vadd.f32 %v3617_v53, %v10547_v40  ;;  %v8141_v38 = vadd.f32 %v8140_v32, %v8139_v57  ;;  %v8776_v12 = vpop.f32.mrf.mxu1 }
 0x20b   : > { %v8142_v1 = vpop.f32.mrf.mxu0  ;;  %v7809_v7 = vpack.c.bf16 %v3831_v30, %v3831_v30  ;;  %v3736_v8 = vadd.f32 %v3612_v61, %v10570_v35 }
 0x20c   : > { %v3833_v58 = vmax.f32 %v3737_v39, 0.0  ;;  %v3620_v41 = vadd.f32 %v8773_v14, %v8141_v38  ;;  %v3624_v23 = vpop.f32.mrf.mxu1  ;;  %v4287_v14 = vld [vmem:[#allocation3 + $0x18] sm:$0xf]  ;;  %v4280_v38 = vld [vmem:[#allocation3 + $0xc] sm:$0xf] }
 0x20d   : > { %v8143_v9 = vpop.f32.mrf.mxu0  ;;  %v3960_v56 = vshrl.u32 %v7809_v7, 16  ;;  %v3832_v43 = vmax.f32 %v3736_v8, 0.0 }
 0x20e   : > { %v7811_v48 = vpack.c.bf16 %v3833_v58, %v3833_v58  ;;  %v3738_v59 = vadd.f32 %v3620_v41, %v10566_v10  ;;  %v8144_v17 = vadd.f32 %v8143_v9, %v8142_v1  ;;  %v10757_v19 = vpop.f32.mrf.mxu1  ;;  %v3963_v10 = vshll.u32 %v7809_v7, 16 }
 0x20f   : > { %v8145_v40 = vpop.f32.mrf.mxu0  ;;  %v3962_v32 = vrot.slane %v3960_v56, 7  ;;  %v7810_v4 = vpack.c.bf16 %v3832_v43, %v3832_v43 }
 0x210   : > { %v3977_v51 = vshrl.u32 %v7811_v48, 16  ;;  %v3834_v54 = vmax.f32 %v3738_v59, 0.0  ;;  %v3625_v34 = vadd.f32 %v8144_v17, %v3624_v23  ;;  %v3980_v53 = vshll.u32 %v7811_v48, 16  ;;  %v3627_v9 = vpop.f32.mrf.mxu1  ;;  %v451_v59 = vld [vmem:[#allocation3 + $0xcc] sm:$0x1] }
 0x211   : > { %v8146_v57 = vpop.f32.mrf.mxu0  ;;  %v3965_v58 = vor.u32 %v3963_v10, %v3962_v32  ;;  %v3968_v41 = vshrl.u32 %v7810_v4, 16  ;;  %v3971_v30 = vshll.u32 %v7810_v4, 16  ;;  %v4291_v23 = vld [vmem:[#allocation3 + $0x20] sm:$0x1]  ;;  %v3966_v4 = vrot.slane %v3962_v32, 4 }
 0x212   : > { %v3979_v47 = vrot.slane %v3977_v51, 7  ;;  %v7812_v37 = vpack.c.bf16 %v3834_v54, %v3834_v54  ;;  %v8147_v52 = vadd.f32 %v8146_v57, %v8145_v40  ;;  %v3739_v35 = vadd.f32 %v3625_v34, %v10586_v27  ;;  %v10764_v34 = vpop.f32.mrf.mxu1 }
 0x213   : > { %v8148_v39 = vpop.f32.mrf.mxu0  ;;  %v4281_v27 = vsel %vm9713_vm7, %v3965_v58, %v4280_v38  ;;  %v3970_v54 = vrot.slane %v3968_v41, 7  ;;  %v452_v57 = vsel %vm9680_vm2, 0, %v451_v59 }
 0x214   : > { %v3982_v3 = vor.u32 %v3980_v53, %v3979_v47  ;;  %v3983_v1 = vrot.slane %v3979_v47, 4  ;;  %v3985_v13 = vshrl.u32 %v7812_v37, 16  ;;  %v3988_v61 = vshll.u32 %v7812_v37, 16  ;;  %4282 = vst [vmem:[#allocation3 + $0xc] sm:$0xf] %v4281_v27 }
 0x215   : > { %v8149_v48 = vpop.f32.mrf.mxu0  ;;  %v3835_v40 = vmax.f32 %v3739_v35, 0.0  ;;  %v3628_v51 = vadd.f32 %v8147_v52, %v3627_v9  ;;  %v4284_v47 = vld [vmem:[#allocation3 + $0x14] sm:$0x1]  ;;  %453 = vst [vmem:[#allocation3 + $0xcc] sm:$0x1] %v452_v57  ;;  %v3975_v35 = vrot.slane %v3970_v54, 4 }
 0x216   : > { %v4288_v8 = vsel %vm9713_vm7, %v3982_v3, %v4287_v14  ;;  %v3987_v7 = vrot.slane %v3985_v13, 7  ;;  %v8150_v56 = vadd.f32 %v8149_v48, %v8148_v39  ;;  %v3973_v14 = vor.u32 %v3971_v30, %v3970_v54  ;;  %v454_v9 = vld [vmem:[#allocation3 + $0x8] sm:$0x1]  ;;  %v3640_v30 = vpop.f32.mrf.mxu1 }
 0x217   : > { %4289 = vst [vmem:[#allocation3 + $0x18] sm:$0xf] %v4288_v8  ;;  %v8151_v43 = vpop.f32.mrf.mxu0  ;;  %v7813_v10 = vpack.c.bf16 %v3835_v40, %v3835_v40  ;;  %v3740_v52 = vadd.f32 %v3628_v51, %v10602_v16  ;;  %v4285_v16 = vsel %vm9680_vm2, %v3975_v35, %v4284_v47  ;;  %v4294_v40 = vld [vmem:[#allocation3 + $0x24] sm:$0xf] }
 0x218   : > { %v3990_v53 = vor.u32 %v3988_v61, %v3987_v7  ;;  %v3992_v37 = vrot.slane %v3987_v7, 4  ;;  %v3633_v38 = vadd.f32 %v8776_v12, %v8150_v56  ;;  %v3974_v61 = vsel %vm9704_vm6, %v3966_v4, %v3973_v14  ;;  %4286 = vst [vmem:[#allocation3 + $0x14] sm:$0x1] %v4285_v16  ;;  %v9204_v4 = vld [vmem:[#allocation3] sm:$0xff]  }
 0x219   : > { %v8152_v3 = vpop.f32.mrf.mxu0  ;;  %v3994_v41 = vshrl.u32 %v7813_v10, 16  ;;  %v3836_v32 = vmax.f32 %v3740_v52, 0.0  ;;  %4283 = vst [vmem:[#allocation3 + $0x10] sm:$0xf] %v3974_v61  ;;  %v3997_v59 = vshll.u32 %v7813_v10, 16  ;;  %v455_v7 = vsel %vm9924_vm8, 0, %v454_v9 }
 0x21a   : > { %v3991_v13 = vsel %vm9704_vm6, %v3983_v1, %v3990_v53  ;;  %v4292_v58 = vsel %vm9680_vm2, %v3992_v37, %v4291_v23  ;;  %v3741_v12 = vadd.f32 %v3633_v38, %v10579_v15  ;;  %v8153_v8 = vadd.f32 %v8152_v3, %v8151_v43  ;;  %456 = vst [vmem:[#allocation3 + $0x8] sm:$0x1] %v455_v7  ;;  %v10781_v53 = vpop.f32.mrf.mxu1  ;;  %v4298_v3 = vld [vmem:[#allocation3 + $0x2c] sm:$0x1] }
 0x21b   : > { %4290 = vst [vmem:[#allocation3 + $0x1c] sm:$0xf] %v3991_v13  ;;  %4293 = vst [vmem:[#allocation3 + $0x20] sm:$0x1] %v4292_v58  ;;  %v8154_v48 = vpop.f32.mrf.mxu0  ;;  %v3996_v1 = vrot.slane %v3994_v41, 7  ;;  %v7814_v51 = vpack.c.bf16 %v3836_v32, %v3836_v32 }
 0x21c   : > { %v3837_v27 = vmax.f32 %v3741_v12, 0.0  ;;  %v3636_v56 = vadd.f32 %v10757_v19, %v8153_v8  ;;  %v4301_v58 = vld [vmem:[#allocation3 + $0x30] sm:$0xf] }
 0x21d   : > { %v8155_v54 = vpop.f32.mrf.mxu0  ;;  %v3999_v23 = vor.u32 %v3997_v59, %v3996_v1  ;;  %v4002_v15 = vshrl.u32 %v7814_v51, 16  ;;  %v4000_v14 = vrot.slane %v3996_v1, 4  ;;  %v4005_v38 = vshll.u32 %v7814_v51, 16  ;;  %v3643_v1 = vpop.f32.mrf.mxu1  ;;  %v9211_v51 = vld [vmem:[#allocation10 + $0x170] sm:$0xff]  }
 0x21e   : > { %v8156_v57 = vadd.f32 %v8155_v54, %v8154_v48  ;;  %v7815_v47 = vpack.c.bf16 %v3837_v27, %v3837_v27  ;;  %v3742_v10 = vadd.f32 %v3636_v56, %v10596_v45 }
 0x21f   : > { %v8157_v37 = vpop.f32.mrf.mxu0  ;;  %v4295_v43 = vsel %vm9713_vm7, %v3999_v23, %v4294_v40  ;;  %v4004_v35 = vrot.slane %v4002_v15, 7  ;;  %v9247_v17 = vld [vmem:[#allocation3 + $0x14] ss:$0 sps:$4 sm:$0x11]  }
 0x220   : > { %v3641_v52 = vadd.f32 %v8156_v57, %v3640_v30  ;;  %4296 = vst [vmem:[#allocation3 + $0x24] sm:$0xf] %v4295_v43  ;;  %v4011_v13 = vshrl.u32 %v7815_v47, 16  ;;  %v3838_v41 = vmax.f32 %v3742_v10, 0.0  ;;  %v4014_v45 = vshll.u32 %v7815_v47, 16  ;;  %v10789_v30 = vld [vmem:[#allocation3 + $0xc] sm:$0xff]  }
 0x221   : > { %v8158_v19 = vpop.f32.mrf.mxu0  ;;  %v4007_v32 = vor.u32 %v4005_v38, %v4004_v35  ;;  %v4009_v12 = vrot.slane %v4004_v35, 4  ;;  %4824 = vmatprep.mubr.bf16.mxu1 %v10789_v30 }
 0x222   : > { %v3743_v9 = vadd.f32 %v3641_v52, %v10620_v2  ;;  %v8159_v61 = vadd.f32 %v8158_v19, %v8157_v37  ;;  %v10787_v16 = vld [vmem:[#allocation3 + $0x18] sm:$0xff]   ;;  %v4013_v48 = vrot.slane %v4011_v13, 7  ;;  %v7816_v8 = vpack.c.bf16 %v3838_v41, %v3838_v41  ;;  %4825 = vmatmul.mubr.bf16.vlgmr.msra.gmra.mxu1 %v9204_v4  ;;  %v11731_v37 = vld [vmem:[#allocation24_spill] sm:$0xff]  ;;  %v10802_v52 = vpop.f32.mrf.mxu1 }
 0x223   : > { %v8160_v59 = vpop.f32.mrf.mxu0  ;;  %8818 = vmatprep.mubr.bf16.mxu0 %v10787_v16  ;;  %v4008_v2 = vsel %vm9704_vm6, %v4000_v14, %v4007_v32  ;;  %v4299_v27 = vsel %vm9680_vm2, %v4009_v12, %v4298_v3  ;;  %8851 = vmatpush3.bf16.msra.mxu1 %v11731_v37  ;;  %v9214_v14 = vld [vmem:[#allocation10 + $0x168] sm:$0xff]  }
 0x224   : > { %v3839_v7 = vmax.f32 %v3743_v9, 0.0  ;;  %v3644_v40 = vadd.f32 %v8159_v61, %v3643_v1  ;;  %v4016_v54 = vor.u32 %v4014_v45, %v4013_v48  ;;  %4297 = vst [vmem:[#allocation3 + $0x28] sm:$0xf] %v4008_v2  ;;  %4300 = vst [vmem:[#allocation3 + $0x2c] sm:$0x1] %v4299_v27  ;;  %v4019_v56 = vshrl.u32 %v7816_v8, 16  ;;  %4832 = vmatprep.mubr.bf16.mxu1 %v10787_v16 }
 0x225   : > { %v8161_v23 = vpop.f32.mrf.mxu0  ;;  %v4022_v38 = vshll.u32 %v7816_v8, 16  ;;  %8852 = vmatprep.subr.bf16.mxu1 %v9211_v51  ;;  %v4017_v4 = vrot.slane %v4013_v48, 4  ;;  %v4308_v45 = vld [vmem:[#allocation3 + $0x3c] sm:$0xf]  ;;  %v9222_v27 = vld [vmem:[#allocation10 + $0xf8] sm:$0xff]  }
 0x226   : > { %v7817_v57 = vpack.c.bf16 %v3839_v7, %v3839_v7  ;;  %v3744_v15 = vadd.f32 %v3644_v40, %v10628_v5  ;;  %v4302_v47 = vsel %vm9713_vm7, %v4016_v54, %v4301_v58  ;;  %v8162_v43 = vadd.f32 %v8161_v23, %v8160_v59  ;;  %v4305_v5 = vld [vmem:[#allocation3 + $0x38] sm:$0x1]  ;;  %v3656_v7 = vpop.f32.mrf.mxu1  ;;  %v9249_v39 = vld [vmem:[#allocation3 + $0x20] ss:$0 sps:$4 sm:$0x11]  }
 0x227   : > { %v8163_v10 = vpop.f32.mrf.mxu0  ;;  %4303 = vst [vmem:[#allocation3 + $0x30] sm:$0xf] %v4302_v47  ;;  %v4021_v35 = vrot.slane %v4019_v56, 7  ;;  %8853 = vmatpush3.bf16.msra.mxu1 %v9211_v51  ;;  %v9224_v51 = vld [vmem:[#allocation10 + $0x130] sm:$0xff]  }
 0x228   : > { %v4028_v3 = vshrl.u32 %v7817_v57, 16  ;;  %v3840_v13 = vmax.f32 %v3744_v15, 0.0  ;;  %v4031_v19 = vshll.u32 %v7817_v57, 16  ;;  %v3649_v58 = vadd.f32 %v10764_v34, %v8162_v43  ;;  %8854 = vmatprep.subr.bf16.mxu1 %v9214_v14  ;;  %v9217_v34 = vld [vmem:[#allocation10 + $0x160] sm:$0xff]  }
 0x229   : > { %v8164_v41 = vpop.f32.mrf.mxu0  ;;  %v4024_v9 = vor.u32 %v4022_v38, %v4021_v35  ;;  %v4026_v61 = vrot.slane %v4021_v35, 4  ;;  %v10817_v38 = vpop.f32.mrf.mxu1 }
 0x22a   : > { %v4030_v32 = vrot.slane %v4028_v3, 7  ;;  %v7818_v12 = vpack.c.bf16 %v3840_v13, %v3840_v13  ;;  %v3745_v1 = vadd.f32 %v3649_v58, %v10611_v0  ;;  %v8165_v59 = vadd.f32 %v8164_v41, %v8163_v10  ;;  %4833 = vmatmul.mubr.bf16.gmra.mxu1 %v10789_v30  ;;  %v4312_v3 = vld [vmem:[#allocation3 + $0x44] sm:$0x1] }
 0x22b   : > { %v8166_v40 = vpop.f32.mrf.mxu0  ;;  %v4025_v8 = vsel %vm9704_vm6, %v4017_v4, %v4024_v9  ;;  %v4306_v48 = vsel %vm9680_vm2, %v4026_v61, %v4305_v5  ;;  %v10811_v57 = vld [vmem:[#allocation3 + $0x24] sm:$0xff]   ;;  %8855 = vmatpush3.bf16.msra.mxu1 %v9214_v14  ;;  %v9220_v9 = vld [vmem:[#allocation10 + $0x158] sm:$0xff]  }
 0x22c   : > { %v4033_v2 = vor.u32 %v4031_v19, %v4030_v32  ;;  %4304 = vst [vmem:[#allocation3 + $0x34] sm:$0xf] %v4025_v8  ;;  %4307 = vst [vmem:[#allocation3 + $0x38] sm:$0x1] %v4306_v48  ;;  %v4036_v54 = vshrl.u32 %v7818_v12, 16  ;;  %v3841_v23 = vmax.f32 %v3745_v1, 0.0  ;;  %v3652_v0 = vadd.f32 %v10781_v53, %v8165_v59  ;;  %4840 = vmatprep.mubr.bf16.mxu1 %v10811_v57 }
 0x22d   : > { %v8167_v56 = vpop.f32.mrf.mxu0  ;;  %v4039_v43 = vshll.u32 %v7818_v12, 16  ;;  %8819 = vmatmul.mubr.bf16.vlgmr.msra.gmra.mxu0 %v10811_v57  ;;  %v9225_v4 = vld [vmem:[#allocation10 + $0xf0] sm:$0xff]   ;;  %v4034_v30 = vrot.slane %v4030_v32, 4  ;;  %8856 = vmatprep.subr.bf16.mxu1 %v9217_v34 }
 0x22e   : > { %v4309_v15 = vsel %vm9713_vm7, %v4033_v2, %v4308_v45  ;;  %v8168_v47 = vadd.f32 %v8167_v56, %v8166_v40  ;;  %v4038_v37 = vrot.slane %v4036_v54, 7  ;;  %v7819_v10 = vpack.c.bf16 %v3841_v23, %v3841_v23  ;;  %8387 = vmatpush3.bf16.msra.mxu0 %v9222_v27  ;;  %v4315_v61 = vld [vmem:[#allocation3 + $0x48] sm:$0xf]  ;;  %v3659_v40 = vpop.f32.mrf.mxu1 }
 0x22f   : > { %4310 = vst [vmem:[#allocation3 + $0x3c] sm:$0xf] %v4309_v15  ;;  %v3746_v35 = vadd.f32 %v3652_v0, %v10624_v25  ;;  %v8169_v53 = vpop.f32.mrf.mxu0  ;;  %8388 = vmatprep.subr.bf16.mxu0 %v9224_v51  ;;  %v9228_v25 = vld [vmem:[#allocation10 + $0x128] sm:$0xff]   ;;  %v9227_v48 = vld [vmem:[#allocation10 + $0x150] sm:$0xff]   ;;  %8857 = vmatpush3.bf16.msra.mxu1 %v9217_v34  ;;  %v9231_v51 = vld [vmem:[#allocation10 + $0x120] sm:$0xff]  }
 0x230   : > { %v3657_v13 = vadd.f32 %v8168_v47, %v3656_v7  ;;  %v4041_v5 = vor.u32 %v4039_v43, %v4038_v37  ;;  %v4043_v19 = vrot.slane %v4038_v37, 4  ;;  %v4045_v58 = vshrl.u32 %v7819_v10, 16  ;;  %8858 = vmatprep.subr.bf16.mxu1 %v9220_v9 }
 0x231   : > { %v8170_v41 = vpop.f32.mrf.mxu0  ;;  %v3842_v12 = vmax.f32 %v3746_v35, 0.0  ;;  %v4048_v7 = vshll.u32 %v7819_v10, 16  ;;  %v4319_v10 = vld [vmem:[#allocation3 + $0x50] sm:$0x1] }
 0x232   : > { %v3747_v45 = vadd.f32 %v3657_v13, %v10644_v49  ;;  %v8171_v1 = vadd.f32 %v8170_v41, %v8169_v53  ;;  %v4042_v59 = vsel %vm9704_vm6, %v4034_v30, %v4041_v5  ;;  %v4313_v14 = vsel %vm9680_vm2, %v4043_v19, %v4312_v3  ;;  %8389 = vmatpush3.bf16.msra.mxu0 %v9225_v4  ;;  %v9229_v49 = vld [vmem:[#allocation10 + $0xe8] sm:$0xff]   ;;  %v10834_v53 = vpop.f32.mrf.mxu1 }
 0x233   : > { %v4047_v32 = vrot.slane %v4045_v58, 7  ;;  %v8172_v8 = vpop.f32.mrf.mxu0  ;;  %4311 = vst [vmem:[#allocation3 + $0x40] sm:$0xf] %v4042_v59  ;;  %4314 = vst [vmem:[#allocation3 + $0x44] sm:$0x1] %v4313_v14  ;;  %v7820_v2 = vpack.c.bf16 %v3842_v12, %v3842_v12  ;;  %v10826_v23 = vld [vmem:[#allocation3 + $0x30] sm:$0xff]   ;;  %8390 = vmatprep.subr.bf16.mxu0 %v9228_v25  ;;  %4841 = vmatmul.mubr.bf16.gmra.mxu1 %v10787_v16 }
 0x234   : > { %v3843_v27 = vmax.f32 %v3747_v45, 0.0  ;;  %v3660_v54 = vadd.f32 %v8171_v1, %v3659_v40  ;;  %8822 = vmatprep.mubr.bf16.mxu0 %v10826_v23  ;;  %4848 = vmatprep.mubr.bf16.mxu1 %v10826_v23  ;;  %v9234_v41 = vld [vmem:[#allocation10 + $0x148] sm:$0xff]   ;;  %v9235_v1 = vld [vmem:[#allocation10 + $0x118] sm:$0xff]  }
 0x235   : > { %v4050_v0 = vor.u32 %v4048_v7, %v4047_v32  ;;  %v8173_v56 = vpop.f32.mrf.mxu0  ;;  %v4053_v15 = vshrl.u32 %v7820_v2, 16  ;;  %v4056_v13 = vshll.u32 %v7820_v2, 16  ;;  %8859 = vmatpush3.bf16.msra.mxu1 %v9220_v9  ;;  %v4051_v16 = vrot.slane %v4047_v32, 4  ;;  %v4322_v59 = vld [vmem:[#allocation3 + $0x54] sm:$0xf]  ;;  %v3672_v9 = vpop.f32.mrf.mxu1 }
 0x236   : > { %v7821_v47 = vpack.c.bf16 %v3843_v27, %v3843_v27  ;;  %v3748_v37 = vadd.f32 %v3660_v54, %v10654_v6  ;;  %v8174_v34 = vadd.f32 %v8173_v56, %v8172_v8  ;;  %8391 = vmatpush3.bf16.msra.mxu0 %v9229_v49  ;;  %v9232_v6 = vld [vmem:[#allocation10 + $0xe0] sm:$0xff]   ;;  %8860 = vmatprep.subr.bf16.mxu1 %v9227_v48  ;;  %v9236_v27 = vld [vmem:[#allocation10 + $0xd8] sm:$0xff]   ;;  %v9238_v56 = vld [vmem:[#allocation10 + $0x110] sm:$0xff]  }
 0x237   : > { %v4316_v43 = vsel %vm9713_vm7, %v4050_v0, %v4315_v61  ;;  %v8175_v35 = vpop.f32.mrf.mxu0  ;;  %v4055_v3 = vrot.slane %v4053_v15, 7  ;;  %8392 = vmatprep.subr.bf16.mxu0 %v9231_v51  ;;  %v9241_v51 = vld [vmem:[#allocation10 + $0x140] sm:$0xff]  }
 0x238   : > { %4317 = vst [vmem:[#allocation3 + $0x48] sm:$0xf] %v4316_v43  ;;  %v4062_v4 = vshrl.u32 %v7821_v47, 16  ;;  %v3844_v30 = vmax.f32 %v3748_v37, 0.0  ;;  %v4065_v5 = vshll.u32 %v7821_v47, 16  ;;  %v3665_v19 = vadd.f32 %v10802_v52, %v8174_v34 }
 0x239   : > { %v8176_v58 = vpop.f32.mrf.mxu0  ;;  %v4058_v25 = vor.u32 %v4056_v13, %v4055_v3  ;;  %v4060_v61 = vrot.slane %v4055_v3, 4  ;;  %8861 = vmatpush3.bf16.msra.mxu1 %v9227_v48  ;;  %v9239_v13 = vld [vmem:[#allocation10 + $0xd0] sm:$0xff]  }
 0x23a   : > { %v4064_v12 = vrot.slane %v4062_v4, 7  ;;  %v7822_v45 = vpack.c.bf16 %v3844_v30, %v3844_v30  ;;  %v3749_v14 = vadd.f32 %v3665_v19, %v10637_v28  ;;  %v8177_v7 = vadd.f32 %v8176_v58, %v8175_v35  ;;  %v10838_v8 = vld [vmem:[#allocation3 + $0x3c] sm:$0xff]   ;;  %8393 = vmatpush3.bf16.msra.mxu0 %v9232_v6  ;;  %8862 = vmatprep.subr.bf16.mxu1 %v9234_v41  ;;  %v9256_v19 = vld [vmem:[#allocation10 + $0x1f8] sm:$0xff]  }
 0x23b   : > { %v8178_v40 = vpop.f32.mrf.mxu0  ;;  %v4059_v52 = vsel %vm9704_vm6, %v4051_v16, %v4058_v25  ;;  %v4320_v32 = vsel %vm9680_vm2, %v4060_v61, %v4319_v10  ;;  %8823 = vmatmul.mubr.bf16.gmra.mxu0 %v10838_v8  ;;  %4849 = vmatmul.mubr.bf16.gmra.mxu1 %v10811_v57  ;;  %v4326_v35 = vld [vmem:[#allocation3 + $0x5c] sm:$0x1] }
 0x23c   : > { %v4067_v2 = vor.u32 %v4065_v5, %v4064_v12  ;;  %4318 = vst [vmem:[#allocation3 + $0x4c] sm:$0xf] %v4059_v52  ;;  %4321 = vst [vmem:[#allocation3 + $0x50] sm:$0x1] %v4320_v32  ;;  %v4070_v54 = vshrl.u32 %v7822_v45, 16  ;;  %v3845_v49 = vmax.f32 %v3749_v14, 0.0  ;;  %v3668_v28 = vadd.f32 %v10817_v38, %v8177_v7  ;;  %8394 = vmatprep.subr.bf16.mxu0 %v9235_v1  ;;  %v10850_v38 = vpop.f32.mrf.mxu1 }
 0x23d   : > { %v8179_v0 = vpop.f32.mrf.mxu0  ;;  %v4073_v37 = vshll.u32 %v7822_v45, 16  ;;  %4856 = vmatprep.mubr.bf16.mxu1 %v10838_v8  ;;  %8863 = vmatpush3.bf16.msra.mxu1 %v9234_v41  ;;  %v4068_v4 = vrot.slane %v4064_v12, 4  ;;  %v9242_v5 = vld [vmem:[#allocation10 + $0x108] sm:$0xff]  }
 0x23e   : > { %v4323_v15 = vsel %vm9713_vm7, %v4067_v2, %v4322_v59  ;;  %v8180_v48 = vadd.f32 %v8179_v0, %v8178_v40  ;;  %v4072_v47 = vrot.slane %v4070_v54, 7  ;;  %v7823_v43 = vpack.c.bf16 %v3845_v49, %v3845_v49  ;;  %8395 = vmatpush3.bf16.msra.mxu0 %v9236_v27  ;;  %8864 = vmatprep.subr.bf16.mxu1 %v9241_v51  ;;  %v9243_v45 = vld [vmem:[#allocation10 + $0xc8] sm:$0xff]   ;;  %v3675_v14 = vpop.f32.mrf.mxu1  ;;  %v9250_v27 = vld [vmem:[#allocation10 + $0x100] sm:$0xff]  }
 0x23f   : > { %4324 = vst [vmem:[#allocation3 + $0x54] sm:$0xf] %v4323_v15  ;;  %v3750_v10 = vadd.f32 %v3668_v28, %v10650_v62  ;;  %v8181_v34 = vpop.f32.mrf.mxu0  ;;  %8396 = vmatprep.subr.bf16.mxu0 %v9238_v56  ;;  %v4329_v62 = vld [vmem:[#allocation3 + $0x60] sm:$0xf]  ;;  %v4333_v56 = vld [vmem:[#allocation3 + $0x68] sm:$0x1] }
 0x240   : > { %v3673_v3 = vadd.f32 %v8180_v48, %v3672_v9  ;;  %v4075_v57 = vor.u32 %v4073_v37, %v4072_v47  ;;  %v4077_v30 = vrot.slane %v4072_v47, 4  ;;  %v4079_v6 = vshrl.u32 %v7823_v43, 16  ;;  %v10866_v48 = vpop.f32.mrf.mxu1 }
 0x241   : > { %v8182_v16 = vpop.f32.mrf.mxu0  ;;  %v3846_v58 = vmax.f32 %v3750_v10, 0.0  ;;  %v4082_v59 = vshll.u32 %v7823_v43, 16  ;;  %8865 = vmatpush3.bf16.msra.mxu1 %v9241_v51 }
 0x242   : > { %v3751_v25 = vadd.f32 %v3673_v3, %v10671_v36  ;;  %v8183_v61 = vadd.f32 %v8182_v16, %v8181_v34  ;;  %v4076_v41 = vsel %vm9704_vm6, %v4068_v4, %v4075_v57  ;;  %v4327_v12 = vsel %vm9680_vm2, %v4077_v30, %v4326_v35  ;;  %8397 = vmatpush3.bf16.msra.mxu0 %v9239_v13  ;;  %v10869_v13 = vld [vmem:[#allocation10 + $0x238] sm:$0xff]   ;;  %v4336_v16 = vld [vmem:[#allocation3 + $0x6c] sm:$0xf] }
 0x243   : > { %v4081_v1 = vrot.slane %v4079_v6, 7  ;;  %v8184_v7 = vpop.f32.mrf.mxu0  ;;  %4325 = vst [vmem:[#allocation3 + $0x58] sm:$0xf] %v4076_v41  ;;  %4328 = vst [vmem:[#allocation3 + $0x5c] sm:$0x1] %v4327_v12  ;;  %v7824_v9 = vpack.c.bf16 %v3846_v58, %v3846_v58  ;;  %v10858_v32 = vld [vmem:[#allocation3 + $0x48] sm:$0xff]   ;;  %8398 = vmatprep.subr.bf16.mxu0 %v9242_v5  ;;  %8522 = vmatprep.subr.bf16.mxu1 %v9256_v19 }
 0x244   : > { %v3847_v40 = vmax.f32 %v3751_v25, 0.0  ;;  %v3676_v52 = vadd.f32 %v8183_v61, %v3675_v14  ;;  %4857 = vmatmul.mubr.bf16.gmra.mxu1 %v10826_v23  ;;  %8826 = vmatprep.mubr.bf16.mxu0 %v10858_v32  ;;  %v9251_v23 = vld [vmem:[#allocation10 + $0xc0] sm:$0xff]  }
 0x245   : > { %v4084_v36 = vor.u32 %v4082_v59, %v4081_v1  ;;  %v8185_v2 = vpop.f32.mrf.mxu0  ;;  %v4087_v54 = vshrl.u32 %v7824_v9, 16  ;;  %4864 = vmatprep.mubr.bf16.mxu1 %v10858_v32  ;;  %v4090_v37 = vshll.u32 %v7824_v9, 16 }
 0x246   : > { %v7825_v49 = vpack.c.bf16 %v3847_v40, %v3847_v40  ;;  %v3752_v28 = vadd.f32 %v3676_v52, %v10678_v26  ;;  %v8186_v15 = vadd.f32 %v8185_v2, %v8184_v7  ;;  %8399 = vmatpush3.bf16.msra.mxu0 %v9243_v45  ;;  %v4085_v26 = vrot.slane %v4081_v1, 4  ;;  %v4340_v2 = vld [vmem:[#allocation3 + $0x74] sm:$0x1] }
 0x247   : > { %v4330_v0 = vsel %vm9713_vm7, %v4084_v36, %v4329_v62  ;;  %v8187_v51 = vpop.f32.mrf.mxu0  ;;  %v4089_v47 = vrot.slane %v4087_v54, 7  ;;  %8400 = vmatprep.subr.bf16.mxu0 %v9250_v27  ;;  %v3688_v62 = vpop.f32.mrf.mxu1 }
 0x248   : > { %4331 = vst [vmem:[#allocation3 + $0x60] sm:$0xf] %v4330_v0  ;;  %v4096_v43 = vshrl.u32 %v7825_v49, 16  ;;  %v3848_v10 = vmax.f32 %v3752_v28, 0.0  ;;  %v4099_v34 = vshll.u32 %v7825_v49, 16  ;;  %v3681_v35 = vadd.f32 %v10834_v53, %v8186_v15 }
 0x249   : > { %v8188_v3 = vpop.f32.mrf.mxu0  ;;  %v4092_v4 = vor.u32 %v4090_v37, %v4089_v47  ;;  %v4094_v57 = vrot.slane %v4089_v47, 4  ;;  %v10885_v36 = vpop.f32.mrf.mxu1 }
 0x24a   : > { %v4098_v30 = vrot.slane %v4096_v43, 7  ;;  %v7826_v6 = vpack.c.bf16 %v3848_v10, %v3848_v10  ;;  %v3753_v5 = vadd.f32 %v3681_v35, %v10662_v22  ;;  %v8189_v19 = vadd.f32 %v8188_v3, %v8187_v51  ;;  %v10872_v25 = vld [vmem:[#allocation3 + $0x54] sm:$0xff]   ;;  %8401 = vmatpush3.bf16.msra.mxu0 %v9251_v23 }
 0x24b   : > { %v8190_v58 = vpop.f32.mrf.mxu0  ;;  %v4093_v61 = vsel %vm9704_vm6, %v4085_v26, %v4092_v4  ;;  %v4334_v53 = vsel %vm9680_vm2, %v4094_v57, %v4333_v56  ;;  %8827 = vmatmul.mubr.bf16.gmra.mxu0 %v10872_v25  ;;  %8898 = vmatprep.subr.bf16.mxu0 %v10869_v13  ;;  %v3691_v23 = vpop.f32.mrf.mxu1 }
 0x24c   : > { %v4101_v45 = vor.u32 %v4099_v34, %v4098_v30  ;;  %4332 = vst [vmem:[#allocation3 + $0x64] sm:$0xf] %v4093_v61  ;;  %4335 = vst [vmem:[#allocation3 + $0x68] sm:$0x1] %v4334_v53  ;;  %v4104_v41 = vshrl.u32 %v7826_v6, 16  ;;  %v3849_v12 = vmax.f32 %v3753_v5, 0.0  ;;  %v3684_v1 = vadd.f32 %v10850_v38, %v8189_v19  ;;  %4865 = vmatmul.mubr.bf16.gmra.mxu1 %v10838_v8 }
 0x24d   : > { %v8191_v22 = vpop.f32.mrf.mxu0  ;;  %v4107_v9 = vshll.u32 %v7826_v6, 16  ;;  %4872 = vmatprep.mubr.bf16.mxu1 %v10872_v25  ;;  %v4102_v54 = vrot.slane %v4098_v30, 4  ;;  %v4343_v8 = vld [vmem:[#allocation3 + $0x78] sm:$0xf] }
 0x24e   : > { %v4337_v59 = vsel %vm9713_vm7, %v4101_v45, %v4336_v16  ;;  %v8192_v14 = vadd.f32 %v8191_v22, %v8190_v58  ;;  %v4106_v7 = vrot.slane %v4104_v41, 7  ;;  %v7827_v40 = vpack.c.bf16 %v3849_v12, %v3849_v12  ;;  %v10901_v58 = vpop.f32.mrf.mxu1 }
 0x24f   : > { %4338 = vst [vmem:[#allocation3 + $0x6c] sm:$0xf] %v4337_v59  ;;  %v3754_v52 = vadd.f32 %v3684_v1, %v10675_v44  ;;  %v8193_v38 = vpop.f32.mrf.mxu0 }
 0x250   : > { %v3689_v27 = vadd.f32 %v8192_v14, %v3688_v62  ;;  %v4109_v49 = vor.u32 %v4107_v9, %v4106_v7  ;;  %v4111_v28 = vrot.slane %v4106_v7, 4  ;;  %v4113_v0 = vshrl.u32 %v7827_v40, 16 }
 0x251   : > { %v8194_v56 = vpop.f32.mrf.mxu0  ;;  %v3850_v15 = vmax.f32 %v3754_v52, 0.0  ;;  %v4116_v10 = vshll.u32 %v7827_v40, 16  ;;  %v4350_v40 = vld [vmem:[#allocation3 + $0x84] sm:$0xf] }
 0x252   : > { %v3755_v51 = vadd.f32 %v3689_v27, %v10690_v46  ;;  %v8195_v47 = vadd.f32 %v8194_v56, %v8193_v38  ;;  %v4110_v44 = vsel %vm9704_vm6, %v4102_v54, %v4109_v49  ;;  %v4341_v37 = vsel %vm9680_vm2, %v4111_v28, %v4340_v2  ;;  %v3704_v2 = vpop.f32.mrf.mxu1 }
 0x253   : > { %v4115_v43 = vrot.slane %v4113_v0, 7  ;;  %v8196_v26 = vpop.f32.mrf.mxu0  ;;  %4339 = vst [vmem:[#allocation3 + $0x70] sm:$0xf] %v4110_v44  ;;  %4342 = vst [vmem:[#allocation3 + $0x74] sm:$0x1] %v4341_v37  ;;  %v7828_v34 = vpack.c.bf16 %v3850_v15, %v3850_v15  ;;  %v10893_v4 = vld [vmem:[#allocation3 + $0x60] sm:$0xff]  }
 0x254   : > { %v3851_v35 = vmax.f32 %v3755_v51, 0.0  ;;  %v3692_v3 = vadd.f32 %v8195_v47, %v3691_v23  ;;  %4873 = vmatmul.mubr.bf16.gmra.mxu1 %v10858_v32  ;;  %8830 = vmatprep.mubr.bf16.mxu0 %v10893_v4  ;;  %v4347_v32 = vld [vmem:[#allocation3 + $0x80] sm:$0x1]  ;;  %v4354_v47 = vld [vmem:[#allocation3 + $0x8c] sm:$0x1] }
 0x255   : > { %v4118_v57 = vor.u32 %v4116_v10, %v4115_v43  ;;  %v8197_v46 = vpop.f32.mrf.mxu0  ;;  %v4121_v30 = vshrl.u32 %v7828_v34, 16  ;;  %4880 = vmatprep.mubr.bf16.mxu1 %v10893_v4  ;;  %v4124_v53 = vshll.u32 %v7828_v34, 16  ;;  %v4119_v12 = vrot.slane %v4115_v43, 4 }
 0x256   : > { %v7829_v6 = vpack.c.bf16 %v3851_v35, %v3851_v35  ;;  %v3756_v16 = vadd.f32 %v3692_v3, %v10701_v63  ;;  %v8198_v19 = vadd.f32 %v8197_v46, %v8196_v26  ;;  %v10917_v26 = vpop.f32.mrf.mxu1 }
 0x257   : > { %v4344_v5 = vsel %vm9713_vm7, %v4118_v57, %v4343_v8  ;;  %v8199_v62 = vpop.f32.mrf.mxu0  ;;  %v4123_v61 = vrot.slane %v4121_v30, 7 }
 0x258   : > { %4345 = vst [vmem:[#allocation3 + $0x78] sm:$0xf] %v4344_v5  ;;  %v4130_v45 = vshrl.u32 %v7829_v6, 16  ;;  %v3852_v41 = vmax.f32 %v3756_v16, 0.0  ;;  %v4133_v1 = vshll.u32 %v7829_v6, 16  ;;  %v3697_v63 = vadd.f32 %v10866_v48, %v8198_v19 }
 0x259   : > { %v8200_v22 = vpop.f32.mrf.mxu0  ;;  %v4126_v59 = vor.u32 %v4124_v53, %v4123_v61  ;;  %v4128_v14 = vrot.slane %v4123_v61, 4  ;;  %v3707_v53 = vpop.f32.mrf.mxu1 }
 0x25a   : > { %v4132_v7 = vrot.slane %v4130_v45, 7  ;;  %v7830_v9 = vpack.c.bf16 %v3852_v41, %v3852_v41  ;;  %v3757_v52 = vadd.f32 %v3697_v63, %v10688_v21  ;;  %v8201_v38 = vadd.f32 %v8200_v22, %v8199_v62  ;;  %v10905_v54 = vld [vmem:[#allocation3 + $0x6c] sm:$0xff]   ;;  %v505_v21 = vld [vmem:[#allocation3 + $0xd4] sm:$0x1] }
 0x25b   : > { %v8202_v27 = vpop.f32.mrf.mxu0  ;;  %v4127_v49 = vsel %vm9704_vm6, %v4119_v12, %v4126_v59  ;;  %v4348_v28 = vsel %vm9680_vm2, %v4128_v14, %v4347_v32  ;;  %8831 = vmatmul.mubr.bf16.gmra.mxu0 %v10905_v54  ;;  %v506_v35 = vsel %vm9924_vm8, 0, %v505_v21 }
 0x25c   : > { %v4135_v48 = vor.u32 %v4133_v1, %v4132_v7  ;;  %4346 = vst [vmem:[#allocation3 + $0x7c] sm:$0xf] %v4127_v49  ;;  %4349 = vst [vmem:[#allocation3 + $0x80] sm:$0x1] %v4348_v28  ;;  %v4138_v0 = vshrl.u32 %v7830_v9, 16  ;;  %v3853_v56 = vmax.f32 %v3757_v52, 0.0  ;;  %v3700_v8 = vadd.f32 %v10885_v36, %v8201_v38  ;;  %4881 = vmatmul.mubr.bf16.gmra.mxu1 %v10872_v25  ;;  %v10935_v52 = vpop.f32.mrf.mxu1 }
 0x25d   : > { %v8203_v15 = vpop.f32.mrf.mxu0  ;;  %v4141_v43 = vshll.u32 %v7830_v9, 16  ;;  %4888 = vmatprep.mubr.bf16.mxu1 %v10905_v54  ;;  %v4136_v3 = vrot.slane %v4132_v7, 4  ;;  %507 = vst [vmem:[#allocation3 + $0xd4] sm:$0x1] %v506_v35 }
 0x25e   : > { %v4351_v51 = vsel %vm9713_vm7, %v4135_v48, %v4350_v40  ;;  %v8204_v44 = vadd.f32 %v8203_v15, %v8202_v27  ;;  %v4140_v37 = vrot.slane %v4138_v0, 7  ;;  %v7831_v10 = vpack.c.bf16 %v3853_v56, %v3853_v56 }
 0x25f   : > { %4352 = vst [vmem:[#allocation3 + $0x84] sm:$0xf] %v4351_v51  ;;  %v3758_v23 = vadd.f32 %v3700_v8, %v10698_v55  ;;  %v8205_v36 = vpop.f32.mrf.mxu0  ;;  %v4364_v51 = vld [vmem:[#allocation3 + $0x9c] sm:$0xf] }
 0x260   : > { %v3705_v34 = vadd.f32 %v8204_v44, %v3704_v2  ;;  %v4143_v57 = vor.u32 %v4141_v43, %v4140_v37  ;;  %v4145_v46 = vrot.slane %v4140_v37, 4  ;;  %v4147_v25 = vshrl.u32 %v7831_v10, 16  ;;  %v3720_v37 = vpop.f32.mrf.mxu1 }
 0x261   : > { %v8206_v30 = vpop.f32.mrf.mxu0  ;;  %v3854_v6 = vmax.f32 %v3758_v23, 0.0  ;;  %v4150_v61 = vshll.u32 %v7831_v10, 16 }
 0x262   : > { %v3759_v16 = vadd.f32 %v3705_v34, %v10708_v42  ;;  %v8207_v5 = vadd.f32 %v8206_v30, %v8205_v36  ;;  %v4144_v55 = vsel %vm9704_vm6, %v4136_v3, %v4143_v57  ;;  %v4355_v19 = vsel %vm9680_vm2, %v4145_v46, %v4354_v47 }
 0x263   : > { %v4149_v62 = vrot.slane %v4147_v25, 7  ;;  %v8208_v45 = vpop.f32.mrf.mxu0  ;;  %4353 = vst [vmem:[#allocation3 + $0x88] sm:$0xf] %v4144_v55  ;;  %4356 = vst [vmem:[#allocation3 + $0x8c] sm:$0x1] %v4355_v19  ;;  %v7832_v41 = vpack.c.bf16 %v3854_v6, %v3854_v6  ;;  %v10927_v1 = vld [vmem:[#allocation3 + $0x78] sm:$0xff]  }
 0x264   : > { %v3855_v12 = vmax.f32 %v3759_v16, 0.0  ;;  %v3708_v32 = vadd.f32 %v8207_v5, %v3707_v53  ;;  %4889 = vmatmul.mubr.bf16.gmra.mxu1 %v10893_v4  ;;  %8834 = vmatprep.mubr.bf16.mxu0 %v10927_v1  ;;  %v4361_v4 = vld [vmem:[#allocation3 + $0x98] sm:$0x1]  ;;  %v8801_v5 = vpop.f32.mrf.mxu1 }
 0x265   : > { %v4152_v42 = vor.u32 %v4150_v61, %v4149_v62  ;;  %v8209_v63 = vpop.f32.mrf.mxu0  ;;  %v4155_v22 = vshrl.u32 %v7832_v41, 16  ;;  %4896 = vmatprep.mubr.bf16.mxu1 %v10927_v1  ;;  %v4158_v2 = vshll.u32 %v7832_v41, 16  ;;  %v4153_v28 = vrot.slane %v4149_v62, 4 }
 0x266   : > { %v7833_v59 = vpack.c.bf16 %v3855_v12, %v3855_v12  ;;  %v3760_v14 = vadd.f32 %v3708_v32, %v10715_v60  ;;  %v8210_v9 = vadd.f32 %v8209_v63, %v8208_v45 }
 0x267   : > { %v4358_v7 = vsel %vm9713_vm7, %v4152_v42, %v4357_v31  ;;  %v8211_v40 = vpop.f32.mrf.mxu0  ;;  %v4157_v38 = vrot.slane %v4155_v22, 7  ;;  %v4371_v22 = vld [vmem:[#allocation3 + $0xa8] sm:$0xf] }
 0x268   : > { %4359 = vst [vmem:[#allocation3 + $0x90] sm:$0xf] %v4358_v7  ;;  %v4164_v27 = vshrl.u32 %v7833_v59, 16  ;;  %v3856_v49 = vmax.f32 %v3760_v14, 0.0  ;;  %v4167_v48 = vshll.u32 %v7833_v59, 16  ;;  %v3713_v60 = vadd.f32 %v10901_v58, %v8210_v9  ;;  %v3723_v59 = vpop.f32.mrf.mxu1 }
 0x269   : > { %v8212_v0 = vpop.f32.mrf.mxu0  ;;  %v4160_v56 = vor.u32 %v4158_v2, %v4157_v38  ;;  %v4162_v8 = vrot.slane %v4157_v38, 4 }
 0x26a   : > { %v4166_v15 = vrot.slane %v4164_v27, 7  ;;  %v7834_v21 = vpack.c.bf16 %v3856_v49, %v3856_v49  ;;  %v3761_v47 = vadd.f32 %v3713_v60, %v10717_v50  ;;  %v8213_v44 = vadd.f32 %v8212_v0, %v8211_v40  ;;  %v10939_v10 = vld [vmem:[#allocation3 + $0x84] sm:$0xff]  }
 0x26b   : > { %v8214_v43 = vpop.f32.mrf.mxu0  ;;  %v4161_v23 = vsel %vm9704_vm6, %v4153_v28, %v4160_v56  ;;  %v4362_v36 = vsel %vm9680_vm2, %v4162_v8, %v4361_v4  ;;  %8835 = vmatmul.mubr.bf16.gmra.mxu0 %v10939_v10 }
 0x26c   : > { %v4169_v58 = vor.u32 %v4167_v48, %v4166_v15  ;;  %4360 = vst [vmem:[#allocation3 + $0x94] sm:$0xf] %v4161_v23  ;;  %4363 = vst [vmem:[#allocation3 + $0x98] sm:$0x1] %v4362_v36  ;;  %v4172_v34 = vshrl.u32 %v7834_v21, 16  ;;  %v3857_v35 = vmax.f32 %v3761_v47, 0.0  ;;  %v3716_v3 = vadd.f32 %v10917_v26, %v8213_v44  ;;  %4897 = vmatmul.mubr.bf16.gmra.mxu1 %v10905_v54 }
 0x26d   : > { %v8215_v57 = vpop.f32.mrf.mxu0  ;;  %v4175_v30 = vshll.u32 %v7834_v21, 16  ;;  %4904 = vmatprep.mubr.bf16.mxu1 %v10939_v10  ;;  %v4368_v26 = vld [vmem:[#allocation3 + $0xa4] sm:$0x1]  ;;  %v4170_v62 = vrot.slane %v4166_v15, 4  ;;  %v4378_v36 = vld [vmem:[#allocation3 + $0xb4] sm:$0xf] }
 0x26e   : > { %v4365_v50 = vsel %vm9713_vm7, %v4169_v58, %v4364_v51  ;;  %v8216_v46 = vadd.f32 %v8215_v57, %v8214_v43  ;;  %v4174_v25 = vrot.slane %v4172_v34, 7  ;;  %v7835_v6 = vpack.c.bf16 %v3857_v35, %v3857_v35  ;;  %v4375_v51 = vld [vmem:[#allocation3 + $0xb0] sm:$0x1] }
 0x26f   : > { %4366 = vst [vmem:[#allocation3 + $0x9c] sm:$0xf] %v4365_v50  ;;  %v3762_v16 = vadd.f32 %v3716_v3, %v10725_v29  ;;  %v8217_v55 = vpop.f32.mrf.mxu0 }
 0x270   : > { %v3721_v19 = vadd.f32 %v8216_v46, %v3720_v37  ;;  %v4177_v61 = vor.u32 %v4175_v30, %v4174_v25  ;;  %v4179_v31 = vrot.slane %v4174_v25, 4  ;;  %v4181_v53 = vshrl.u32 %v7835_v6, 16 }
 0x271   : > { %v8218_v45 = vpop.f32.mrf.mxu0  ;;  %v3858_v41 = vmax.f32 %v3762_v16, 0.0  ;;  %v4184_v63 = vshll.u32 %v7835_v6, 16 }
 0x272   : > { %v3763_v54 = vadd.f32 %v3721_v19, %v10732_v20  ;;  %v8219_v12 = vadd.f32 %v8218_v45, %v8217_v55  ;;  %v4178_v32 = vsel %vm9704_vm6, %v4170_v62, %v4177_v61  ;;  %v4369_v29 = vsel %vm9680_vm2, %v4179_v31, %v4368_v26  ;;  %v4382_v26 = vld [vmem:[#allocation3 + $0xbc] sm:$0x1] }
 0x273   : > { %v4183_v42 = vrot.slane %v4181_v53, 7  ;;  %v8220_v14 = vpop.f32.mrf.mxu0  ;;  %4367 = vst [vmem:[#allocation3 + $0xa0] sm:$0xf] %v4178_v32  ;;  %4370 = vst [vmem:[#allocation3 + $0xa4] sm:$0x1] %v4369_v29  ;;  %v7836_v7 = vpack.c.bf16 %v3858_v41, %v3858_v41  ;;  %v10957_v38 = vld [vmem:[#allocation3 + $0x90] sm:$0xff]  }
 0x274   : > { %v3859_v9 = vmax.f32 %v3763_v54, 0.0  ;;  %v3724_v40 = vadd.f32 %v8219_v12, %v3723_v59  ;;  %4905 = vmatmul.mubr.bf16.gmra.mxu1 %v10927_v1  ;;  %8838 = vmatprep.mubr.bf16.mxu0 %v10957_v38  ;;  %v4385_v54 = vld [vmem:[#allocation3 + $0xc0] sm:$0xf] }
 0x275   : > { %v4186_v20 = vor.u32 %v4184_v63, %v4183_v42  ;;  %v8221_v2 = vpop.f32.mrf.mxu0  ;;  %v4189_v27 = vshrl.u32 %v7836_v7, 16  ;;  %4912 = vmatprep.mubr.bf16.mxu1 %v10957_v38  ;;  %v4192_v56 = vshll.u32 %v7836_v7, 16  ;;  %v4187_v21 = vrot.slane %v4183_v42, 4  ;;  %v9246_v63 = vld [vmem:[#allocation3 + $0xc] sm:$0xff]   ;;  %v9252_v7 = vld [vmem:[#allocation3] sm:$0xff]  }
 0x276   : > { %v7837_v49 = vpack.c.bf16 %v3859_v9, %v3859_v9  ;;  %v3764_v28 = vadd.f32 %v3724_v40, %v10739_v24  ;;  %v8222_v48 = vadd.f32 %v8221_v2, %v8220_v14  ;;  %v4389_v14 = vld [vmem:[#allocation3 + $0xc8] sm:$0x1] }
 0x277   : > { %v4372_v4 = vsel %vm9713_vm7, %v4186_v20, %v4371_v22  ;;  %v8223_v60 = vpop.f32.mrf.mxu0  ;;  %v4191_v0 = vrot.slane %v4189_v27, 7  ;;  %v5391_v27 = vshll.u32 %v9246_v63, 16 }
 0x278   : > { %4373 = vst [vmem:[#allocation3 + $0xa8] sm:$0xf] %v4372_v4  ;;  %v4198_v8 = vshrl.u32 %v7837_v49, 16  ;;  %v3860_v15 = vmax.f32 %v3764_v28, 0.0  ;;  %v4201_v47 = vshll.u32 %v7837_v49, 16  ;;  %v3729_v1 = vadd.f32 %v10935_v52, %v8222_v48  ;;  %v9248_v28 = vld [vmem:[#allocation3 + $0x18] sm:$0xff]  }
 0x279   : > { %v8224_v24 = vpop.f32.mrf.mxu0  ;;  %v4194_v44 = vor.u32 %v4192_v56, %v4191_v0  ;;  %v4196_v37 = vrot.slane %v4191_v0, 4  ;;  %v5393_v4 = vrot.slane %v5391_v27, 1  ;;  %v5379_v48 = vshll.u32 %v9252_v7, 16  ;;  %v9266_v27 = vld [vmem:[#allocation10 + $0x1b0] sm:$0xff]  }
 0x27a   : > { %v4200_v43 = vrot.slane %v4198_v8, 7  ;;  %v7838_v23 = vpack.c.bf16 %v3860_v15, %v3860_v15  ;;  %v3765_v58 = vadd.f32 %v3729_v1, %v10743_v11  ;;  %v8225_v34 = vadd.f32 %v8224_v24, %v8223_v60  ;;  %v9233_v35 = vld [vmem:[#allocation3 + $0x9c] sm:$0xff]   ;;  %v9253_v60 = vld [vmem:[#allocation3 + $0x8] ss:$0 sps:$4 sm:$0x11]   ;;  %v9245_v15 = vld [vmem:[#allocation3 + $0xcc] sm:$0xff]  }
 0x27b   : > { %v4195_v3 = vsel %vm9704_vm6, %v4187_v21, %v4194_v44  ;;  %v4376_v57 = vsel %vm9680_vm2, %v4196_v37, %v4375_v51  ;;  %8839 = vmatmul.mubr.bf16.gmra.mxu0 %v9233_v35  ;;  %v5389_v0 = vshrl.u32 %v9246_v63, 16  ;;  %v5396_v56 = vshll.u32 %v9247_v17, 16  ;;  %v9254_v44 = vld [vmem:[#allocation3 + $0x24] sm:$0xff]   ;;  %v9265_v63 = vld [vmem:[#allocation3 + $0x50] ss:$0 sps:$4 sm:$0x11]  }
 0x27c   : > { %v4203_v50 = vor.u32 %v4201_v47, %v4200_v43  ;;  %4374 = vst [vmem:[#allocation3 + $0xac] sm:$0xf] %v4195_v3  ;;  %4377 = vst [vmem:[#allocation3 + $0xb0] sm:$0x1] %v4376_v57  ;;  %v4206_v52 = vshrl.u32 %v7838_v23, 16  ;;  %v3861_v46 = vmax.f32 %v3765_v58, 0.0  ;;  %v3732_v25 = vadd.f32 %v8801_v5, %v8225_v34  ;;  %4913 = vmatmul.mubr.bf16.gmra.mxu1 %v10939_v10 }
 0x27d   : > { %v4209_v6 = vshll.u32 %v7838_v23, 16  ;;  %4920 = vmatprep.mubr.bf16.mxu1 %v9233_v35  ;;  %v4204_v19 = vrot.slane %v4200_v43, 4  ;;  %v5403_v8 = vshll.u32 %v9248_v28, 16  ;;  %v5394_v21 = vor.u32 %v5393_v4, %v5389_v0  ;;  %v9257_v43 = vld [vmem:[#allocation3 + $0x30] sm:$0xff]   ;;  %v9269_v17 = vld [vmem:[#allocation10 + $0x1e8] sm:$0xff]  }
 0x27e   : > { %v4379_v30 = vsel %vm9713_vm7, %v4203_v50, %v4378_v36  ;;  %v4208_v11 = vrot.slane %v4206_v52, 7  ;;  %v7839_v16 = vpack.c.bf16 %v3861_v46, %v3861_v46  ;;  %v3766_v55 = vadd.f32 %v3732_v25, %v10749_v33  ;;  %v9255_v3 = vld [vmem:[#allocation3 + $0x2c] ss:$0 sps:$4 sm:$0x11]   ;;  %v9310_v0 = vld [vmem:[#allocation10 + $0x218] sm:$0xff]  }
 0x27f   : > { %4380 = vst [vmem:[#allocation3 + $0xb4] sm:$0xf] %v4379_v30  ;;  %v5377_v51 = vshrl.u32 %v9252_v7, 16  ;;  %v5381_v47 = vrot.slane %v5379_v48, 1  ;;  %v5384_v1 = vshll.u32 %v9253_v60, 16  ;;  %v5398_v24 = vrot.slane %v5396_v56, 1 }
 0x280   : > { %v4211_v62 = vor.u32 %v4209_v6, %v4208_v11  ;;  %v4213_v61 = vrot.slane %v4208_v11, 4  ;;  %v4215_v31 = vshrl.u32 %v7839_v16, 16  ;;  %v3862_v53 = vmax.f32 %v3766_v55, 0.0  ;;  %v9258_v25 = vld [vmem:[#allocation3 + $0x38] ss:$0 sps:$4 sm:$0x11]  }
 0x281   : > { %v4218_v41 = vshll.u32 %v7839_v16, 16  ;;  %v5405_v37 = vrot.slane %v5403_v8, 1  ;;  %v5399_v23 = vsel %vm2071_vm9, %v5394_v21, %v5398_v24  ;;  %v5408_v36 = vshll.u32 %v9249_v39, 16  ;;  %v9261_v6 = vld [vmem:[#allocation3 + $0x3c] sm:$0xff]   ;;  %v9273_v16 = vld [vmem:[#allocation10 + $0x230] sm:$0xff]  }
 0x282   : > { %v4212_v5 = vsel %vm9704_vm6, %v4204_v19, %v4211_v62  ;;  %v4383_v45 = vsel %vm9680_vm2, %v4213_v61, %v4382_v26  ;;  %v4217_v10 = vrot.slane %v4215_v31, 7  ;;  %v7840_v12 = vpack.c.bf16 %v3862_v53, %v3862_v53  ;;  %v9264_v19 = vld [vmem:[#allocation3 + $0x48] sm:$0xff]   ;;  %v9268_v8 = vld [vmem:[#allocation3 + $0x5c] ss:$0 sps:$4 sm:$0x11]  }
 0x283   : > { %4381 = vst [vmem:[#allocation3 + $0xb8] sm:$0xf] %v4212_v5  ;;  %4384 = vst [vmem:[#allocation3 + $0xbc] sm:$0x1] %v4383_v45  ;;  %v9237_v33 = vld [vmem:[#allocation3 + $0xa8] sm:$0xff]   ;;  %v5401_v58 = vshrl.u32 %v9248_v28, 16  ;;  %v5382_v34 = vor.u32 %v5381_v47, %v5377_v51 }
 0x284   : > { %v4220_v32 = vor.u32 %v4218_v41, %v4217_v10  ;;  %v4223_v29 = vshrl.u32 %v7840_v12, 16  ;;  %4921 = vmatmul.mubr.bf16.gmra.mxu1 %v10957_v38  ;;  %8842 = vmatprep.mubr.bf16.mxu0 %v9237_v33  ;;  %v4226_v59 = vshll.u32 %v7840_v12, 16  ;;  %v4221_v9 = vrot.slane %v4217_v10, 4  ;;  %v9286_v10 = vld [vmem:[#allocation10 + $0x228] sm:$0xff]   ;;  %v9276_v51 = vld [vmem:[#allocation10 + $0x1e0] sm:$0xff]  }
 0x285   : > { %4928 = vmatprep.mubr.bf16.mxu1 %v9237_v33  ;;  %v5415_v57 = vshll.u32 %v9254_v44, 16  ;;  %v5406_v50 = vor.u32 %v5405_v37, %v5401_v58  ;;  %v5427_v52 = vshll.u32 %v9257_v43, 16  ;;  %v5410_v46 = vrot.slane %v5408_v36, 1  ;;  %v9271_v39 = vld [vmem:[#allocation3 + $0x68] ss:$0 sps:$4 sm:$0x11]  }
 0x286   : > { %v4386_v42 = vsel %vm9713_vm7, %v4220_v32, %v4385_v54  ;;  %v4225_v22 = vrot.slane %v4223_v29, 7  ;;  %v5413_v62 = vshrl.u32 %v9254_v44, 16  ;;  %v5420_v61 = vshll.u32 %v9255_v3, 16  ;;  %v9262_v32 = vld [vmem:[#allocation3 + $0x44] ss:$0 sps:$4 sm:$0x11]  }
 0x287   : > { %4387 = vst [vmem:[#allocation3 + $0xc0] sm:$0xf] %v4386_v42  ;;  %v5417_v11 = vrot.slane %v5415_v57, 1  ;;  %v10989_v55 = vsel %vm2071_vm9, %v5406_v50, %v5410_v46  ;;  %v5429_v26 = vrot.slane %v5427_v52, 1  ;;  %v5425_v31 = vshrl.u32 %v9257_v43, 16  ;;  %v9263_v42 = vld [vmem:[#allocation10 + $0x1f0] sm:$0xff]  }
 0x288   : > { %v4228_v40 = vor.u32 %v4226_v59, %v4225_v22  ;;  %v4230_v20 = vrot.slane %v4225_v22, 4  ;;  %v5432_v53 = vshll.u32 %v9258_v25, 16  ;;  %v5439_v45 = vshll.u32 %v9261_v6, 16  ;;  %v9277_v37 = vld [vmem:[#allocation3 + $0x78] sm:$0xff]   ;;  %v9315_v43 = vld [vmem:[#allocation10 + $0x210] sm:$0xff]   ;;  %v9282_v3 = vld [vmem:[#allocation10 + $0x1d8] sm:$0xff]  }
 0x289   : > { %v5418_v5 = vor.u32 %v5417_v11, %v5413_v62  ;;  %v5430_v41 = vor.u32 %v5429_v26, %v5425_v31  ;;  %v5451_v54 = vshll.u32 %v9264_v19, 16  ;;  %v5422_v12 = vrot.slane %v5420_v61, 1  ;;  %v9279_v58 = vld [vmem:[#allocation10 + $0x1a0] sm:$0xff]   ;;  %v9320_v25 = vld [vmem:[#allocation10 + $0x208] sm:$0xff]  }
 0x28a   : > { %v9240_v2 = vld [vmem:[#allocation3 + $0xb4] sm:$0xff]   ;;  %v4229_v49 = vsel %vm9704_vm6, %v4221_v9, %v4228_v40  ;;  %v4390_v38 = vsel %vm9680_vm2, %v4230_v20, %v4389_v14  ;;  %v5434_v29 = vrot.slane %v5432_v53, 1  ;;  %v5441_v59 = vrot.slane %v5439_v45, 1  ;;  %v9270_v9 = vld [vmem:[#allocation3 + $0x60] sm:$0xff]  }
 0x28b   : > { %4388 = vst [vmem:[#allocation3 + $0xc4] sm:$0xf] %v4229_v49  ;;  %4391 = vst [vmem:[#allocation3 + $0xc8] sm:$0x1] %v4390_v38  ;;  %8843 = vmatmul.mubr.bf16.gmra.mxu0 %v9240_v2  ;;  %v10995_v22 = vsel %vm2071_vm9, %v5418_v5, %v5422_v12  ;;  %v9267_v14 = vld [vmem:[#allocation3 + $0x54] sm:$0xff]   ;;  %v5453_v7 = vrot.slane %v5451_v54, 1 }
 0x28c   : > { %4929 = vmatmul.mubr.bf16.gmra.mxu1 %v9233_v35  ;;  %v5386_v35 = vrot.slane %v5384_v1, 1  ;;  %v9299_v40 = vld [vmem:[#allocation10 + $0x220] sm:$0xff]   ;;  %v5437_v20 = vshrl.u32 %v9261_v6, 16  ;;  %v5449_v49 = vshrl.u32 %v9264_v19, 16  ;;  %v5456_v38 = vshll.u32 %v9265_v63, 16  ;;  %v9274_v1 = vld [vmem:[#allocation3 + $0x6c] sm:$0xff]  }
 0x28d   : > { %4936 = vmatprep.mubr.bf16.mxu1 %v9240_v2  ;;  %v5463_v4 = vshll.u32 %v9267_v14, 16  ;;  %v5475_v60 = vshll.u32 %v9270_v9, 16  ;;  %v5468_v36 = vshll.u32 %v9268_v8, 16  ;;  %v5487_v50 = vshll.u32 %v9274_v1, 16  ;;  %v9285_v6 = vld [vmem:[#allocation10 + $0x198] sm:$0xff]   ;;  %v9280_v61 = vld [vmem:[#allocation3 + $0x84] sm:$0xff]  }
 0x28e   : > { %v5387_v30 = vsel %vm2071_vm9, %v5382_v34, %v5386_v35  ;;  %v5442_v28 = vor.u32 %v5441_v59, %v5437_v20  ;;  %v5454_v48 = vor.u32 %v5453_v7, %v5449_v49  ;;  %v5458_v21 = vrot.slane %v5456_v38, 1  ;;  %v9275_v11 = vld [vmem:[#allocation3 + $0x74] ss:$0 sps:$4 sm:$0x11]   ;;  %v9325_v45 = vld [vmem:[#allocation10 + $0x200] sm:$0xff]   ;;  %v9292_v54 = vld [vmem:[#allocation10 + $0x190] sm:$0xff]  }
 0x28f   : > { %v5477_v44 = vrot.slane %v5475_v60, 1  ;;  %v5473_v34 = vshrl.u32 %v9270_v9, 16  ;;  %v5480_v35 = vshll.u32 %v9271_v39, 16  ;;  %v5499_v46 = vshll.u32 %v9277_v37, 16  ;;  %v9283_v5 = vld [vmem:[#allocation3 + $0x90] sm:$0xff]   ;;  %v9298_v9 = vld [vmem:[#allocation10 + $0x188] sm:$0xff]  }
 0x290   : > { %v11008_v24 = vsel %vm2071_vm9, %v5454_v48, %v5458_v21  ;;  %v9278_v26 = vld [vmem:[#allocation3 + $0x80] ss:$0 sps:$4 sm:$0x11]   ;;  %v5489_v62 = vrot.slane %v5487_v50, 1  ;;  %v5497_v12 = vshrl.u32 %v9277_v37, 16  ;;  %v5523_v59 = vshll.u32 %v9283_v5, 16 }
 0x291   : > { %v5478_v52 = vor.u32 %v5477_v44, %v5473_v34  ;;  %v5501_v53 = vrot.slane %v5499_v46, 1  ;;  %v9281_v7 = vld [vmem:[#allocation3 + $0x8c] ss:$0 sps:$4 sm:$0x11]   ;;  %v9287_v49 = vld [vmem:[#allocation3 + $0x9c] sm:$0xff]  }
 0x292   : > { %v9244_v18 = vld [vmem:[#allocation3 + $0xc0] sm:$0xff]   ;;  %v9284_v20 = vld [vmem:[#allocation3 + $0x98] ss:$0 sps:$4 sm:$0x11]   ;;  %v5516_v48 = vshll.u32 %v9281_v7, 16  ;;  %v5533_v34 = vshrl.u32 %v9287_v49, 16 }
 0x293   : > { %8846 = vmatprep.mubr.bf16.mxu0 %v9244_v18  ;;  %v5502_v63 = vor.u32 %v5501_v53, %v5497_v12  ;;  %v9303_v60 = vld [vmem:[#allocation10 + $0x180] sm:$0xff]   ;;  %v9291_v44 = vld [vmem:[#allocation3 + $0xb0] ss:$0 sps:$4 sm:$0x11]  }
 0x294   : > { %4937 = vmatmul.mubr.bf16.gmra.mxu1 %v9237_v33  ;;  %8847 = vmatmul.mubr.bf16.gmra.mxu0 %v9245_v15  ;;  %v9259_v33 = vld [vmem:[#allocation10 + $0x1b8] sm:$0xff]   ;;  %v9272_v15 = vld [vmem:[#allocation10 + $0x1a8] sm:$0xff]  }
 0x295   : > { %4944 = vmatprep.mubr.bf16.mxu1 %v9244_v18  ;;  %5867 = vmatprep.mubr.bf16.mxu0 %v5399_v23  ;;  %v5465_v18 = vrot.slane %v5463_v4, 1  ;;  %v5509_v4 = vshrl.u32 %v9280_v61, 16 }
 0x29c   : > { %4945 = vmatmul.mubr.bf16.gmra.mxu1 %v9240_v2  ;;  %5868 = vmatmul.mubr.bf16.vlgmr.msra.gmra.mxu0 %v5387_v30  ;;  %v5444_v2 = vshll.u32 %v9262_v32, 16  ;;  %v5470_v30 = vrot.slane %v5468_v36, 1  ;;  %v9295_v32 = vld [vmem:[#allocation10 + $0x1c8] sm:$0xff]  }
 0x29d   : > { %8866 = vmatprep.mubr.bf16.mxu1 %v10989_v55  ;;  %5875 = vmatprep.mubr.bf16.mxu0 %v10989_v55 }
 0x29e   : > { %8899 = vmatpush3.bf16.msra.mxu0 %v10869_v13  ;;  %v10999_v13 = vsel %vm2071_vm9, %v5430_v41, %v5434_v29  ;;  %v5446_v56 = vrot.slane %v5444_v2, 1  ;;  %v5492_v41 = vshll.u32 %v9275_v11, 16  ;;  %v9294_v11 = vld [vmem:[#allocation3 + $0xbc] ss:$0 sps:$4 sm:$0x11]  }
 0x29f   : > { %8900 = vmatprep.subr.bf16.mxu0 %v9273_v16 }
 0x2a0   : > { %v11004_v47 = vsel %vm2071_vm9, %v5442_v28, %v5446_v56  ;;  %v9290_v28 = vld [vmem:[#allocation3 + $0xa8] sm:$0xff]   ;;  %v5528_v56 = vshll.u32 %v9284_v20, 16 }
 0x2a1   : > { %v5547_v39 = vshll.u32 %v9290_v28, 16 }
 0x2a2   : > { %8901 = vmatpush3.bf16.msra.mxu0 %v9273_v16  ;;  %v5482_v16 = vrot.slane %v5480_v35, 1 }
 0x2a3   : > { %8902 = vmatprep.subr.bf16.mxu0 %v9286_v10  ;;  %v5549_v36 = vrot.slane %v5547_v39, 1 }
 0x2a4   : > { %8867 = vmatmul.mubr.bf16.vlgmr.msra.gmra.mxu1 %v10995_v22  ;;  %5876 = vmatmul.mubr.bf16.gmra.mxu0 %v5399_v23  ;;  %v5461_v23 = vshrl.u32 %v9267_v14, 16  ;;  %v11018_v31 = vsel %vm2071_vm9, %v5478_v52, %v5482_v16  ;;  %v5494_v14 = vrot.slane %v5492_v41, 1 }
 0x2a5   : > { %8870 = vmatprep.mubr.bf16.mxu1 %v10999_v13  ;;  %8523 = vmatpush3.bf16.msra.mxu1 %v9259_v33  ;;  %v5504_v33 = vshll.u32 %v9278_v26, 16  ;;  %v9297_v26 = vld [vmem:[#allocation3 + $0xc8] ss:$0 sps:$4 sm:$0x11]  }
 0x2a6   : > { %8524 = vmatprep.subr.bf16.mxu1 %v9263_v42  ;;  %5883 = vmatprep.mubr.bf16.mxu0 %v10995_v22  ;;  %v5466_v57 = vor.u32 %v5465_v18, %v5461_v23  ;;  %v5511_v42 = vshll.u32 %v9280_v61, 16  ;;  %v9288_v18 = vld [vmem:[#allocation3 + $0xa4] ss:$0 sps:$4 sm:$0x11]   ;;  %v9293_v23 = vld [vmem:[#allocation3 + $0xb4] sm:$0xff]  }
 0x2a7   : > { %8903 = vmatpush3.bf16.msra.mxu0 %v9286_v10  ;;  %v5485_v10 = vshrl.u32 %v9274_v1, 16  ;;  %v5530_v1 = vrot.slane %v5528_v56, 1  ;;  %v5540_v35 = vshll.u32 %v9288_v18, 16  ;;  %v5559_v52 = vshll.u32 %v9293_v23, 16 }
 0x2a8   : > { %8904 = vmatprep.subr.bf16.mxu0 %v9299_v40  ;;  %v11014_v19 = vsel %vm2071_vm9, %v5466_v57, %v5470_v30  ;;  %v5552_v57 = vshll.u32 %v9291_v44, 16  ;;  %v5557_v53 = vshrl.u32 %v9293_v23, 16  ;;  %v9312_v18 = vld [vmem:[#allocation3 + $0x2c] ss:$0 sps:$4 sm:$0x11]  }
 0x2a9   : > { %8525 = vmatpush3.bf16.msra.mxu1 %v9266_v27  ;;  %v5490_v29 = vor.u32 %v5489_v62, %v5485_v10  ;;  %v5513_v27 = vrot.slane %v5511_v42, 1  ;;  %v5542_v30 = vrot.slane %v5540_v35, 1  ;;  %v5561_v62 = vrot.slane %v5559_v52, 1 }
 0x2aa   : > { %8526 = vmatprep.subr.bf16.mxu1 %v9269_v17  ;;  %v5525_v17 = vrot.slane %v5523_v59, 1  ;;  %v5554_v16 = vrot.slane %v5552_v57, 1  ;;  %v6429_v23 = vrot.slane %v9312_v18, 1  ;;  %v9314_v57 = vld [vmem:[#allocation3 + $0x38] ss:$0 sps:$4 sm:$0x11]  }
 0x2ab   : > { %8905 = vmatpush3.bf16.msra.mxu0 %v9299_v40  ;;  %v5506_v40 = vrot.slane %v5504_v33, 1  ;;  %v11024_v2 = vsel %vm2071_vm9, %v5490_v29, %v5494_v14  ;;  %v5514_v8 = vor.u32 %v5513_v27, %v5509_v4  ;;  %v5562_v12 = vor.u32 %v5561_v62, %v5557_v53 }
 0x2ac   : > { %8871 = vmatmul.mubr.bf16.gmra.mxu1 %v11004_v47  ;;  %8906 = vmatprep.subr.bf16.mxu0 %v9310_v0 }
 0x2ad   : > { %8874 = vmatprep.mubr.bf16.mxu1 %v11008_v24  ;;  %8527 = vmatpush3.bf16.msra.mxu1 %v9272_v15  ;;  %v11028_v38 = vsel %vm2071_vm9, %v5502_v63, %v5506_v40  ;;  %v5535_v15 = vshll.u32 %v9287_v49, 16 }
 0x2ae   : > { %5884 = vmatmul.mubr.bf16.gmra.mxu0 %v10989_v55  ;;  %8528 = vmatprep.subr.bf16.mxu1 %v9276_v51  ;;  %v9289_v55 = vld [vmem:[#allocation10 + $0x1d0] sm:$0xff]   ;;  %v5518_v51 = vrot.slane %v5516_v48, 1  ;;  %v9308_v48 = vld [vmem:[#allocation3 + $0x18] sm:$0xfe]  }
 0x2af   : > { %5891 = vmatprep.mubr.bf16.mxu0 %v10999_v13  ;;  %8907 = vmatpush3.bf16.msra.mxu0 %v9310_v0  ;;  %v5521_v0 = vshrl.u32 %v9283_v5, 16  ;;  %v5564_v5 = vshll.u32 %v9294_v11, 16 }
 0x2b0   : > { %8908 = vmatprep.subr.bf16.mxu0 %v9315_v43  ;;  %v11034_v37 = vsel %vm2071_vm9, %v5514_v8, %v5518_v51  ;;  %v9311_v51 = vld [vmem:[#allocation3 + $0x24] sm:$0xfe]  }
 0x2b1   : > { %8529 = vmatpush3.bf16.msra.mxu1 %v9279_v58  ;;  %v5526_v21 = vor.u32 %v5525_v17, %v5521_v0  ;;  %v9296_v58 = vld [vmem:[#allocation3 + $0xc0] sm:$0xff]  }
 0x2b2   : > { %8530 = vmatprep.subr.bf16.mxu1 %v9282_v3  ;;  %v5545_v3 = vshrl.u32 %v9290_v28, 16  ;;  %v5569_v41 = vshrl.u32 %v9296_v58, 16  ;;  %v9306_v17 = vld [vmem:[#allocation3] sm:$0xfe]  }
 0x2b3   : > { %8909 = vmatpush3.bf16.msra.mxu0 %v9315_v43  ;;  %v5537_v43 = vrot.slane %v5535_v15, 1  ;;  %v9307_v28 = vld [vmem:[#allocation3 + $0x8] ss:$0 sps:$4 sm:$0x11]   ;;  %v6419_v0 = vrot.slane %v9306_v17, 1 }
 0x2b4   : > { %8875 = vmatmul.mubr.bf16.gmra.mxu1 %v11014_v19  ;;  %8910 = vmatprep.subr.bf16.mxu0 %v9320_v25  ;;  %v5550_v46 = vor.u32 %v5549_v36, %v5545_v3  ;;  %v6420_v56 = vrot.slane %v9307_v28, 1  ;;  %v9313_v3 = vld [vmem:[#allocation3 + $0x30] sm:$0xfe]  }
 0x2b5   : > { %8878 = vmatprep.mubr.bf16.mxu1 %v11018_v31  ;;  %8531 = vmatpush3.bf16.msra.mxu1 %v9285_v6  ;;  %v5538_v50 = vor.u32 %v5537_v43, %v5533_v34  ;;  %v9300_v6 = vld [vmem:[#allocation3 + $0xcc] sm:$0xff]   ;;  %v6428_v43 = vrot.slane %v9311_v51, 1  ;;  %v6431_v11 = vrot.slane %v9313_v3, 1 }
 0x2b6   : > { %5892 = vmatmul.mubr.bf16.gmra.mxu0 %v10995_v22  ;;  %8532 = vmatprep.subr.bf16.mxu1 %v9289_v55  ;;  %v9302_v22 = vld [vmem:[#allocation10 + $0x1c0] sm:$0xff]   ;;  %v5583_v10 = vshll.u32 %v9300_v6, 16  ;;  %v5581_v29 = vshrl.u32 %v9300_v6, 16  ;;  %v6421_v15 = vsel %vm3115_vm10, %v6419_v0, %v6420_v56  ;;  %v6432_v6 = vrot.slane %v9314_v57, 1 }
 0x2b7   : > { %5899 = vmatprep.mubr.bf16.mxu0 %v11004_v47  ;;  %8911 = vmatpush3.bf16.msra.mxu0 %v9320_v25  ;;  %v5571_v25 = vshll.u32 %v9296_v58, 16  ;;  %v11044_v55 = vsel %vm2071_vm9, %v5538_v50, %v5542_v30  ;;  %v11077_v35 = vsel %vm3115_vm10, %v6428_v43, %v6429_v23 }
 0x2b8   : > { %8912 = vmatprep.subr.bf16.mxu0 %v9325_v45  ;;  %v5585_v42 = vrot.slane %v5583_v10, 1 }
 0x2b9   : > { %8533 = vmatpush3.bf16.msra.mxu1 %v9292_v54  ;;  %v5573_v61 = vrot.slane %v5571_v25, 1  ;;  %v5576_v54 = vshll.u32 %v9297_v26, 16 }
 0x2ba   : > { %8534 = vmatprep.subr.bf16.mxu1 %v9295_v32  ;;  %v5566_v32 = vrot.slane %v5564_v5, 1  ;;  %v5586_v40 = vor.u32 %v5585_v42, %v5581_v29  ;;  %v11088_v5 = vsel %vm3115_vm10, %v6431_v11, %v6432_v6 }
 0x2bb   : > { %8913 = vmatpush3.bf16.msra.mxu0 %v9325_v45  ;;  %v9301_v45 = vld [vmem:[#allocation3 + $0xd4] ss:$0 sps:$4 sm:$0x11]   ;;  %v5574_v33 = vor.u32 %v5573_v61, %v5569_v41  ;;  %v5578_v59 = vrot.slane %v5576_v54, 1 }
 0x2bc   : > { %8879 = vmatmul.mubr.bf16.gmra.mxu1 %v11024_v2  ;;  %v5588_v63 = vshll.u32 %v9301_v45, 16  ;;  %v11054_v14 = vsel %vm2071_vm9, %v5562_v12, %v5566_v32  ;;  %v9317_v45 = vld [vmem:[#allocation3 + $0x44] ss:$0 sps:$4 sm:$0x11]  }
 0x2bd   : > { %8882 = vmatprep.mubr.bf16.mxu1 %v11028_v38  ;;  %8535 = vmatpush3.bf16.msra.mxu1 %v9298_v9  ;;  %v11058_v7 = vsel %vm2071_vm9, %v5574_v33, %v5578_v59  ;;  %v9305_v9 = vld [vmem:[#allocation3 + $0x14] ss:$0 sps:$4 sm:$0x11]   ;;  %v6435_v32 = vrot.slane %v9317_v45, 1 }
 0x2be   : > { %5900 = vmatmul.mubr.bf16.gmra.mxu0 %v10999_v13  ;;  %8536 = vmatprep.subr.bf16.mxu1 %v9302_v22  ;;  %v11038_v13 = vsel %vm2071_vm9, %v5526_v21, %v5530_v1  ;;  %v5590_v20 = vrot.slane %v5588_v63, 1  ;;  %v6423_v27 = vrot.slane %v9305_v9, 1 }
 0x2bf   : > { %5907 = vmatprep.mubr.bf16.mxu0 %v11008_v24 }
 0x2c0   : > { %v5591_v49 = vsel %vm2071_vm9, %v5586_v40, %v5590_v20  ;;  %v9318_v40 = vld [vmem:[#allocation3 + $0x48] sm:$0xfe]  }
 0x2c1   : > { %8537 = vmatpush3.bf16.msra.mxu1 %v9303_v60  ;;  %v9309_v60 = vld [vmem:[#allocation3 + $0x20] ss:$0 sps:$4 sm:$0x11]   ;;  %v6437_v28 = vrot.slane %v9318_v40, 1 }
 0x2c2   : > { %v6426_v8 = vrot.slane %v9309_v60, 1 }
 0x2c4   : > { %8883 = vmatmul.mubr.bf16.gmra.mxu1 %v11034_v37 }
 0x2c5   : > { %8886 = vmatprep.mubr.bf16.mxu1 %v11038_v13 }
 0x2c6   : > { %5908 = vmatmul.mubr.bf16.gmra.mxu0 %v11004_v47  ;;  %v11048_v47 = vsel %vm2071_vm9, %v5550_v46, %v5554_v16 }
 0x2c7   : > { %5915 = vmatprep.mubr.bf16.mxu0 %v11014_v19 }
 0x2cc   : > { %8887 = vmatmul.mubr.bf16.gmra.mxu1 %v11044_v55 }
 0x2cd   : > { %8890 = vmatprep.mubr.bf16.mxu1 %v11048_v47 }
 0x2ce   : > { %5916 = vmatmul.mubr.bf16.gmra.mxu0 %v11008_v24  ;;  %v9304_v24 = vld [vmem:[#allocation3 + $0xc] sm:$0xfe]  }
 0x2cf   : > { %5923 = vmatprep.mubr.bf16.mxu0 %v11018_v31  ;;  %v6422_v22 = vrot.slane %v9304_v24, 1 }
 0x2d1   : > { %v6424_v4 = vsel %vm3115_vm10, %v6422_v22, %v6423_v27 }
 0x2d4   : > { %8891 = vmatmul.mubr.bf16.gmra.mxu1 %v11054_v14 }
 0x2d5   : > { %8894 = vmatprep.mubr.bf16.mxu1 %v11058_v7 }
 0x2d6   : > { %5924 = vmatmul.mubr.bf16.gmra.mxu0 %v11014_v19  ;;  %v6425_v19 = vrot.slane %v9308_v48, 1 }
 0x2d7   : > { %5931 = vmatprep.mubr.bf16.mxu0 %v11024_v2 }
 0x2d8   : > { %v11069_v39 = vsel %vm3115_vm10, %v6425_v19, %v6426_v8 }
 0x2dc   : > { %8895 = vmatmul.mubr.bf16.gmra.mxu1 %v5591_v49 }
 0x2dd   : > { %6748 = vmatprep.mubr.bf16.mxu1 %v6424_v4 }
 0x2de   : > { %5932 = vmatmul.mubr.bf16.gmra.mxu0 %v11018_v31 }
 0x2df   : > { %5939 = vmatprep.mubr.bf16.mxu0 %v11028_v38 }
 0x2e2   : > { %v8266_v21 = vpop.f32.mrf.mxu1 }
 0x2e4   : > { %6749 = vmatmul.mubr.bf16.vlgmr.msra.gmra.mxu1 %v6421_v15  ;;  %v8267_v1 = vpop.f32.mrf.mxu1  ;;  %v9322_v15 = vld [vmem:[#allocation3 + $0x5c] ss:$0 sps:$4 sm:$0x11]  }
 0x2e5   : > { %6756 = vmatprep.mubr.bf16.mxu1 %v11069_v39  ;;  %v8268_v44 = vadd.f32 %v8267_v1, %v8266_v21 }
 0x2e6   : > { %5940 = vmatmul.mubr.bf16.gmra.mxu0 %v11024_v2  ;;  %v8269_v31 = vpop.f32.mrf.mxu1 }
 0x2e7   : > { %5947 = vmatprep.mubr.bf16.mxu0 %v11034_v37 }
 0x2e8   : > { %v8270_v36 = vpop.f32.mrf.mxu1 }
 0x2e9   : > { %v11074_v58 = vadd.f32 %v8270_v36, %v8269_v31  ;;  %v6441_v31 = vrot.slane %v9322_v15, 1 }
 0x2ea   : > { %v8272_v34 = vpop.f32.mrf.mxu1 }
 0x2ec   : > { %6757 = vmatmul.mubr.bf16.gmra.mxu1 %v6424_v4  ;;  %v8273_v2 = vpop.f32.mrf.mxu1 }
 0x2ed   : > { %6764 = vmatprep.mubr.bf16.mxu1 %v11077_v35  ;;  %v8820_v50 = vpop.f32.mrf.mxu0  ;;  %v8274_v52 = vadd.f32 %v8273_v2, %v8272_v34  ;;  %v9324_v2 = vld [vmem:[#allocation3 + $0x68] ss:$0 sps:$4 sm:$0x11]  }
 0x2ee   : > { %5948 = vmatmul.mubr.bf16.gmra.mxu0 %v11028_v38  ;;  %v8275_v25 = vpop.f32.mrf.mxu1  ;;  %v9316_v38 = vld [vmem:[#allocation3 + $0x3c] sm:$0xfe]  }
 0x2ef   : > { %v4987_v46 = vpop.f32.mrf.mxu0  ;;  %5955 = vmatprep.mubr.bf16.mxu0 %v11038_v13  ;;  %v11084_v16 = vadd.f32 %v8820_v50, %v8274_v52  ;;  %v6434_v33 = vrot.slane %v9316_v38, 1  ;;  %v9323_v50 = vld [vmem:[#allocation3 + $0x60] sm:$0xfe]  }
 0x2f0   : > { %v11082_v30 = vadd.f32 %v8268_v44, %v4987_v46  ;;  %v8276_v26 = vpop.f32.mrf.mxu1 }
 0x2f1   : > { %v8821_v62 = vpop.f32.mrf.mxu0  ;;  %v8277_v61 = vadd.f32 %v8276_v26, %v8275_v25  ;;  %v11101_v9 = vsel %vm3115_vm10, %v6434_v33, %v6435_v32  ;;  %v6443_v26 = vrot.slane %v9323_v50, 1  ;;  %v9327_v33 = vld [vmem:[#allocation3 + $0x74] ss:$0 sps:$4 sm:$0x11]  }
 0x2f2   : > { %v6447_v40 = vrot.slane %v9327_v33, 1 }
 0x2f3   : > { %v8278_v53 = vpop.f32.mrf.mxu1  ;;  %v11091_v10 = vadd.f32 %v8821_v62, %v8277_v61  ;;  %v11095_v29 = vpop.f32.mrf.mxu0  ;;  %v6444_v62 = vrot.slane %v9324_v2, 1 }
 0x2f4   : > { %6765 = vmatmul.mubr.bf16.gmra.mxu1 %v11069_v39 }
 0x2f5   : > { %6772 = vmatprep.mubr.bf16.mxu1 %v11088_v5  ;;  %v8279_v41 = vpop.f32.mrf.mxu1 }
 0x2f6   : > { %5956 = vmatmul.mubr.bf16.gmra.mxu0 %v11034_v37  ;;  %v8280_v54 = vadd.f32 %v8279_v41, %v8278_v53  ;;  %v9319_v37 = vld [vmem:[#allocation3 + $0x50] ss:$0 sps:$4 sm:$0x11]  }
 0x2f7   : > { %5963 = vmatprep.mubr.bf16.mxu0 %v11044_v55  ;;  %v8281_v12 = vpop.f32.mrf.mxu1  ;;  %v6438_v4 = vrot.slane %v9319_v37, 1 }
 0x2f9   : > { %v8282_v42 = vpop.f32.mrf.mxu1  ;;  %v11112_v8 = vsel %vm3115_vm10, %v6437_v28, %v6438_v4  ;;  %v9328_v28 = vld [vmem:[#allocation3 + $0x78] sm:$0xfe]   ;;  %v9329_v4 = vld [vmem:[#allocation3 + $0x80] ss:$0 sps:$4 sm:$0x11]  }
 0x2fa   : > { %v11097_v63 = vadd.f32 %v8282_v42, %v8281_v12  ;;  %v9326_v12 = vld [vmem:[#allocation3 + $0x6c] sm:$0xfe]   ;;  %v6450_v15 = vrot.slane %v9329_v4, 1 }
 0x2fb   : > { %v8824_v59 = vpop.f32.mrf.mxu0  ;;  %v8284_v24 = vpop.f32.mrf.mxu1 }
 0x2fc   : > { %6773 = vmatmul.mubr.bf16.gmra.mxu1 %v11077_v35 }
 0x2fd   : > { %6780 = vmatprep.mubr.bf16.mxu1 %v11101_v9  ;;  %v5003_v20 = vpop.f32.mrf.mxu0  ;;  %v8285_v22 = vpop.f32.mrf.mxu1 }
 0x2fe   : > { %5964 = vmatmul.mubr.bf16.gmra.mxu0 %v11038_v13  ;;  %v11105_v27 = vadd.f32 %v8280_v54, %v5003_v20  ;;  %v8286_v49 = vadd.f32 %v8285_v22, %v8284_v24  ;;  %v9321_v13 = vld [vmem:[#allocation3 + $0x54] sm:$0xfe]   ;;  %v6446_v24 = vrot.slane %v9326_v12, 1 }
 0x2ff   : > { %5971 = vmatprep.mubr.bf16.mxu0 %v11048_v47  ;;  %v8287_v17 = vpop.f32.mrf.mxu1  ;;  %v8825_v0 = vpop.f32.mrf.mxu0  ;;  %v6440_v44 = vrot.slane %v9321_v13, 1  ;;  %v6449_v13 = vrot.slane %v9328_v28, 1  ;;  %v9335_v28 = vld [vmem:[#allocation3 + $0xa4] ss:$0 sps:$4 sm:$0x11]  }
 0x300   : > { %v11108_v48 = vadd.f32 %v8824_v59, %v8286_v49 }
 0x301   : > { %v8288_v60 = vpop.f32.mrf.mxu1  ;;  %v11119_v43 = vpop.f32.mrf.mxu0  ;;  %v11123_v57 = vsel %vm3115_vm10, %v6440_v44, %v6441_v31 }
 0x302   : > { %v8289_v56 = vadd.f32 %v8288_v60, %v8287_v17  ;;  %v11145_v17 = vsel %vm3115_vm10, %v6446_v24, %v6447_v40 }
 0x304   : > { %v8290_v19 = vpop.f32.mrf.mxu1  ;;  %6781 = vmatmul.mubr.bf16.gmra.mxu1 %v11088_v5  ;;  %v11115_v21 = vadd.f32 %v8825_v0, %v8289_v56 }
 0x305   : > { %6788 = vmatprep.mubr.bf16.mxu1 %v11112_v8 }
 0x306   : > { %v8291_v51 = vpop.f32.mrf.mxu1  ;;  %5972 = vmatmul.mubr.bf16.gmra.mxu0 %v11044_v55 }
 0x307   : > { %v8292_v18 = vadd.f32 %v8291_v51, %v8290_v19  ;;  %5979 = vmatprep.mubr.bf16.mxu0 %v11054_v14 }
 0x308   : > { %v8293_v1 = vpop.f32.mrf.mxu1 }
 0x30a   : > { %v8294_v23 = vpop.f32.mrf.mxu1 }
 0x30b   : > { %v8295_v36 = vadd.f32 %v8294_v23, %v8293_v1  ;;  %v8828_v34 = vpop.f32.mrf.mxu0 }
 0x30c   : > { %v8296_v3 = vpop.f32.mrf.mxu1  ;;  %6789 = vmatmul.mubr.bf16.gmra.mxu1 %v11101_v9 }
 0x30d   : > { %6796 = vmatprep.mubr.bf16.mxu1 %v11123_v57  ;;  %v5019_v55 = vpop.f32.mrf.mxu0 }
 0x30e   : > { %v8297_v52 = vpop.f32.mrf.mxu1  ;;  %5980 = vmatmul.mubr.bf16.gmra.mxu0 %v11048_v47  ;;  %v11127_v46 = vadd.f32 %v8292_v18, %v5019_v55  ;;  %v11136_v47 = vsel %vm3115_vm10, %v6443_v26, %v6444_v62 }
 0x30f   : > { %v8298_v25 = vadd.f32 %v8297_v52, %v8296_v3  ;;  %5987 = vmatprep.mubr.bf16.mxu0 %v11058_v7  ;;  %v8829_v11 = vpop.f32.mrf.mxu0 }
 0x310   : > { %v8299_v6 = vpop.f32.mrf.mxu1 }
 0x311   : > { %v11130_v61 = vadd.f32 %v8828_v34, %v8298_v25  ;;  %v5022_v53 = vpop.f32.mrf.mxu0  ;;  %v9331_v34 = vld [vmem:[#allocation3 + $0x8c] ss:$0 sps:$4 sm:$0x11]  }
 0x312   : > { %v8300_v38 = vpop.f32.mrf.mxu1  ;;  %v11132_v45 = vadd.f32 %v8295_v36, %v5022_v53  ;;  %v9330_v36 = vld [vmem:[#allocation3 + $0x84] sm:$0xfe]   ;;  %v6453_v52 = vrot.slane %v9331_v34, 1  ;;  %v9332_v53 = vld [vmem:[#allocation3 + $0x90] sm:$0xfe]  }
 0x313   : > { %v8301_v41 = vadd.f32 %v8300_v38, %v8299_v6  ;;  %v6452_v55 = vrot.slane %v9330_v36, 1  ;;  %v9333_v38 = vld [vmem:[#allocation3 + $0x98] ss:$0 sps:$4 sm:$0x11]  }
 0x314   : > { %v8302_v54 = vpop.f32.mrf.mxu1  ;;  %6797 = vmatmul.mubr.bf16.gmra.mxu1 %v11112_v8 }
 0x315   : > { %6804 = vmatprep.mubr.bf16.mxu1 %v11136_v47  ;;  %v11139_v7 = vadd.f32 %v8829_v11, %v8301_v41  ;;  %v6454_v62 = vsel %vm3115_vm10, %v6452_v55, %v6453_v52 }
 0x316   : > { %v8303_v32 = vpop.f32.mrf.mxu1  ;;  %5988 = vmatmul.mubr.bf16.gmra.mxu0 %v11054_v14 }
 0x317   : > { %v8304_v42 = vadd.f32 %v8303_v32, %v8302_v54  ;;  %8914 = vmatprep.mubr.bf16.mxu0 %v11069_v39  ;;  %v6455_v32 = vrot.slane %v9332_v53, 1 }
 0x318   : > { %v8305_v59 = vpop.f32.mrf.mxu1 }
 0x31a   : > { %v8306_v37 = vpop.f32.mrf.mxu1 }
 0x31b   : > { %v8307_v20 = vadd.f32 %v8306_v37, %v8305_v59  ;;  %v8832_v22 = vpop.f32.mrf.mxu0 }
 0x31c   : > { %v8308_v49 = vpop.f32.mrf.mxu1  ;;  %6805 = vmatmul.mubr.bf16.gmra.mxu1 %v11123_v57 }
 0x31d   : > { %6812 = vmatprep.mubr.bf16.mxu1 %v11145_v17  ;;  %v5035_v14 = vpop.f32.mrf.mxu0 }
 0x31e   : > { %v8309_v60 = vpop.f32.mrf.mxu1  ;;  %8915 = vmatmul.mubr.bf16.vlgmr.msra.gmra.mxu0 %v11077_v35  ;;  %v11149_v39 = vadd.f32 %v8304_v42, %v5035_v14  ;;  %v6451_v35 = vsel %vm3115_vm10, %v6449_v13, %v6450_v15  ;;  %v6456_v42 = vrot.slane %v9333_v38, 1 }
 0x31f   : > { %v8310_v0 = vadd.f32 %v8309_v60, %v8308_v49  ;;  %8918 = vmatprep.mubr.bf16.mxu0 %v11088_v5  ;;  %v8833_v56 = vpop.f32.mrf.mxu0  ;;  %v9334_v49 = vld [vmem:[#allocation3 + $0x9c] sm:$0xfe]  }
 0x320   : > { %v8311_v19 = vpop.f32.mrf.mxu1 }
 0x321   : > { %v11152_v51 = vadd.f32 %v8832_v22, %v8310_v0  ;;  %v5038_v18 = vpop.f32.mrf.mxu0  ;;  %v6458_v0 = vrot.slane %v9334_v49, 1 }
 0x322   : > { %v8312_v1 = vpop.f32.mrf.mxu1  ;;  %v11154_v44 = vadd.f32 %v8307_v20, %v5038_v18 }
 0x323   : > { %v8313_v31 = vadd.f32 %v8312_v1, %v8311_v19 }
 0x324   : > { %v8314_v23 = vpop.f32.mrf.mxu1  ;;  %6813 = vmatmul.mubr.bf16.gmra.mxu1 %v11136_v47 }
 0x325   : > { %6820 = vmatprep.mubr.bf16.mxu1 %v6451_v35  ;;  %v11158_v5 = vadd.f32 %v8833_v56, %v8313_v31  ;;  %v6459_v56 = vrot.slane %v9335_v28, 1  ;;  %v9336_v31 = vld [vmem:[#allocation3 + $0xa8] sm:$0xfe]  }
 0x326   : > { %v8315_v3 = vpop.f32.mrf.mxu1  ;;  %8919 = vmatmul.mubr.bf16.gmra.mxu0 %v11101_v9 }
 0x327   : > { %v8316_v50 = vadd.f32 %v8315_v3, %v8314_v23  ;;  %8922 = vmatprep.mubr.bf16.mxu0 %v11112_v8  ;;  %v6460_v1 = vsel %vm3115_vm10, %v6458_v0, %v6459_v56  ;;  %v9337_v23 = vld [vmem:[#allocation3 + $0xb0] ss:$0 sps:$4 sm:$0x11]  }
 0x328   : > { %v8317_v2 = vpop.f32.mrf.mxu1  ;;  %v6462_v55 = vrot.slane %v9337_v23, 1 }
 0x32a   : > { %v8318_v25 = vpop.f32.mrf.mxu1 }
 0x32b   : > { %v8319_v11 = vadd.f32 %v8318_v25, %v8317_v2  ;;  %v8836_v6 = vpop.f32.mrf.mxu0  ;;  %v6461_v2 = vrot.slane %v9336_v31, 1 }
 0x32c   : > { %v8320_v26 = vpop.f32.mrf.mxu1  ;;  %6821 = vmatmul.mubr.bf16.gmra.mxu1 %v11145_v17 }
 0x32d   : > { %6828 = vmatprep.mubr.bf16.mxu1 %v6454_v62  ;;  %v5051_v41 = vpop.f32.mrf.mxu0  ;;  %v6463_v38 = vsel %vm3115_vm10, %v6461_v2, %v6462_v55 }
 0x32e   : > { %v8321_v54 = vpop.f32.mrf.mxu1  ;;  %8923 = vmatmul.mubr.bf16.gmra.mxu0 %v11123_v57  ;;  %v11165_v9 = vadd.f32 %v8316_v50, %v5051_v41  ;;  %v6457_v57 = vsel %vm3115_vm10, %v6455_v32, %v6456_v42  ;;  %v9339_v41 = vld [vmem:[#allocation3 + $0xbc] ss:$0 sps:$4 sm:$0x11]  }
 0x32f   : > { %v8322_v8 = vadd.f32 %v8321_v54, %v8320_v26  ;;  %8926 = vmatprep.mubr.bf16.mxu0 %v11136_v47  ;;  %v8837_v12 = vpop.f32.mrf.mxu0 }
 0x330   : > { %v8323_v33 = vpop.f32.mrf.mxu1 }
 0x331   : > { %v11168_v59 = vadd.f32 %v8836_v6, %v8322_v8  ;;  %v5054_v24 = vpop.f32.mrf.mxu0 }
 0x332   : > { %v8324_v40 = vpop.f32.mrf.mxu1  ;;  %v11170_v37 = vadd.f32 %v8319_v11, %v5054_v24 }
 0x333   : > { %v8325_v20 = vadd.f32 %v8324_v40, %v8323_v33  ;;  %v9341_v33 = vld [vmem:[#allocation3 + $0xc8] ss:$0 sps:$4 sm:$0x11]   ;;  %v6465_v40 = vrot.slane %v9339_v41, 1 }
 0x334   : > { %v8326_v22 = vpop.f32.mrf.mxu1  ;;  %6829 = vmatmul.mubr.bf16.gmra.mxu1 %v6451_v35  ;;  %v6468_v49 = vrot.slane %v9341_v33, 1 }
 0x335   : > { %6836 = vmatprep.mubr.bf16.mxu1 %v6457_v57  ;;  %v11173_v4 = vadd.f32 %v8837_v12, %v8325_v20  ;;  %v9340_v12 = vld [vmem:[#allocation3 + $0xc0] sm:$0xfe]  }
 0x336   : > { %v8327_v47 = vpop.f32.mrf.mxu1  ;;  %8927 = vmatmul.mubr.bf16.gmra.mxu0 %v11145_v17 }
 0x337   : > { %v8328_v14 = vadd.f32 %v8327_v47, %v8326_v22  ;;  %8930 = vmatprep.mubr.bf16.mxu0 %v6451_v35  ;;  %v6467_v22 = vrot.slane %v9340_v12, 1  ;;  %v9342_v47 = vld [vmem:[#allocation3 + $0xcc] sm:$0xfe]  }
 0x338   : > { %v8329_v60 = vpop.f32.mrf.mxu1  ;;  %v6470_v23 = vrot.slane %v9342_v47, 1 }
 0x33a   : > { %v8330_v19 = vpop.f32.mrf.mxu1 }
 0x33b   : > { %v8331_v13 = vadd.f32 %v8330_v19, %v8329_v60  ;;  %v8840_v15 = vpop.f32.mrf.mxu0 }
 0x33c   : > { %v8332_v18 = vpop.f32.mrf.mxu1  ;;  %6837 = vmatmul.mubr.bf16.gmra.mxu1 %v6454_v62 }
 0x33d   : > { %6844 = vmatprep.mubr.bf16.mxu1 %v6460_v1  ;;  %v5067_v36 = vpop.f32.mrf.mxu0 }
 0x33e   : > { %v8333_v34 = vpop.f32.mrf.mxu1  ;;  %8931 = vmatmul.mubr.bf16.gmra.mxu0 %v6454_v62  ;;  %v11177_v3 = vadd.f32 %v8328_v14, %v5067_v36  ;;  %v9338_v62 = vld [vmem:[#allocation3 + $0xb4] sm:$0xfe]   ;;  %v9343_v14 = vld [vmem:[#allocation3 + $0xd4] ss:$0 sps:$4 sm:$0x11]  }
 0x33f   : > { %v8334_v17 = vadd.f32 %v8333_v34, %v8332_v18  ;;  %8934 = vmatprep.mubr.bf16.mxu0 %v6457_v57  ;;  %v8841_v35 = vpop.f32.mrf.mxu0  ;;  %v6464_v24 = vrot.slane %v9338_v62, 1  ;;  %v6471_v36 = vrot.slane %v9343_v14, 1 }
 0x340   : > { %v8335_v50 = vpop.f32.mrf.mxu1 }
 0x341   : > { %v11179_v52 = vadd.f32 %v8840_v15, %v8334_v17  ;;  %v5070_v25 = vpop.f32.mrf.mxu0  ;;  %v6466_v0 = vsel %vm3115_vm10, %v6464_v24, %v6465_v40  ;;  %v6469_v15 = vsel %vm3115_vm10, %v6467_v22, %v6468_v49  ;;  %v6472_v55 = vsel %vm3115_vm10, %v6470_v23, %v6471_v36 }
 0x342   : > { %v8336_v11 = vpop.f32.mrf.mxu1  ;;  %v11181_v6 = vadd.f32 %v8331_v13, %v5070_v25 }
 0x343   : > { %v8337_v26 = vadd.f32 %v8336_v11, %v8335_v50 }
 0x344   : > { %v8338_v53 = vpop.f32.mrf.mxu1  ;;  %6845 = vmatmul.mubr.bf16.gmra.mxu1 %v6457_v57 }
 0x345   : > { %6852 = vmatprep.mubr.bf16.mxu1 %v6463_v38  ;;  %v11184_v54 = vadd.f32 %v8841_v35, %v8337_v26 }
 0x346   : > { %v8339_v8 = vpop.f32.mrf.mxu1  ;;  %8935 = vmatmul.mubr.bf16.gmra.mxu0 %v6460_v1 }
 0x347   : > { %v8340_v32 = vadd.f32 %v8339_v8, %v8338_v53  ;;  %8938 = vmatprep.mubr.bf16.mxu0 %v6463_v38 }
 0x348   : > { %v8341_v42 = vpop.f32.mrf.mxu1 }
 0x34a   : > { %v8342_v20 = vpop.f32.mrf.mxu1 }
 0x34b   : > { %v8343_v57 = vadd.f32 %v8342_v20, %v8341_v42  ;;  %v8844_v28 = vpop.f32.mrf.mxu0 }
 0x34c   : > { %v8344_v60 = vpop.f32.mrf.mxu1  ;;  %6853 = vmatmul.mubr.bf16.gmra.mxu1 %v6460_v1 }
 0x34d   : > { %6860 = vmatprep.mubr.bf16.mxu1 %v6466_v0  ;;  %v5083_v56 = vpop.f32.mrf.mxu0 }
 0x34e   : > { %v8345_v19 = vpop.f32.mrf.mxu1  ;;  %8939 = vmatmul.mubr.bf16.gmra.mxu0 %v6466_v0  ;;  %v11187_v13 = vadd.f32 %v8340_v32, %v5083_v56 }
 0x34f   : > { %v8346_v18 = vadd.f32 %v8345_v19, %v8344_v60  ;;  %8942 = vmatprep.mubr.bf16.mxu0 %v6469_v15  ;;  %v8845_v31 = vpop.f32.mrf.mxu0 }
 0x350   : > { %v8347_v34 = vpop.f32.mrf.mxu1 }
 0x351   : > { %v11190_v17 = vadd.f32 %v8844_v28, %v8346_v18  ;;  %v5086_v35 = vpop.f32.mrf.mxu0 }
 0x352   : > { %v8348_v1 = vpop.f32.mrf.mxu1  ;;  %v11192_v50 = vadd.f32 %v8343_v57, %v5086_v35 }
 0x353   : > { %v8349_v2 = vadd.f32 %v8348_v1, %v8347_v34  ;;  %v4991_v1 = vadd.f32 %v11074_v58, %v11095_v29 }
 0x354   : > { %v8350_v25 = vpop.f32.mrf.mxu1  ;;  %6861 = vmatmul.mubr.bf16.gmra.mxu1 %v6463_v38  ;;  %v8848_v26 = vpop.f32.mrf.mxu0 }
 0x355   : > { %6868 = vmatprep.mubr.bf16.mxu1 %v6469_v15  ;;  %v11195_v11 = vadd.f32 %v8845_v31, %v8349_v2 }
 0x356   : > { %v8351_v53 = vpop.f32.mrf.mxu1  ;;  %8943 = vmatmul.mubr.bf16.gmra.mxu0 %v6472_v55  ;;  %v5099_v41 = vpop.f32.mrf.mxu0 }
 0x357   : > { %v8352_v62 = vadd.f32 %v8351_v53, %v8350_v25 }
 0x358   : > { %v8353_v8 = vpop.f32.mrf.mxu1  ;;  %v8849_v33 = vpop.f32.mrf.mxu0 }
 0x359   : > { %v11197_v12 = vadd.f32 %v8352_v62, %v5099_v41 }
 0x35a   : > { %v8354_v32 = vpop.f32.mrf.mxu1  ;;  %v5102_v24 = vpop.f32.mrf.mxu0 }
 0x35b   : > { %v8355_v42 = vadd.f32 %v8354_v32, %v8353_v8 }
 0x35c   : > { %v8356_v40 = vpop.f32.mrf.mxu1  ;;  %6869 = vmatmul.mubr.bf16.gmra.mxu1 %v6466_v0  ;;  %v8402_v38 = vpop.f32.mrf.mxu0  ;;  %v11208_v0 = vld [vmem:[%s11674_s4] ss:$0 sm:$0xff] }
 0x35d   : > { %v11199_v20 = vadd.f32 %v8355_v42, %v5102_v24  ;;  %v5114_v35 = vadd.f32 %v11208_v0, %v11082_v30  ;;  %v5116_v8 = vadd.f32 %v11208_v0, %v11084_v16 }
 0x35e   : > { %v8357_v22 = vpop.f32.mrf.mxu1  ;;  %v8403_v57 = vpop.f32.mrf.mxu0 }
 0x35f   : > { %v8358_v49 = vadd.f32 %v8357_v22, %v8356_v40  ;;  %v8404_v47 = vadd.f32 %v8403_v57, %v8402_v38 }
 0x360   : > { %v8359_v28 = vpop.f32.mrf.mxu1  ;;  %v8405_v60 = vpop.f32.mrf.mxu0 }
 0x361   : > { %v11201_v14 = vadd.f32 %v8848_v26, %v8358_v49  ;;  %v5117_v49 = vadd.f32 %v11208_v0, %v11091_v10 }
 0x362   : > { %v8360_v56 = vpop.f32.mrf.mxu1  ;;  %v8406_v15 = vpop.f32.mrf.mxu0 }
 0x363   : > { %v8361_v19 = vadd.f32 %v8360_v56, %v8359_v28  ;;  %v8407_v31 = vadd.f32 %v8406_v15, %v8405_v60  ;;  %v5118_v15 = vadd.f32 %v11208_v0, %v11105_v27 }
 0x364   : > { %v8868_v18 = vpop.f32.mrf.mxu1  ;;  %v8408_v34 = vpop.f32.mrf.mxu0 }
 0x365   : > { %v11203_v23 = vadd.f32 %v8849_v33, %v8361_v19  ;;  %v5115_v33 = vadd.f32 %v11208_v0, %v4991_v1 }
 0x366   : > { %v6030_v36 = vpop.f32.mrf.mxu1  ;;  %v8409_v25 = vpop.f32.mrf.mxu0 }
 0x367   : > { %v6031_v2 = vadd.f32 %v8404_v47, %v6030_v36  ;;  %v8410_v53 = vadd.f32 %v8409_v25, %v8408_v34 }
 0x368   : > { %v8869_v55 = vpop.f32.mrf.mxu1  ;;  %v8411_v41 = vpop.f32.mrf.mxu0 }
 0x369   : > { %v11214_v26 = vadd.f32 %v6031_v2, %v5114_v35  ;;  %v6039_v42 = vadd.f32 %v8868_v18, %v8410_v53  ;;  %v5007_v18 = vadd.f32 %v11097_v63, %v11119_v43  ;;  %v5120_v63 = vadd.f32 %v11208_v0, %v11108_v48 }
 0x36a   : > { %v6033_v62 = vpop.f32.mrf.mxu1  ;;  %v8412_v30 = vpop.f32.mrf.mxu0 }
 0x36b   : > { %v6034_v32 = vadd.f32 %v8407_v31, %v6033_v62  ;;  %v8413_v58 = vadd.f32 %v8412_v30, %v8411_v41  ;;  %v11221_v29 = vadd.f32 %v6039_v42, %v5116_v8 }
 0x36c   : > { %v8872_v24 = vpop.f32.mrf.mxu1 }
 0x36d   : > { %v11219_v40 = vadd.f32 %v6034_v32, %v5115_v33  ;;  %v6042_v57 = vadd.f32 %v8869_v55, %v8413_v58  ;;  %v5119_v55 = vadd.f32 %v11208_v0, %v5007_v18 }
 0x36e   : > { %v6046_v38 = vpop.f32.mrf.mxu1  ;;  %v8414_v22 = vpop.f32.mrf.mxu0 }
 0x36f   : > { %v11225_v60 = vadd.f32 %v6042_v57, %v5117_v49  ;;  %v5121_v49 = vadd.f32 %v11208_v0, %v11115_v21 }
 0x370   : > { %v8873_v28 = vpop.f32.mrf.mxu1  ;;  %v8415_v47 = vpop.f32.mrf.mxu0 }
 0x371   : > { %v8416_v16 = vadd.f32 %v8415_v47, %v8414_v22 }
 0x372   : > { %v6049_v56 = vpop.f32.mrf.mxu1  ;;  %v8417_v19 = vpop.f32.mrf.mxu0 }
 0x373   : > { %v6047_v31 = vadd.f32 %v8416_v16, %v6046_v38 }
 0x374   : > { %v8876_v36 = vpop.f32.mrf.mxu1  ;;  %v8418_v34 = vpop.f32.mrf.mxu0 }
 0x375   : > { %v8419_v35 = vadd.f32 %v8418_v34, %v8417_v19  ;;  %v11231_v1 = vadd.f32 %v6047_v31, %v5118_v15  ;;  %v5122_v15 = vadd.f32 %v11208_v0, %v11127_v46 }
 0x376   : > { %v6062_v10 = vpop.f32.mrf.mxu1  ;;  %v8420_v2 = vpop.f32.mrf.mxu0 }
 0x377   : > { %v6050_v25 = vadd.f32 %v8419_v35, %v6049_v56 }
 0x378   : > { %v8877_v53 = vpop.f32.mrf.mxu1  ;;  %v8421_v62 = vpop.f32.mrf.mxu0 }
 0x379   : > { %v8422_v41 = vadd.f32 %v8421_v62, %v8420_v2  ;;  %v11234_v8 = vadd.f32 %v6050_v25, %v5119_v55  ;;  %v5123_v55 = vadd.f32 %v11208_v0, %v11132_v45 }
 0x37a   : > { %v6065_v27 = vpop.f32.mrf.mxu1  ;;  %v8423_v33 = vpop.f32.mrf.mxu0 }
 0x37b   : > { %v6055_v43 = vadd.f32 %v8872_v24, %v8422_v41 }
 0x37c   : > { %v11238_v32 = vpop.f32.mrf.mxu1  ;;  %v8424_v42 = vpop.f32.mrf.mxu0 }
 0x37d   : > { %v8425_v30 = vadd.f32 %v8424_v42, %v8423_v33  ;;  %v11240_v58 = vadd.f32 %v6055_v43, %v5120_v63  ;;  %v5124_v43 = vadd.f32 %v11208_v0, %v11130_v61 }
 0x37e   : > { %v6078_v38 = vpop.f32.mrf.mxu1  ;;  %v8426_v22 = vpop.f32.mrf.mxu0 }
 0x37f   : > { %v6058_v57 = vadd.f32 %v8873_v28, %v8425_v30 }
 0x380   : > { %v11244_v47 = vpop.f32.mrf.mxu1  ;;  %v8427_v16 = vpop.f32.mrf.mxu0 }
 0x381   : > { %v8428_v56 = vadd.f32 %v8427_v16, %v8426_v22  ;;  %v11246_v19 = vadd.f32 %v6058_v57, %v5121_v49  ;;  %v5125_v16 = vadd.f32 %v11208_v0, %v11139_v7 }
 0x382   : > { %v6081_v48 = vpop.f32.mrf.mxu1  ;;  %v8429_v24 = vpop.f32.mrf.mxu0 }
 0x383   : > { %v6063_v18 = vadd.f32 %v8428_v56, %v6062_v10 }
 0x384   : > { %v11250_v31 = vpop.f32.mrf.mxu1  ;;  %v8430_v34 = vpop.f32.mrf.mxu0 }
 0x385   : > { %v8431_v35 = vadd.f32 %v8430_v34, %v8429_v24  ;;  %v11252_v2 = vadd.f32 %v6063_v18, %v5122_v15 }
 0x386   : > { %v6094_v21 = vpop.f32.mrf.mxu1  ;;  %v8432_v28 = vpop.f32.mrf.mxu0 }
 0x387   : > { %v6066_v25 = vadd.f32 %v8431_v35, %v6065_v27  ;;  %v5126_v35 = vadd.f32 %v11208_v0, %v11149_v39 }
 0x388   : > { %v11256_v62 = vpop.f32.mrf.mxu1  ;;  %v8433_v41 = vpop.f32.mrf.mxu0 }
 0x389   : > { %v8434_v33 = vadd.f32 %v8433_v41, %v8432_v28  ;;  %v11258_v63 = vadd.f32 %v6066_v25, %v5123_v55 }
 0x38a   : > { %v6097_v46 = vpop.f32.mrf.mxu1  ;;  %v8435_v10 = vpop.f32.mrf.mxu0 }
 0x38b   : > { %v6071_v42 = vadd.f32 %v8876_v36, %v8434_v33 }
 0x38c   : > { %v11262_v30 = vpop.f32.mrf.mxu1  ;;  %v8436_v22 = vpop.f32.mrf.mxu0 }
 0x38d   : > { %v8437_v49 = vadd.f32 %v8436_v22, %v8435_v10  ;;  %v11264_v57 = vadd.f32 %v6071_v42, %v5124_v43  ;;  %v5127_v10 = vadd.f32 %v11208_v0, %v11154_v44 }
 0x38e   : > { %v11266_v45 = vpop.f32.mrf.mxu1  ;;  %v8438_v27 = vpop.f32.mrf.mxu0 }
 0x38f   : > { %v6074_v56 = vadd.f32 %v8877_v53, %v8437_v49 }
 0x390   : > { %v11270_v24 = vpop.f32.mrf.mxu1  ;;  %v8439_v15 = vpop.f32.mrf.mxu0 }
 0x391   : > { %v8440_v18 = vadd.f32 %v8439_v15, %v8438_v27  ;;  %v11272_v34 = vadd.f32 %v6074_v56, %v5125_v16  ;;  %v5128_v16 = vadd.f32 %v11208_v0, %v11152_v51 }
 0x392   : > { %v11274_v61 = vpop.f32.mrf.mxu1  ;;  %v8441_v36 = vpop.f32.mrf.mxu0 }
 0x393   : > { %v6079_v28 = vadd.f32 %v8440_v18, %v6078_v38 }
 0x394   : > { %v11278_v55 = vpop.f32.mrf.mxu1  ;;  %v8442_v25 = vpop.f32.mrf.mxu0 }
 0x395   : > { %v8443_v41 = vadd.f32 %v8442_v25, %v8441_v36  ;;  %v11280_v33 = vadd.f32 %v6079_v28, %v5126_v35  ;;  %v5129_v28 = vadd.f32 %v11208_v0, %v11158_v5 }
 0x396   : > { %v11282_v7 = vpop.f32.mrf.mxu1  ;;  %v8444_v53 = vpop.f32.mrf.mxu0 }
 0x397   : > { %v6082_v43 = vadd.f32 %v8443_v41, %v6081_v48 }
 0x398   : > { %v11286_v42 = vpop.f32.mrf.mxu1  ;;  %v8445_v22 = vpop.f32.mrf.mxu0 }
 0x399   : > { %v8446_v49 = vadd.f32 %v8445_v22, %v8444_v53  ;;  %v11288_v27 = vadd.f32 %v6082_v43, %v5127_v10  ;;  %v5130_v22 = vadd.f32 %v11208_v0, %v11165_v9 }
 0x39a   : > { %v11290_v39 = vpop.f32.mrf.mxu1  ;;  %v8447_v38 = vpop.f32.mrf.mxu0 }
 0x39b   : > { %11732 = vst [vmem:[#allocation20_spill] sm:$0xff] %v11288_v27  ;;  %v6087_v56 = vadd.f32 %v11238_v32, %v8446_v49 }
 0x39c   : > { %v11295_v15 = vpop.f32.mrf.mxu1  ;;  %v8448_v18 = vpop.f32.mrf.mxu0 }
 0x39d   : > { %v8449_v36 = vadd.f32 %v8448_v18, %v8447_v38  ;;  %v11297_v44 = vadd.f32 %v6087_v56, %v5128_v16 }
 0x39e   : > { %v11299_v48 = vpop.f32.mrf.mxu1  ;;  %v8450_v35 = vpop.f32.mrf.mxu0 }
 0x39f   : > { %v6090_v25 = vadd.f32 %v11244_v47, %v8449_v36  ;;  %v5131_v36 = vadd.f32 %v11208_v0, %v11170_v37 }
 0x3a0   : > { %v11304_v41 = vpop.f32.mrf.mxu1  ;;  %v8451_v53 = vpop.f32.mrf.mxu0 }
 0x3a1   : > { %v8452_v51 = vadd.f32 %v8451_v53, %v8450_v35  ;;  %v11306_v10 = vadd.f32 %v6090_v25, %v5129_v28 }
 0x3a2   : > { %v11308_v32 = vpop.f32.mrf.mxu1  ;;  %v8453_v43 = vpop.f32.mrf.mxu0 }
 0x3a3   : > { %v6095_v49 = vadd.f32 %v8452_v51, %v6094_v21  ;;  %v5132_v51 = vadd.f32 %v11208_v0, %v11168_v59 }
 0x3a4   : > { %v11312_v38 = vpop.f32.mrf.mxu1  ;;  %v8454_v16 = vpop.f32.mrf.mxu0 }
 0x3a5   : > { %v8455_v56 = vadd.f32 %v8454_v16, %v8453_v43  ;;  %v11314_v5 = vadd.f32 %v6095_v49, %v5130_v22 }
 0x3a6   : > { %v11316_v47 = vpop.f32.mrf.mxu1  ;;  %v8456_v18 = vpop.f32.mrf.mxu0 }
 0x3a7   : > { %11733 = vst [vmem:[#allocation17_spill] sm:$0xff] %v11314_v5  ;;  %v6098_v35 = vadd.f32 %v8455_v56, %v6097_v46 }
 0x3a8   : > { %v11320_v28 = vpop.f32.mrf.mxu1  ;;  %v8457_v25 = vpop.f32.mrf.mxu0 }
 0x3a9   : > { %v8458_v53 = vadd.f32 %v8457_v25, %v8456_v18  ;;  %v11322_v27 = vadd.f32 %v6098_v35, %v5131_v36  ;;  %v5133_v18 = vadd.f32 %v11208_v0, %v11173_v4 }
 0x3aa   : > { %v11324_v9 = vpop.f32.mrf.mxu1  ;;  %v8459_v21 = vpop.f32.mrf.mxu0 }
 0x3ab   : > { %11734 = vst [vmem:[#allocation19_spill] sm:$0xff] %v11322_v27  ;;  %v6103_v43 = vadd.f32 %v11250_v31, %v8458_v53 }
 0x3ac   : > { %v11329_v22 = vpop.f32.mrf.mxu1  ;;  %v8460_v49 = vpop.f32.mrf.mxu0 }
 0x3ad   : > { %v8461_v16 = vadd.f32 %v8460_v49, %v8459_v21  ;;  %v11331_v37 = vadd.f32 %v6103_v43, %v5132_v51  ;;  %v5134_v21 = vadd.f32 %v11208_v0, %v11177_v3 }
 0x3ae   : > { %v11333_v46 = vpop.f32.mrf.mxu1  ;;  %v8462_v56 = vpop.f32.mrf.mxu0 }
 0x3af   : > { %v6106_v36 = vadd.f32 %v11256_v62, %v8461_v16 }
 0x3b0   : > { %v11338_v35 = vpop.f32.mrf.mxu1  ;;  %v8463_v25 = vpop.f32.mrf.mxu0 }
 0x3b1   : > { %v8464_v59 = vadd.f32 %v8463_v25, %v8462_v56  ;;  %v11340_v27 = vadd.f32 %v6106_v36, %v5133_v18  ;;  %v5135_v56 = vadd.f32 %v11208_v0, %v11181_v6 }
 0x3b2   : > { %v11342_v31 = vpop.f32.mrf.mxu1  ;;  %v8465_v53 = vpop.f32.mrf.mxu0 }
 0x3b3   : > { %11735 = vst [vmem:[#allocation21_spill] sm:$0xff] %v11340_v27  ;;  %v6111_v51 = vadd.f32 %v8464_v59, %v11266_v45 }
 0x3b4   : > { %v11347_v43 = vpop.f32.mrf.mxu1  ;;  %v8466_v49 = vpop.f32.mrf.mxu0 }
 0x3b5   : > { %v8467_v4 = vadd.f32 %v8466_v49, %v8465_v53  ;;  %v11349_v5 = vadd.f32 %v6111_v51, %v5134_v21  ;;  %v5136_v53 = vadd.f32 %v11208_v0, %v11179_v52 }
 0x3b6   : > { %v11351_v62 = vpop.f32.mrf.mxu1  ;;  %v8468_v16 = vpop.f32.mrf.mxu0 }
 0x3b7   : > { %11736 = vst [vmem:[#allocation23_spill] sm:$0xff] %v11349_v5  ;;  %v6114_v18 = vadd.f32 %v8467_v4, %v11274_v61 }
 0x3b8   : > { %v11356_v36 = vpop.f32.mrf.mxu1  ;;  %v8469_v25 = vpop.f32.mrf.mxu0 }
 0x3b9   : > { %v8470_v3 = vadd.f32 %v8469_v25, %v8468_v16  ;;  %v11358_v27 = vadd.f32 %v6114_v18, %v5135_v56  ;;  %v5137_v16 = vadd.f32 %v11208_v0, %v11184_v54 }
 0x3ba   : > { %v11360_v45 = vpop.f32.mrf.mxu1  ;;  %v8471_v59 = vpop.f32.mrf.mxu0 }
 0x3bb   : > { %11737 = vst [vmem:[#allocation26_spill] sm:$0xff] %v11358_v27  ;;  %v6119_v21 = vadd.f32 %v11262_v30, %v8470_v3 }
 0x3bc   : > { %v11365_v51 = vpop.f32.mrf.mxu1  ;;  %v8472_v49 = vpop.f32.mrf.mxu0 }
 0x3bd   : > { %v8473_v6 = vadd.f32 %v8472_v49, %v8471_v59  ;;  %v11367_v5 = vadd.f32 %v6119_v21, %v5136_v53  ;;  %v5138_v59 = vadd.f32 %v11208_v0, %v11187_v13 }
 0x3be   : > { %v11369_v61 = vpop.f32.mrf.mxu1  ;;  %v8474_v4 = vpop.f32.mrf.mxu0 }
 0x3bf   : > { %11738 = vst [vmem:[#allocation22_spill] sm:$0xff] %v11367_v5  ;;  %v6122_v56 = vadd.f32 %v11270_v24, %v8473_v6 }
 0x3c0   : > { %v11374_v18 = vpop.f32.mrf.mxu1  ;;  %v8475_v25 = vpop.f32.mrf.mxu0 }
 0x3c1   : > { %v8476_v52 = vadd.f32 %v8475_v25, %v8474_v4  ;;  %v11376_v27 = vadd.f32 %v6122_v56, %v5137_v16  ;;  %v5139_v4 = vadd.f32 %v11208_v0, %v11192_v50 }
 0x3c2   : > { %v11378_v30 = vpop.f32.mrf.mxu1  ;;  %v8477_v3 = vpop.f32.mrf.mxu0 }
 0x3c3   : > { %11739 = vst [vmem:[#allocation18_spill] sm:$0xff] %v11376_v27  ;;  %v6127_v53 = vadd.f32 %v8476_v52, %v11282_v7 }
 0x3c4   : > { %v11383_v21 = vpop.f32.mrf.mxu1  ;;  %v8478_v49 = vpop.f32.mrf.mxu0 }
 0x3c5   : > { %v8479_v54 = vadd.f32 %v8478_v49, %v8477_v3  ;;  %v11385_v5 = vadd.f32 %v6127_v53, %v5138_v59  ;;  %v5140_v3 = vadd.f32 %v11208_v0, %v11190_v17 }
 0x3c6   : > { %v11387_v24 = vpop.f32.mrf.mxu1  ;;  %v8480_v6 = vpop.f32.mrf.mxu0 }
 0x3c7   : > { %11740 = vst [vmem:[#allocation25_spill] sm:$0xff] %v11385_v5  ;;  %v6130_v16 = vadd.f32 %v8479_v54, %v11290_v39 }
 0x3c8   : > { %v11392_v56 = vpop.f32.mrf.mxu1  ;;  %v8481_v25 = vpop.f32.mrf.mxu0 }
 0x3c9   : > { %v8482_v13 = vadd.f32 %v8481_v25, %v8480_v6  ;;  %v11394_v27 = vadd.f32 %v6130_v16, %v5139_v4  ;;  %v5141_v6 = vadd.f32 %v11208_v0, %v11195_v11 }
 0x3ca   : > { %v11396_v7 = vpop.f32.mrf.mxu1  ;;  %v8483_v52 = vpop.f32.mrf.mxu0 }
 0x3cb   : > { %11741 = vst [vmem:[#allocation27_spill] sm:$0xff] %v11394_v27  ;;  %v6135_v59 = vadd.f32 %v11278_v55, %v8482_v13 }
 0x3cc   : > { %v11401_v53 = vpop.f32.mrf.mxu1  ;;  %v8484_v49 = vpop.f32.mrf.mxu0 }
 0x3cd   : > { %v8485_v50 = vadd.f32 %v8484_v49, %v8483_v52  ;;  %v11403_v5 = vadd.f32 %v6135_v59, %v5140_v3  ;;  %v5142_v52 = vadd.f32 %v11208_v0, %v11197_v12 }
 0x3ce   : > { %v11405_v39 = vpop.f32.mrf.mxu1  ;;  %v8486_v54 = vpop.f32.mrf.mxu0 }
 0x3cf   : > { %11742 = vst [vmem:[#allocation28_spill] sm:$0xff] %v11403_v5  ;;  %v6138_v4 = vadd.f32 %v11286_v42, %v8485_v50 }
 0x3d0   : > { %v11410_v16 = vpop.f32.mrf.mxu1  ;;  %v8487_v25 = vpop.f32.mrf.mxu0 }
 0x3d1   : > { %v8488_v17 = vadd.f32 %v8487_v25, %v8486_v54  ;;  %v11412_v27 = vadd.f32 %v6138_v4, %v5141_v6  ;;  %v5143_v54 = vadd.f32 %v11208_v0, %v11199_v20 }
 0x3d2   : > { %v11414_v55 = vpop.f32.mrf.mxu1  ;;  %v8489_v13 = vpop.f32.mrf.mxu0 }
 0x3d3   : > { %11743 = vst [vmem:[#allocation16_spill] sm:$0xff] %v11412_v27  ;;  %v6143_v3 = vadd.f32 %v8488_v17, %v11299_v48 }
 0x3d4   : > { %v11419_v59 = vpop.f32.mrf.mxu1  ;;  %v8490_v49 = vpop.f32.mrf.mxu0 }
 0x3d5   : > { %v8491_v11 = vadd.f32 %v8490_v49, %v8489_v13  ;;  %v11421_v5 = vadd.f32 %v6143_v3, %v5142_v52  ;;  %v5144_v13 = vadd.f32 %v11208_v0, %v11201_v14  ;;  %v8540_v14 = vadd.f32 %v11316_v47, %v11312_v38 }
 0x3d6   : > { %v11423_v42 = vpop.f32.mrf.mxu1  ;;  %v8492_v50 = vpop.f32.mrf.mxu0 }
 0x3d7   : > { %v6146_v6 = vadd.f32 %v8491_v11, %v11308_v32  ;;  %v8546_v32 = vadd.f32 %v11333_v46, %v11329_v22  ;;  %v7136_v22 = vld [vmem:[%s9668_s30 + $0x10] sm:$0xff] }
 0x3d8   : > { %v11428_v4 = vpop.f32.mrf.mxu1  ;;  %v8493_v25 = vpop.f32.mrf.mxu0 }
 0x3d9   : > { %v8494_v12 = vadd.f32 %v8493_v25, %v8492_v50  ;;  %v11430_v27 = vadd.f32 %v6146_v6, %v5143_v54  ;;  %v5145_v6 = vadd.f32 %v11208_v0, %v11203_v23  ;;  %v7134_v0 = vld [vmem:[%s9668_s30] sm:$0xff] }
 0x3da   : > { %v11432_v48 = vpop.f32.mrf.mxu1  ;;  %v8495_v17 = vpop.f32.mrf.mxu0 }
 0x3db   : > { %v6151_v52 = vadd.f32 %v11295_v15, %v8494_v12 }
 0x3dc   : > { %v11437_v3 = vpop.f32.mrf.mxu1  ;;  %v8496_v20 = vpop.f32.mrf.mxu0 }
 0x3dd   : > { %v11441_v49 = vadd.f32 %v6151_v52, %v5144_v13  ;;  %v8497_v11 = vadd.f32 %v8496_v20, %v8495_v17  ;;  %v8549_v17 = vadd.f32 %v11342_v31, %v11338_v35  ;;  %v7137_v35 = vld [vmem:[%s9668_s30 + $0x18] sm:$0xff] }
 0x3de   : > { %v11443_v50 = vpop.f32.mrf.mxu1  ;;  %v8916_v54 = vpop.f32.mrf.mxu0 }
 0x3df   : > { %v6154_v15 = vadd.f32 %v11304_v41, %v8497_v11  ;;  %v6920_v25 = vadd.f32 %v8916_v54, %v8546_v32  ;;  %v8543_v41 = vadd.f32 %v11324_v9, %v11320_v28  ;;  %v7135_v28 = vld [vmem:[%s9668_s30 + $0x8] sm:$0xff] }
 0x3e0   : > { %v11450_v12 = vpop.f32.mrf.mxu1  ;;  %v6911_v46 = vpop.f32.mrf.mxu0 }
 0x3e1   : > { %v11455_v13 = vadd.f32 %v6154_v15, %v5145_v6  ;;  %v7040_v52 = vadd.f32 %v6920_v25, %v11221_v29  ;;  %v6912_v20 = vadd.f32 %v8540_v14, %v6911_v46  ;;  %v8558_v25 = vadd.f32 %v11369_v61, %v11365_v51 }
 0x3e2   : > { %v11458_v23 = vpop.f32.mrf.mxu1  ;;  %v8917_v38 = vpop.f32.mrf.mxu0 }
 0x3e3   : > { %v7168_v47 = vadd.f32 %v7136_v22, %v7040_v52  ;;  %v7038_v32 = vadd.f32 %v6912_v20, %v11214_v26  ;;  %v6923_v11 = vadd.f32 %v8917_v38, %v8549_v17  ;;  %v8552_v26 = vadd.f32 %v11351_v62, %v11347_v43 }
 0x3e4   : > { %v11464_v54 = vpop.f32.mrf.mxu1  ;;  %v6914_v31 = vpop.f32.mrf.mxu0  ;;  %v8561_v20 = vadd.f32 %v11378_v30, %v11374_v18 }
 0x3e5   : > { %v7200_v6 = vmax.f32 %v7168_v47, 0.0  ;;  %v7166_v29 = vadd.f32 %v7134_v0, %v7038_v32  ;;  %v7041_v14 = vadd.f32 %v6923_v11, %v11225_v60  ;;  %v6915_v15 = vadd.f32 %v8543_v41, %v6914_v31  ;;  %v7140_v0 = vld [vmem:[%s9668_s30 + $0x30] sm:$0xff]  ;;  %v7138_v32 = vld [vmem:[%s9668_s30 + $0x20] sm:$0xff] }
 0x3e6   : > { %v11470_v46 = vpop.f32.mrf.mxu1  ;;  %v8920_v9 = vpop.f32.mrf.mxu0  ;;  %v8555_v11 = vadd.f32 %v11360_v45, %v11356_v36  ;;  %v8570_v36 = vadd.f32 %v11405_v39, %v11401_v53  ;;  %v8573_v39 = vadd.f32 %v11414_v55, %v11410_v16 }
 0x3e7   : > { %7232 = vst [vmem:[%s11477_s11 + $0x10] sm:$0xff] %v7200_v6  ;;  %v7198_v60 = vmax.f32 %v7166_v29, 0.0  ;;  %v7169_v22 = vadd.f32 %v7137_v35, %v7041_v14  ;;  %v7039_v51 = vadd.f32 %v6915_v15, %v11219_v40  ;;  %v6936_v17 = vadd.f32 %v8920_v9, %v8558_v25  ;;  %v7141_v29 = vld [vmem:[%s9668_s30 + $0x38] sm:$0xff] }
 0x3e8   : > { %v11481_v61 = vpop.f32.mrf.mxu1  ;;  %v6927_v52 = vpop.f32.mrf.mxu0 }
 0x3e9   : > { %7230 = vst [vmem:[%s11477_s11] sm:$0xff] %v7198_v60  ;;  %v7201_v43 = vmax.f32 %v7169_v22, 0.0  ;;  %v7167_v62 = vadd.f32 %v7135_v28, %v7039_v51  ;;  %v6928_v38 = vadd.f32 %v8552_v26, %v6927_v52  ;;  %v7044_v47 = vadd.f32 %v6936_v17, %v11240_v58 }
 0x3ea   : > { %v11487_v41 = vpop.f32.mrf.mxu1  ;;  %v8921_v40 = vpop.f32.mrf.mxu0  ;;  %v8564_v26 = vadd.f32 %v11387_v24, %v11383_v21  ;;  %v7144_v21 = vld [vmem:[%s9668_s30 + $0x50] sm:$0xff] }
 0x3eb   : > { %7233 = vst [vmem:[%s11477_s11 + $0x18] sm:$0xff] %v7201_v43  ;;  %v7199_v35 = vmax.f32 %v7167_v62, 0.0  ;;  %v7042_v18 = vadd.f32 %v6928_v38, %v11231_v1  ;;  %v6939_v30 = vadd.f32 %v8921_v40, %v8561_v20  ;;  %v7172_v6 = vadd.f32 %v7140_v0, %v7044_v47  ;;  %v7139_v1 = vld [vmem:[%s9668_s30 + $0x28] sm:$0xff]  ;;  %v7142_v62 = vld [vmem:[%s9668_s30 + $0x40] sm:$0xff] }
 0x3ec   : > { %v11495_v31 = vpop.f32.mrf.mxu1  ;;  %v6930_v14 = vpop.f32.mrf.mxu0  ;;  %v8567_v38 = vadd.f32 %v11396_v7, %v11392_v56  ;;  %v8582_v56 = vadd.f32 %v11443_v50, %v11437_v3  ;;  %v8585_v50 = vadd.f32 %v11458_v23, %v11450_v12 }
 0x3ed   : > { %7231 = vst [vmem:[%s11477_s11 + $0x8] sm:$0xff] %v7199_v35  ;;  %v7170_v15 = vadd.f32 %v7138_v32, %v7042_v18  ;;  %v7045_v58 = vadd.f32 %v6939_v30, %v11246_v19  ;;  %v6931_v25 = vadd.f32 %v8555_v11, %v6930_v14  ;;  %v7204_v45 = vmax.f32 %v7172_v6, 0.0  ;;  %v7145_v11 = vld [vmem:[%s9668_s30 + $0x58] sm:$0xff] }
 0x3ee   : > { %v11502_v28 = vpop.f32.mrf.mxu1  ;;  %v8924_v9 = vpop.f32.mrf.mxu0  ;;  %v8576_v14 = vadd.f32 %v11423_v42, %v11419_v59  ;;  %v7148_v59 = vld [vmem:[%s9668_s30 + $0x70] sm:$0xff] }
 0x3ef   : > { %v7202_v60 = vmax.f32 %v7170_v15, 0.0  ;;  %v7173_v22 = vadd.f32 %v7141_v29, %v7045_v58  ;;  %v7043_v51 = vadd.f32 %v6931_v25, %v11234_v8  ;;  %7236 = vst [vmem:[%s11477_s11 + $0x30] sm:$0xff] %v7204_v45  ;;  %v6952_v17 = vadd.f32 %v8924_v9, %v8570_v36 }
 0x3f0   : > { %v11509_v19 = vpop.f32.mrf.mxu1  ;;  %v6943_v53 = vpop.f32.mrf.mxu0 }
 0x3f1   : > { %7234 = vst [vmem:[%s11477_s11 + $0x20] sm:$0xff] %v7202_v60  ;;  %v7205_v52 = vmax.f32 %v7173_v22, 0.0  ;;  %v7171_v20 = vadd.f32 %v7139_v1, %v7043_v51  ;;  %v6944_v24 = vadd.f32 %v8564_v26, %v6943_v53  ;;  %v7048_v8 = vadd.f32 %v6952_v17, %v11264_v57  ;;  %v7146_v26 = vld [vmem:[%s9668_s30 + $0x60] sm:$0xff] }
 0x3f2   : > { %v11515_v43 = vpop.f32.mrf.mxu1  ;;  %v8925_v0 = vpop.f32.mrf.mxu0  ;;  %v8579_v22 = vadd.f32 %v11432_v48, %v11428_v4  ;;  %v8594_v4 = vadd.f32 %v11502_v28, %v11495_v31 }
 0x3f3   : > { %7237 = vst [vmem:[%s11477_s11 + $0x38] sm:$0xff] %v7205_v52  ;;  %v7203_v47 = vmax.f32 %v7171_v20, 0.0  ;;  %v7046_v16 = vadd.f32 %v6944_v24, %v11252_v2  ;;  %v6955_v55 = vadd.f32 %v8925_v0, %v8573_v39  ;;  %v7176_v40 = vadd.f32 %v7144_v21, %v7048_v8  ;;  %v7143_v2 = vld [vmem:[%s9668_s30 + $0x48] sm:$0xff]  ;;  %v7149_v39 = vld [vmem:[%s9668_s30 + $0x78] sm:$0xff] }
 0x3f4   : > { %v11523_v32 = vpop.f32.mrf.mxu1  ;;  %v6946_v35 = vpop.f32.mrf.mxu0  ;;  %v7147_v8 = vld [vmem:[%s9668_s30 + $0x68] sm:$0xff]  ;;  %v8597_v31 = vadd.f32 %v11515_v43, %v11509_v19 }
 0x3f5   : > { %7235 = vst [vmem:[%s11477_s11 + $0x28] sm:$0xff] %v7203_v47  ;;  %v7174_v18 = vadd.f32 %v7142_v62, %v7046_v16  ;;  %v7049_v57 = vadd.f32 %v6955_v55, %v11272_v34  ;;  %v6947_v30 = vadd.f32 %v8567_v38, %v6946_v35  ;;  %v7208_v7 = vmax.f32 %v7176_v40, 0.0  ;;  %v11744_v47 = vld [vmem:[#allocation20_spill] sm:$0xff]  ;;  %v7152_v35 = vld [vmem:[%s9668_s30 + $0x90] sm:$0xff] }
 0x3f6   : > { %v11530_v6 = vpop.f32.mrf.mxu1  ;;  %v8928_v29 = vpop.f32.mrf.mxu0  ;;  %v8588_v62 = vadd.f32 %v11470_v46, %v11464_v54 }
 0x3f7   : > { %v7206_v15 = vmax.f32 %v7174_v18, 0.0  ;;  %v7177_v58 = vadd.f32 %v7145_v11, %v7049_v57  ;;  %v7047_v25 = vadd.f32 %v6947_v30, %v11258_v63  ;;  %7240 = vst [vmem:[%s11477_s11 + $0x50] sm:$0xff] %v7208_v7  ;;  %v6968_v36 = vadd.f32 %v8928_v29, %v8582_v56  ;;  %v7150_v57 = vld [vmem:[%s9668_s30 + $0x80] sm:$0xff] }
 0x3f8   : > { %v11537_v34 = vpop.f32.mrf.mxu1  ;;  %v6959_v3 = vpop.f32.mrf.mxu0  ;;  %v8591_v56 = vadd.f32 %v11487_v41, %v11481_v61  ;;  %v7151_v41 = vld [vmem:[%s9668_s30 + $0x88] sm:$0xff] }
 0x3f9   : > { %7238 = vst [vmem:[%s11477_s11 + $0x40] sm:$0xff] %v7206_v15  ;;  %v7209_v45 = vmax.f32 %v7177_v58, 0.0  ;;  %v7175_v1 = vadd.f32 %v7143_v2, %v7047_v25  ;;  %v6960_v42 = vadd.f32 %v8576_v14, %v6959_v3  ;;  %v7052_v63 = vadd.f32 %v6968_v36, %v11297_v44  ;;  %v11745_v2 = vld [vmem:[#allocation17_spill] sm:$0xff]  ;;  %v7153_v15 = vld [vmem:[%s9668_s30 + $0x98] sm:$0xff] }
 0x3fa   : > { %v11543_v9 = vpop.f32.mrf.mxu1  ;;  %v8929_v60 = vpop.f32.mrf.mxu0  ;;  %v11746_v36 = vld [vmem:[#allocation21_spill] sm:$0xff] }
 0x3fb   : > { %7241 = vst [vmem:[%s11477_s11 + $0x58] sm:$0xff] %v7209_v45  ;;  %v7207_v51 = vmax.f32 %v7175_v1, 0.0  ;;  %v7050_v12 = vadd.f32 %v6960_v42, %v11280_v33  ;;  %v6971_v23 = vadd.f32 %v8929_v60, %v8585_v50  ;;  %v7180_v53 = vadd.f32 %v7148_v59, %v7052_v63 }
 0x3fc   : > { %v8604_v17 = vpop.f32.mrf.mxu1  ;;  %v6962_v52 = vpop.f32.mrf.mxu0  ;;  %v8600_v59 = vadd.f32 %v11530_v6, %v11523_v32  ;;  %v11748_v32 = vld [vmem:[#allocation22_spill] sm:$0xff] }
 0x3fd   : > { %7239 = vst [vmem:[%s11477_s11 + $0x48] sm:$0xff] %v7207_v51  ;;  %v7178_v20 = vadd.f32 %v7146_v26, %v7050_v12  ;;  %v7053_v44 = vadd.f32 %v6971_v23, %v11306_v10  ;;  %v6963_v21 = vadd.f32 %v8579_v22, %v6962_v52  ;;  %v7212_v48 = vmax.f32 %v7180_v53, 0.0  ;;  %v11747_v26 = vld [vmem:[#allocation19_spill] sm:$0xff] }
 0x3fe   : > { %v8605_v24 = vpop.f32.mrf.mxu1  ;;  %v8932_v33 = vpop.f32.mrf.mxu0 }
 0x3ff   : > { %v7210_v0 = vmax.f32 %v7178_v20, 0.0  ;;  %v7181_v38 = vadd.f32 %v7149_v39, %v7053_v44  ;;  %v7051_v16 = vadd.f32 %v6963_v21, %v11744_v47  ;;  %7244 = vst [vmem:[%s11477_s11 + $0x70] sm:$0xff] %v7212_v48  ;;  %v6984_v55 = vadd.f32 %v8932_v33, %v8594_v4  ;;  %v7156_v39 = vld [vmem:[%s9668_s30 + $0xb0] sm:$0xff]  ;;  %v7154_v44 = vld [vmem:[%s9668_s30 + $0xa0] sm:$0xff] }
 0x400   : > { %v8607_v10 = vpop.f32.mrf.mxu1  ;;  %v6975_v40 = vpop.f32.mrf.mxu0  ;;  %v8606_v50 = vadd.f32 %v8605_v24, %v8604_v17  ;;  %v8603_v4 = vadd.f32 %v11543_v9, %v11537_v34  ;;  %v11749_v24 = vld [vmem:[#allocation23_spill] sm:$0xff]  ;;  %v7155_v9 = vld [vmem:[%s9668_s30 + $0xa8] sm:$0xff] }
 0x401   : > { %7242 = vst [vmem:[%s11477_s11 + $0x60] sm:$0xff] %v7210_v0  ;;  %v7213_v28 = vmax.f32 %v7181_v38, 0.0  ;;  %v7179_v11 = vadd.f32 %v7147_v8, %v7051_v16  ;;  %v6976_v54 = vadd.f32 %v8588_v62, %v6975_v40  ;;  %v7056_v18 = vadd.f32 %v6984_v55, %v11331_v37  ;;  %v7157_v38 = vld [vmem:[%s9668_s30 + $0xb8] sm:$0xff] }
 0x402   : > { %v8608_v46 = vpop.f32.mrf.mxu1  ;;  %v8933_v30 = vpop.f32.mrf.mxu0 }
 0x403   : > { %7245 = vst [vmem:[%s11477_s11 + $0x78] sm:$0xff] %v7213_v28  ;;  %v7211_v7 = vmax.f32 %v7179_v11, 0.0  ;;  %v7054_v19 = vadd.f32 %v6976_v54, %v11745_v2  ;;  %v6987_v43 = vadd.f32 %v8933_v30, %v8597_v31  ;;  %v7184_v14 = vadd.f32 %v7152_v35, %v7056_v18  ;;  %v11751_v18 = vld [vmem:[#allocation26_spill] sm:$0xff] }
 0x404   : > { %v8610_v29 = vpop.f32.mrf.mxu1  ;;  %v6978_v58 = vpop.f32.mrf.mxu0  ;;  %v8609_v23 = vadd.f32 %v8608_v46, %v8607_v10  ;;  %v11750_v10 = vld [vmem:[#allocation18_spill] sm:$0xff] }
 0x405   : > { %7243 = vst [vmem:[%s11477_s11 + $0x68] sm:$0xff] %v7211_v7  ;;  %v7182_v25 = vadd.f32 %v7150_v57, %v7054_v19  ;;  %v7057_v37 = vadd.f32 %v6987_v43, %v11746_v36  ;;  %v6979_v3 = vadd.f32 %v8591_v56, %v6978_v58  ;;  %v7216_v45 = vmax.f32 %v7184_v14, 0.0  ;;  %v7158_v58 = vld [vmem:[%s9668_s30 + $0xc0] sm:$0xff] }
 0x406   : > { %v8611_v61 = vpop.f32.mrf.mxu1  ;;  %v8936_v1 = vpop.f32.mrf.mxu0 }
 0x407   : > { %v7214_v42 = vmax.f32 %v7182_v25, 0.0  ;;  %v7185_v63 = vadd.f32 %v7153_v15, %v7057_v37  ;;  %v7055_v60 = vadd.f32 %v6979_v3, %v11747_v26  ;;  %7248 = vst [vmem:[%s11477_s11 + $0x90] sm:$0xff] %v7216_v45  ;;  %v7000_v51 = vadd.f32 %v8936_v1, %v8606_v50  ;;  %v7160_v15 = vld [vmem:[%s9668_s30 + $0xd0] sm:$0xff]  ;;  %v11752_v3 = vld [vmem:[#allocation28_spill] sm:$0xff] }
 0x408   : > { %v8613_v22 = vpop.f32.mrf.mxu1  ;;  %v6991_v12 = vpop.f32.mrf.mxu0  ;;  %v8612_v31 = vadd.f32 %v8611_v61, %v8610_v29  ;;  %v11753_v45 = vld [vmem:[#allocation25_spill] sm:$0xff] }
 0x409   : > { %7246 = vst [vmem:[%s11477_s11 + $0x80] sm:$0xff] %v7214_v42  ;;  %v7217_v17 = vmax.f32 %v7185_v63, 0.0  ;;  %v7183_v53 = vadd.f32 %v7151_v41, %v7055_v60  ;;  %v6992_v52 = vadd.f32 %v8600_v59, %v6991_v12  ;;  %v7060_v6 = vadd.f32 %v7000_v51, %v11748_v32  ;;  %v11755_v32 = vld [vmem:[#allocation27_spill] sm:$0xff] }
 0x40a   : > { %v8614_v20 = vpop.f32.mrf.mxu1  ;;  %v8937_v21 = vpop.f32.mrf.mxu0 }
 0x40b   : > { %7249 = vst [vmem:[%s11477_s11 + $0x98] sm:$0xff] %v7217_v17  ;;  %v7215_v48 = vmax.f32 %v7183_v53, 0.0  ;;  %v7058_v8 = vadd.f32 %v6992_v52, %v11749_v24  ;;  %v7003_v33 = vadd.f32 %v8937_v21, %v8609_v23  ;;  %v7188_v0 = vadd.f32 %v7156_v39, %v7060_v6  ;;  %v11754_v53 = vld [vmem:[#allocation16_spill] sm:$0xff] }
 0x40c   : > { %v8616_v62 = vpop.f32.mrf.mxu1  ;;  %v6994_v47 = vpop.f32.mrf.mxu0  ;;  %v8615_v29 = vadd.f32 %v8614_v20, %v8613_v22  ;;  %v7161_v22 = vld [vmem:[%s9668_s30 + $0xd8] sm:$0xff]  ;;  %v7159_v52 = vld [vmem:[%s9668_s30 + $0xc8] sm:$0xff] }
 0x40d   : > { %7247 = vst [vmem:[%s11477_s11 + $0x88] sm:$0xff] %v7215_v48  ;;  %v7186_v16 = vadd.f32 %v7154_v44, %v7058_v8  ;;  %v7061_v55 = vadd.f32 %v7003_v33, %v11750_v10  ;;  %v6995_v40 = vadd.f32 %v8603_v4, %v6994_v47  ;;  %v7220_v28 = vmax.f32 %v7188_v0, 0.0  ;;  %v7162_v8 = vld [vmem:[%s9668_s30 + $0xe0] sm:$0xff] }
 0x40e   : > { %v8617_v34 = vpop.f32.mrf.mxu1  ;;  %v8940_v11 = vpop.f32.mrf.mxu0 }
 0x40f   : > { %v8618_v35 = vadd.f32 %v8617_v34, %v8616_v62  ;;  %v7218_v54 = vmax.f32 %v7186_v16, 0.0  ;;  %v7189_v46 = vadd.f32 %v7157_v38, %v7061_v55  ;;  %v7059_v57 = vadd.f32 %v6995_v40, %v11751_v18  ;;  %7252 = vst [vmem:[%s11477_s11 + $0xb0] sm:$0xff] %v7220_v28  ;;  %v7163_v28 = vld [vmem:[%s9668_s30 + $0xe8] sm:$0xff] }
 0x410   : > { %v8619_v30 = vpop.f32.mrf.mxu1  ;;  %v7007_v56 = vpop.f32.mrf.mxu0 }
 0x411   : > { %7250 = vst [vmem:[%s11477_s11 + $0xa0] sm:$0xff] %v7218_v54  ;;  %v7221_v7 = vmax.f32 %v7189_v46, 0.0  ;;  %v7187_v2 = vadd.f32 %v7155_v9, %v7059_v57  ;;  %v7016_v19 = vadd.f32 %v8940_v11, %v8618_v35  ;;  %v7008_v43 = vadd.f32 %v8612_v31, %v7007_v56  ;;  %v7164_v46 = vld [vmem:[%s9668_s30 + $0xf0] sm:$0xff] }
 0x412   : > { %v8620_v14 = vpop.f32.mrf.mxu1  ;;  %v8941_v25 = vpop.f32.mrf.mxu0 }
 0x413   : > { %7253 = vst [vmem:[%s11477_s11 + $0xb8] sm:$0xff] %v7221_v7  ;;  %v8621_v36 = vadd.f32 %v8620_v14, %v8619_v30  ;;  %v7219_v37 = vmax.f32 %v7187_v2, 0.0  ;;  %v7064_v50 = vadd.f32 %v7016_v19, %v11752_v3  ;;  %v7062_v61 = vadd.f32 %v7008_v43, %v11753_v45 }
 0x414   : > { %v8622_v41 = vpop.f32.mrf.mxu1  ;;  %v7010_v1 = vpop.f32.mrf.mxu0 }
 0x415   : > { %7251 = vst [vmem:[%s11477_s11 + $0xa8] sm:$0xff] %v7219_v37  ;;  %v7192_v59 = vadd.f32 %v7160_v15, %v7064_v50  ;;  %v7190_v42 = vadd.f32 %v7158_v58, %v7062_v61  ;;  %v7019_v63 = vadd.f32 %v8941_v25, %v8621_v36  ;;  %v7011_v26 = vadd.f32 %v8615_v29, %v7010_v1 }
 0x416   : > { %v8623_v60 = vpop.f32.mrf.mxu1  ;;  %v8944_v51 = vpop.f32.mrf.mxu0 }
 0x417   : > { %v7224_v12 = vmax.f32 %v7192_v59, 0.0  ;;  %v8624_v23 = vadd.f32 %v8623_v60, %v8622_v41  ;;  %v7222_v17 = vmax.f32 %v7190_v42, 0.0  ;;  %v7065_v39 = vadd.f32 %v7019_v63, %v11754_v53 }
 0x418   : > { %v8625_v20 = vpop.f32.mrf.mxu1  ;;  %v7063_v6 = vadd.f32 %v7011_v26, %v11755_v32  ;;  %v7023_v44 = vpop.f32.mrf.mxu0 }
 0x419   : > { %7256 = vst [vmem:[%s11477_s11 + $0xd0] sm:$0xff] %v7224_v12  ;;  %7254 = vst [vmem:[%s11477_s11 + $0xc0] sm:$0xff] %v7222_v17  ;;  %v7193_v21 = vadd.f32 %v7161_v22, %v7065_v39  ;;  %v7024_v4 = vadd.f32 %v8624_v23, %v7023_v44 }
 0x41a   : > { %v8626_v48 = vpop.f32.mrf.mxu1  ;;  %v7191_v24 = vadd.f32 %v7159_v52, %v7063_v6  ;;  %v8945_v33 = vpop.f32.mrf.mxu0 }
 0x41b   : > { %v7225_v62 = vmax.f32 %v7193_v21, 0.0  ;;  %v8627_v0 = vadd.f32 %v8626_v48, %v8625_v20  ;;  %v7066_v38 = vadd.f32 %v7024_v4, %v11421_v5 }
 0x41c   : > { %v7223_v47 = vmax.f32 %v7191_v24, 0.0  ;;  %v8628_v16 = vpop.f32.mrf.mxu1  ;;  %v7026_v10 = vpop.f32.mrf.mxu0 }
 0x41d   : > { %7257 = vst [vmem:[%s11477_s11 + $0xd8] sm:$0xff] %v7225_v62  ;;  %v7194_v55 = vadd.f32 %v7162_v8, %v7066_v38  ;;  %v7027_v40 = vadd.f32 %v8627_v0, %v7026_v10 }
 0x41e   : > { %7255 = vst [vmem:[%s11477_s11 + $0xc8] sm:$0xff] %v7223_v47  ;;  %v8629_v31 = vpop.f32.mrf.mxu1 }
 0x41f   : > { %v8630_v34 = vadd.f32 %v8629_v31, %v8628_v16  ;;  %v7226_v9 = vmax.f32 %v7194_v55, 0.0  ;;  %v7067_v11 = vadd.f32 %v7027_v40, %v11430_v27  ;;  %v7165_v27 = vld [vmem:[%s9668_s30 + $0xf8] sm:$0xff] }
 0x420   : > { %v8631_v35 = vpop.f32.mrf.mxu1 }
 0x421   : > { %v7032_v5 = vadd.f32 %v8944_v51, %v8630_v34  ;;  %7258 = vst [vmem:[%s11477_s11 + $0xe0] sm:$0xff] %v7226_v9  ;;  %v7195_v54 = vadd.f32 %v7163_v28, %v7067_v11 }
 0x422   : > { %v8632_v18 = vpop.f32.mrf.mxu1 }
 0x423   : > { %v7068_v57 = vadd.f32 %v7032_v5, %v11441_v49  ;;  %v8633_v30 = vadd.f32 %v8632_v18, %v8631_v35  ;;  %v7227_v56 = vmax.f32 %v7195_v54, 0.0 }
 0x425   : > { %v7196_v7 = vadd.f32 %v7164_v46, %v7068_v57  ;;  %v7035_v2 = vadd.f32 %v8945_v33, %v8633_v30  ;;  %7259 = vst [vmem:[%s11477_s11 + $0xe8] sm:$0xff] %v7227_v56 }
 0x427   : > { %v7228_v19 = vmax.f32 %v7196_v7, 0.0  ;;  %v7069_v43 = vadd.f32 %v7035_v2, %v11455_v13 }
 0x429   : > { %7260 = vst [vmem:[%s11477_s11 + $0xf0] sm:$0xff] %v7228_v19  ;;  %v7197_v29 = vadd.f32 %v7165_v27, %v7069_v43 }
 0x42b   : > { %v7229_v49 = vmax.f32 %v7197_v29, 0.0 }
 0x42d   : > { %7261 = vst [vmem:[%s11477_s11 + $0xf8] sm:$0xff] %v7229_v49 }
 0x42e   : > { %9437 = shalt.err (!%p9434_p9)
}
 0x42f   : > { %s9438_s30 = scalar_lea.hbm %s11624_s9, 4096  ;;  %s9442_s8 = scalar_lea.hbm %s11675_s5, 8192 }
 0x430   : > { %p9439_p13 = scmp.ne.s32.totalorder %s11624_s9, %s9438_s30  ;;  %p9443_p4 = scmp.lt.s32.totalorder %s11624_s9, %s11675_s5 }
 0x431   : > { %p9444_p8 = scmp.lt.s32.totalorder %s9442_s8, %s9438_s30 }
 0x432   : > { %p9440_p5 = pnand %p9439_p13, %p11756_p10 }
 0x433   : > { %p9445_p3 = por %p9444_p8, %p9443_p4 }
 0x434   : > { %p9441_p0 = pneg %p9440_p5 }
 0x436   : > { %p9446_p11 = pnand %p9445_p3, %p9441_p0 }
 0x438   : > { %9449 = shalt.err (!%p9446_p11)
}
 0x439   : > { %s9503_s12 = smov 128   ;;  %s9504_s6 = smov 8  }
 0x43a   : > { %8956 = dma.vmem_to_hbm [thread:$0]  (%p11756_p10), %s11626_s28, 4096, %s11624_s9, %s7263_s13, %s9503_s12, %s9503_s12, %s9504_s6  }
 0x43b PF: > { %s7291_s7 = sand.u32 1, %s9480_s18   ;;  %p11757_p1 = scmp.ne.s32.totalorder %s11686_s25, 0 }
 0x43c   : > { %p11758_p2 = scmp.ge.s32.totalorder %s9492_s21, 2  ;;  %s7292_s14 = scalar_lea.sflag [#allocation7], %s7291_s7 }
 0x43e   : > { %p8970_p6 = pnand %p11758_p2, %p11757_p1 }
 0x440   : > { %p8971_p12 = pneg %p8970_p6 }
 0x442   : > { %9475 = dma.done.wait (%p8971_p12), %s7292_s14, 4096  }
 0x443   : > { %9477 = vsyncadd (%p8971_p12), %s7292_s14, 4294963200  ;;  %p19_p7 = scmp.ge.s32.totalorder %s9607_s15, 4   ;;  %s11759_s18 = smov %s9484_s19 }
 0x444   : > { %s11760_s19 = smov %s9488_s20  ;;  %s11761_s20 = smov %s9623_s27 }
 0x445   : > { %s11762_s21 = smov %s9607_s15  ;;  %21 = sbr.rel (!%p19_p7) target bundleno = 6 (0x6), region = 101 }
 0x44a   :  { %7297 = vsyncpa [#allocation6], 1 }
 0x44b   :  { %7299 = vsyncpa [#allocation6 + $0x1], 1 }
 0x44c   :  { %7300 = vsyncpa [#allocation9], 1 }
 0x44d   :  { %7301 = vsyncpa [#allocation7], 1 }
 0x44e   :  { %7303 = vsyncpa [#allocation7 + $0x1], 1 }

</bundles_post_ra>
